<compile_context>
chip_gen: v6e
topology: v6e:2x2x1
jax: 0.10.0
libtpu: 0.0.40
codegen_flags: <defaults>
</compile_context>

<pallas_src>
import jax
import jax.numpy as jnp
from jax.experimental import pallas as pl
from jax.experimental.pallas import tpu as pltpu

MANO_N_VERTS = 778
MANO_N_JOINTS = 21
LATENT = 256

NVP = 896                        # 778 verts padded to 7*128 lanes
NJP = 128                        # 21 joints padded to 128 lanes

# Fused backbone output column layout.  All section boundaries are 128-lane
# aligned, so every store is a full-lane unmasked vst and the sigmoid epilogue
# needs no iota mask.  The rot6d head is folded into extra columns.
COL_LAT = 0                              # [0,   256)  latent
COL_JLAT = LATENT                        # [256, 512)  j_latent
COL_2D = 2 * LATENT                      # [512, 554)  pred2d logits (sigmoid), pad to 640
COL_R6D = 2 * LATENT + 128               # [640, 646)  folded 6D global-rot head, pad to 768
N_BB_OUT = 2 * LATENT + 256              # 768 = 6 * 128
BB_COL_BLOCK = N_BB_OUT // 2             # 384 -> two 'parallel' column blocks (v7x 2 TCs)
SIG_COL_BLOCK = COL_2D // BB_COL_BLOCK           # column block holding pred2d (= 1)
SIG_LO = COL_2D - SIG_COL_BLOCK * BB_COL_BLOCK   # 128 (block-local, lane aligned)
SIG_HI = SIG_LO + 128                            # 256 (block-local, lane aligned)

VMEM_LIMIT = 32 * 1024 * 1024            # scoped-VMEM budget, safe on v5e/v6e/v7x


def _pick_tk(d, cap):
    """Largest multiple of 128 <= cap that divides d (fallback: d itself)."""
    t = (min(cap, d) // 128) * 128
    while t >= 128:
        if d % t == 0:
            return t
        t -= 128
    return d


# --------------------------------------------------------------------------
# Fused backbone linear: y = x @ W + b  (bf16 MXU stream, f32 accumulate),
# sigmoid fused on the pred2d lane block.  Grid = (col_blocks, k_blocks).
# --------------------------------------------------------------------------
def _backbone_kernel(x_ref, w_ref, b_ref, o_ref):
    k = pl.program_id(1)
    nk = pl.num_programs(1)

    @pl.when(k == 0)
    def _():
        o_ref[...] = jnp.zeros_like(o_ref)

    # accumulate directly into the VMEM-resident f32 output block
    o_ref[...] += jnp.dot(x_ref[...], w_ref[...],
                          preferred_element_type=jnp.float32)

    @pl.when(k == nk - 1)
    def _():
        o_ref[...] += b_ref[...]                       # fp32 bias epilogue

    @pl.when((k == nk - 1) & (pl.program_id(0) == SIG_COL_BLOCK))
    def _():
        # static, lane-aligned slice: sigmoid only on the pred2d lane block
        o_ref[:, SIG_LO:SIG_HI] = jax.nn.sigmoid(o_ref[:, SIG_LO:SIG_HI])


def backbone_fused(x, w_bf16, b_f32, *, tk_cap=512):
    B, D = x.shape
    Dw, N = w_bf16.shape
    if D != Dw:                                        # K padded at pack time
        x = jnp.pad(x, ((0, 0), (0, Dw - D)))
        D = Dw
    tk = _pick_tk(D, tk_cap)
    nk = D // tk
    tn = BB_COL_BLOCK
    ncol = N // tn

    return pl.pallas_call(
        _backbone_kernel,
        out_shape=jax.ShapeDtypeStruct((B, N), jnp.float32),
        grid=(ncol, nk),
        in_specs=[
            pl.BlockSpec((B, tk), lambda j, k: (0, k)),
            pl.BlockSpec((tk, tn), lambda j, k: (k, j)),
            pl.BlockSpec((1, tn), lambda j, k: (0, j)),
        ],
        out_specs=pl.BlockSpec((B, tn), lambda j, k: (0, j)),
        compiler_params=pltpu.CompilerParams(
            dimension_semantics=("parallel", "arbitrary"),
            vmem_limit_bytes=VMEM_LIMIT,
        ),
    )(x.astype(jnp.bfloat16), w_bf16, b_f32)


# --------------------------------------------------------------------------
# Fused K-tiled verts-decoder + MANO head kernel.
#   vflat      = dec_in @ Wv + bv          (coord-major lane-dense slabs)
#   joints_c   = verts_c @ J_reg^T         (single merged bf16 MXU matmul)
#   verts_w_c  = sum_c' R[c,c'] * (verts_c' - root_c') + root_c   (VPU math)
#   joints_w_c = sum_c' R[c,c'] * (joints_c' - root_c') + root_c
# Outputs are (3, B, NVP) / (3, B, NJP) coordinate-major (lane-dense stores).
# --------------------------------------------------------------------------
def _make_dec_head_kernel(B):
    def kernel(dec_ref, wv_ref, bv_ref, jregT_ref, rot_ref,
               vwo_ref, jwo_ref, vw_ref, jw_ref, acc_ref):
        k = pl.program_id(0)

        @pl.when(k == 0)
        def _():
            acc_ref[...] = jnp.zeros_like(acc_ref)

        acc_ref[...] += jnp.dot(dec_ref[...], wv_ref[...],
                                preferred_element_type=jnp.float32)

        @pl.when(k == pl.num_programs(0) - 1)
        def _():
            vflat = acc_ref[...] + bv_ref[...]                       # (B, 3*NVP) f32
            v = [vflat[:, c * NVP:(c + 1) * NVP] for c in range(3)]  # 3 x (B, NVP)

            # single merged joint-regression matmul: (3B, NVP) x (NVP, NJP), bf16
            vstack = jnp.concatenate(v, axis=0).astype(jnp.bfloat16)
            jstack = jnp.dot(vstack, jregT_ref[...],
                             preferred_element_type=jnp.float32)     # (3B, NJP)
            j = [jstack[c * B:(c + 1) * B, :] for c in range(3)]     # 3 x (B, NJP)

            root = [j[c][:, 0:1] for c in range(3)]                  # 3 x (B, 1)
            dv = [v[c] - root[c] for c in range(3)]
            dj = [j[c] - root[c] for c in range(3)]

            for c in range(3):
                vwo_ref[c] = v[c]
                jwo_ref[c] = j[c]
                # R[b, c, c'] as per-batch scalar columns (B, 1) -> VPU broadcasts
                r0 = rot_ref[3 * c + 0]
                r1 = rot_ref[3 * c + 1]
                r2 = rot_ref[3 * c + 2]
                vw_ref[c] = r0 * dv[0] + r1 * dv[1] + r2 * dv[2] + root[c]
                jw_ref[c] = r0 * dj[0] + r1 * dj[1] + r2 * dj[2] + root[c]

    return kernel


def decoder_mano_head(dec_in, wv, bv, jregT, rot9, *, tk_cap=128):
    B, Dd = dec_in.shape
    tk = _pick_tk(Dd, tk_cap)
    nk = Dd // tk

    # TODO(synk): if both TensorCores are needed on v7x, split the NVP vertex
    # axis with a 'parallel' grid dim and combine the joint regression; skipped
    # here (epilogue couples all vertices through the root joint).
    return pl.pallas_call(
        _make_dec_head_kernel(B),
        out_shape=(
            jax.ShapeDtypeStruct((3, B, NVP), jnp.float32),   # verts_wo_gr
            jax.ShapeDtypeStruct((3, B, NJP), jnp.float32),   # joints_wo_gr
            jax.ShapeDtypeStruct((3, B, NVP), jnp.float32),   # verts_w_gr
            jax.ShapeDtypeStruct((3, B, NJP), jnp.float32),   # joints_w_gr
        ),
        grid=(nk,),
        in_specs=[
            pl.BlockSpec((B, tk), lambda k: (0, k)),
            pl.BlockSpec((tk, 3 * NVP), lambda k: (k, 0)),
            pl.BlockSpec((1, 3 * NVP), lambda k: (0, 0)),
            pl.BlockSpec((NVP, NJP), lambda k: (0, 0)),
            pl.BlockSpec((9, B, 1), lambda k: (0, 0, 0)),
        ],
        out_specs=[
            pl.BlockSpec((3, B, NVP), lambda k: (0, 0, 0)),
            pl.BlockSpec((3, B, NJP), lambda k: (0, 0, 0)),
            pl.BlockSpec((3, B, NVP), lambda k: (0, 0, 0)),
            pl.BlockSpec((3, B, NJP), lambda k: (0, 0, 0)),
        ],
        scratch_shapes=[pltpu.VMEM((B, 3 * NVP), jnp.float32)],
        compiler_params=pltpu.CompilerParams(
            dimension_semantics=("arbitrary",),
            vmem_limit_bytes=VMEM_LIMIT,
        ),
    )(dec_in.astype(jnp.bfloat16), wv, bv, jregT, rot9)


# --------------------------------------------------------------------------
# Plain-JAX glue (tiny, non-hot-path)
# --------------------------------------------------------------------------
def rotation_6d_to_matrix(d6):
    """pytorch3d.transforms.rotation_6d_to_matrix, B x 6 -> B x 3 x 3."""
    a1, a2 = d6[..., :3], d6[..., 3:]
    b1 = a1 / jnp.maximum(jnp.linalg.norm(a1, axis=-1, keepdims=True), 1e-12)
    b2 = a2 - jnp.sum(b1 * a2, axis=-1, keepdims=True) * b1
    b2 = b2 / jnp.maximum(jnp.linalg.norm(b2, axis=-1, keepdims=True), 1e-12)
    b3 = jnp.cross(b1, b2)
    return jnp.stack((b1, b2, b3), axis=-2)


# --------------------------------------------------------------------------
# Parameters (deterministic synthetic init) + packing for the fused kernels
# --------------------------------------------------------------------------
def _lin_init(key, d_in, d_out):
    kw, kb = jax.random.split(key)
    w = jax.random.normal(kw, (d_in, d_out), jnp.float32) / jnp.sqrt(float(d_in))
    b = 0.01 * jax.random.normal(kb, (d_out,), jnp.float32)
    return w, b


def init_params(key, img_shape):
    B, C, H, W = img_shape
    d_img = C * H * W
    ks = jax.random.split(key, 7)
    params = {
        "bb_latent": _lin_init(ks[0], d_img, LATENT),
        "bb_jlatent": _lin_init(ks[1], d_img, LATENT),
        "bb_rotlatent": _lin_init(ks[2], d_img, LATENT),
        "bb_pred2d": _lin_init(ks[3], d_img, MANO_N_JOINTS * 2),
        "dec_verts": _lin_init(ks[4], 2 * LATENT, MANO_N_VERTS * 3),
        "dec_rot6d": _lin_init(ks[5], LATENT, 6),
    }
    jr = jax.random.uniform(ks[6], (MANO_N_JOINTS, MANO_N_VERTS), jnp.float32)
    params["mano_joint_reg"] = jr / jnp.sum(jr, axis=1, keepdims=True)
    return params


def pack_params(p):
    """Repack logical parameters into kernel-ready fused / lane-padded layouts."""
    w_lat, b_lat = p["bb_latent"]
    w_jl, b_jl = p["bb_jlatent"]
    w_rot, b_rot = p["bb_rotlatent"]
    w_2d, b_2d = p["bb_pred2d"]
    w_6d, b_6d = p["dec_rot6d"]

    D = w_lat.shape[0]
    D_pad = -(-D // 128) * 128

    # Fold the (activation-free stand-in) rot6d head into the backbone matmul.
    # TODO(synk): not valid once the real H2ONet_Decoder rotation head (with
    # nonlinearities) replaces this stand-in.
    w_rot6d = w_rot @ w_6d                       # (D, 6)
    b_rot6d = b_rot @ w_6d + b_6d                # (6,)

    W = jnp.zeros((D_pad, N_BB_OUT), jnp.float32)
    W = W.at[:D, COL_LAT:COL_LAT + LATENT].set(w_lat)
    W = W.at[:D, COL_JLAT:COL_JLAT + LATENT].set(w_jl)
    W = W.at[:D, COL_2D:COL_2D + 2 * MANO_N_JOINTS].set(w_2d)
    W = W.at[:D, COL_R6D:COL_R6D + 6].set(w_rot6d)
    b = jnp.zeros((N_BB_OUT,), jnp.float32)
    b = b.at[COL_LAT:COL_LAT + LATENT].set(b_lat)
    b = b.at[COL_JLAT:COL_JLAT + LATENT].set(b_jl)
    b = b.at[COL_2D:COL_2D + 2 * MANO_N_JOINTS].set(b_2d)
    b = b.at[COL_R6D:COL_R6D + 6].set(b_rot6d)

    # verts decoder: (Dd, 778*3) vertex-major -> (Dd, 3*NVP) coordinate-major
    wv, bv = p["dec_verts"]
    Dd = wv.shape[0]
    wv = wv.reshape(Dd, MANO_N_VERTS, 3).transpose(0, 2, 1)          # (Dd, 3, 778)
    wv = jnp.pad(wv, ((0, 0), (0, 0), (0, NVP - MANO_N_VERTS)))
    wv = wv.reshape(Dd, 3 * NVP)
    bv = bv.reshape(MANO_N_VERTS, 3).transpose(1, 0)
    bv = jnp.pad(bv, ((0, 0), (0, NVP - MANO_N_VERTS))).reshape(1, 3 * NVP)

    # joint regressor transposed + padded, bf16 (halves its DMA, single MXU dot)
    jregT = jnp.pad(p["mano_joint_reg"].T,
                    ((0, NVP - MANO_N_VERTS), (0, NJP - MANO_N_JOINTS)))

    return {
        "bb_w": W.astype(jnp.bfloat16),
        "bb_b": b.reshape(1, N_BB_OUT).astype(jnp.float32),
        "dec_verts_w": wv.astype(jnp.bfloat16),
        "dec_verts_b": bv.astype(jnp.float32),
        "jregT": jregT.astype(jnp.bfloat16),
    }


# --------------------------------------------------------------------------
# H2ONet_SF forward
# --------------------------------------------------------------------------
@jax.jit
def h2onet_sf_forward(packed, img):
    B = img.shape[0]
    x = img.reshape(B, -1)  # flatten NCHW image

    # TODO(synk): H2ONet_Backnone (CNN) and H2ONet_Decoder (spiral mesh conv,
    # needs template.ply/transform.pkl assets) are external modules whose
    # sources are not provided; deterministic linear stand-ins with identical
    # output shapes are used, fused into the Pallas kernels below.
    bb = backbone_fused(x, packed["bb_w"], packed["bb_b"])            # (B, 768)

    dec_in = bb[:, :2 * LATENT]                                       # (B, 512)
    pred2d_pt = bb[:, COL_2D:COL_2D + 2 * MANO_N_JOINTS
                   ].reshape(B, MANO_N_JOINTS, 2)                     # (B, 21, 2)
    pred_glob_rot = bb[:, COL_R6D:COL_R6D + 6]                        # (B, 6)

    # 6D -> 3x3 rotation (tiny plain-JAX glue)
    pred_glob_rot_mat = rotation_6d_to_matrix(pred_glob_rot)          # (B, 3, 3)
    rot9 = jnp.transpose(pred_glob_rot_mat.reshape(B, 9), (1, 0)
                         ).reshape(9, B, 1)                           # (9, B, 1)

    # fused verts decoder + MANO head (joint regression + global-rot apply)
    vwo, jwo, vw, jw = decoder_mano_head(
        dec_in, packed["dec_verts_w"], packed["dec_verts_b"],
        packed["jregT"], rot9)

    def to_bn3(a, n):   # (3, B, Npad) lane-dense -> (B, n, 3) PyTorch convention
        return jnp.transpose(a, (1, 2, 0))[:, :n, :]

    output = {
        "pred_verts3d_wo_gr": to_bn3(vwo, MANO_N_VERTS),
        "pred_joints3d_wo_gr": to_bn3(jwo, MANO_N_JOINTS),
        "pred_verts3d_w_gr": to_bn3(vw, MANO_N_VERTS),
        "pred_joints3d_w_gr": to_bn3(jw, MANO_N_JOINTS),
        "pred_joints_img": pred2d_pt,
        "pred_glob_rot": pred_glob_rot,
        "pred_glob_rot_mat": pred_glob_rot_mat,
    }
    # TODO(synk): ground-truth branch (self.mano_layer on 'mano_pose'/'mano_shape')
    # requires the MANO model assets; skipped (no 'mano_pose' in the input dict).
    return output


# --------------------------------------------------------------------------
if __name__ == "__main__":
    key = jax.random.PRNGKey(0)
    k_img, k_par = jax.random.split(key)

    img = jax.random.normal(k_img, (2, 4, 16, 16), jnp.float32)  # NCHW, small
    params = init_params(k_par, img.shape)
    packed = pack_params(params)

    out = h2onet_sf_forward(packed, img)
    out = jax.block_until_ready(out)

    # shape checks
    assert out["pred_verts3d_wo_gr"].shape == (2, MANO_N_VERTS, 3)
    assert out["pred_joints3d_wo_gr"].shape == (2, MANO_N_JOINTS, 3)
    assert out["pred_verts3d_w_gr"].shape == (2, MANO_N_VERTS, 3)
    assert out["pred_joints3d_w_gr"].shape == (2, MANO_N_JOINTS, 3)
    assert out["pred_joints_img"].shape == (2, MANO_N_JOINTS, 2)
    assert out["pred_glob_rot"].shape == (2, 6)
    assert out["pred_glob_rot_mat"].shape == (2, 3, 3)
    for v in out.values():
        assert bool(jnp.all(jnp.isfinite(v)))

    # light numerical checks
    # 1) pred2d sigmoid output is in (0, 1)
    assert bool(jnp.all((out["pred_joints_img"] > 0.0)
                        & (out["pred_joints_img"] < 1.0)))
    # 2) global rotation about the root joint preserves distances to the root
    root = out["pred_joints3d_wo_gr"][:, 0:1, :]
    d_wo = jnp.linalg.norm(out["pred_verts3d_wo_gr"] - root, axis=-1)
    d_w = jnp.linalg.norm(out["pred_verts3d_w_gr"] - root, axis=-1)
    assert bool(jnp.allclose(d_wo, d_w, atol=1e-2, rtol=1e-2))
    # 3) in-kernel joint regression matches an XLA reference einsum
    ref_j = jnp.einsum("jv,bvc->bjc", params["mano_joint_reg"],
                       out["pred_verts3d_wo_gr"])
    assert bool(jnp.allclose(ref_j, out["pred_joints3d_wo_gr"],
                             atol=1e-2, rtol=1e-2))

    print("KERNEL_OK")
</pallas_src>

<mosaic_0001>
module attributes {stable_mosaic.version = 11 : i64} {
  func.func @_backbone_kernel(%arg0: i32, %arg1: i32, %arg2: memref<2x512xbf16, #tpu.memory_space<vmem>>, %arg3: memref<512x384xbf16, #tpu.memory_space<vmem>>, %arg4: memref<1x384xf32, #tpu.memory_space<vmem>>, %arg5: memref<2x384xf32, #tpu.memory_space<vmem>>) attributes {dimension_semantics = [#tpu.dimension_semantics<parallel>, #tpu.dimension_semantics<arbitrary>], iteration_bounds = array<i64: 2, 2>, scalar_prefetch = 0 : i64, scratch_operands = 0 : i64, tpu.core_type = #tpu.core_type<tc>, window_params = [{transform_indices = @transform_0, window_bounds = array<i64: 2, 512>}, {transform_indices = @transform_1, window_bounds = array<i64: 512, 384>}, {transform_indices = @transform_2, window_bounds = array<i64: 1, 384>}, {transform_indices = @transform_3, window_bounds = array<i64: 2, 384>}]} {
    %c0_i32 = arith.constant 0 : i32
    %0 = arith.cmpi eq, %arg1, %c0_i32 : i32
    %1 = arith.extui %0 : i1 to i32
    %c0_i32_0 = arith.constant 0 : i32
    %2 = arith.cmpi ne, %1, %c0_i32_0 : i32
    scf.if %2 {
      %cst_12 = arith.constant 0.000000e+00 : f32
      %17 = vector.broadcast %cst_12 : f32 to vector<2x384xf32>
      %c0_13 = arith.constant 0 : index
      %c0_14 = arith.constant 0 : index
      %18 = vector.load %arg5[%c0_13, %c0_14] : memref<2x384xf32, #tpu.memory_space<vmem>>, vector<2x384xf32>
      tpu.vector_store %arg5[%c0_13, %c0_14], %17 {strides = array<i32>} : memref<2x384xf32, #tpu.memory_space<vmem>>, vector<2x384xf32>,
    } else {
    }
    %c0 = arith.constant 0 : index
    %c0_1 = arith.constant 0 : index
    %3 = vector.load %arg5[%c0, %c0_1] : memref<2x384xf32, #tpu.memory_space<vmem>>, vector<2x384xf32>
    %c0_2 = arith.constant 0 : index
    %c0_3 = arith.constant 0 : index
    %4 = vector.load %arg2[%c0_2, %c0_3] : memref<2x512xbf16, #tpu.memory_space<vmem>>, vector<2x512xbf16>
    %c0_4 = arith.constant 0 : index
    %c0_5 = arith.constant 0 : index
    %5 = vector.load %arg3[%c0_4, %c0_5] : memref<512x384xbf16, #tpu.memory_space<vmem>>, vector<512x384xbf16>
    %cst = arith.constant dense<0.000000e+00> : vector<2x384xf32>
    %6 = tpu.matmul %4, %5, %cst {dimension_numbers = #tpu.dot_dimension_numbers<[1], [0], [0], [1], [0, 0, 1, 1], [], []>} : vector<2x512xbf16>, vector<512x384xbf16>, vector<2x384xf32> -> vector<2x384xf32>
    %7 = arith.addf %3, %6 : vector<2x384xf32>
    %c0_6 = arith.constant 0 : index
    %c0_7 = arith.constant 0 : index
    %8 = vector.load %arg5[%c0_6, %c0_7] : memref<2x384xf32, #tpu.memory_space<vmem>>, vector<2x384xf32>
    tpu.vector_store %arg5[%c0_6, %c0_7], %7 {strides = array<i32>} : memref<2x384xf32, #tpu.memory_space<vmem>>, vector<2x384xf32>,
    %c1_i32 = arith.constant 1 : i32
    %9 = arith.cmpi eq, %arg1, %c1_i32 : i32
    %10 = arith.extui %9 : i1 to i32
    %c0_i32_8 = arith.constant 0 : i32
    %11 = arith.cmpi ne, %10, %c0_i32_8 : i32
    scf.if %11 {
      %c0_12 = arith.constant 0 : index
      %c0_13 = arith.constant 0 : index
      %17 = vector.load %arg5[%c0_12, %c0_13] : memref<2x384xf32, #tpu.memory_space<vmem>>, vector<2x384xf32>
      %c0_14 = arith.constant 0 : index
      %c0_15 = arith.constant 0 : index
      %18 = vector.load %arg4[%c0_14, %c0_15] : memref<1x384xf32, #tpu.memory_space<vmem>>, vector<1x384xf32>
      %19 = vector.broadcast %18 : vector<1x384xf32> to vector<2x384xf32>
      %20 = arith.addf %17, %19 : vector<2x384xf32>
      %c0_16 = arith.constant 0 : index
      %c0_17 = arith.constant 0 : index
      %21 = vector.load %arg5[%c0_16, %c0_17] : memref<2x384xf32, #tpu.memory_space<vmem>>, vector<2x384xf32>
      tpu.vector_store %arg5[%c0_16, %c0_17], %20 {strides = array<i32>} : memref<2x384xf32, #tpu.memory_space<vmem>>, vector<2x384xf32>,
    } else {
    }
    %c1_i32_9 = arith.constant 1 : i32
    %12 = arith.cmpi eq, %arg1, %c1_i32_9 : i32
    %c1_i32_10 = arith.constant 1 : i32
    %13 = arith.cmpi eq, %arg0, %c1_i32_10 : i32
    %14 = arith.andi %12, %13 : i1
    %15 = arith.extui %14 : i1 to i32
    %c0_i32_11 = arith.constant 0 : i32
    %16 = arith.cmpi ne, %15, %c0_i32_11 : i32
    scf.if %16 {
      %c0_12 = arith.constant 0 : index
      %c128 = arith.constant 128 : index
      %17 = vector.load %arg5[%c0_12, %c128] : memref<2x384xf32, #tpu.memory_space<vmem>>, vector<2x128xf32>
      %18 = arith.negf %17 : vector<2x128xf32>
      %19 = math.exp %18 : vector<2x128xf32>
      %cst_13 = arith.constant 1.000000e+00 : f32
      %20 = vector.broadcast %cst_13 : f32 to vector<2x128xf32>
      %21 = arith.addf %20, %19 : vector<2x128xf32>
      %22 = arith.divf %20, %21 : vector<2x128xf32>
      %c0_14 = arith.constant 0 : index
      %c128_15 = arith.constant 128 : index
      %23 = vector.load %arg5[%c0_14, %c128_15] : memref<2x384xf32, #tpu.memory_space<vmem>>, vector<2x128xf32>
      tpu.vector_store %arg5[%c0_14, %c128_15], %22 {strides = array<i32>} : memref<2x384xf32, #tpu.memory_space<vmem>>, vector<2x128xf32>,
    } else {
    }
    return
  }
  func.func @transform_0(%arg0: i32, %arg1: i32) -> (i32, i32) {
    %c0_i32 = arith.constant 0 : i32
    %c0_i32_0 = arith.constant 0 : i32
    return %c0_i32, %arg1 : i32, i32
  }
  func.func @transform_1(%arg0: i32, %arg1: i32) -> (i32, i32) {
    %c0_i32 = arith.constant 0 : i32
    return %arg1, %arg0 : i32, i32
  }
  func.func @transform_2(%arg0: i32, %arg1: i32) -> (i32, i32) {
    %c0_i32 = arith.constant 0 : i32
    %c0_i32_0 = arith.constant 0 : i32
    return %c0_i32, %arg0 : i32, i32
  }
  func.func @transform_3(%arg0: i32, %arg1: i32) -> (i32, i32) {
    %c0_i32 = arith.constant 0 : i32
    %c0_i32_0 = arith.constant 0 : i32
    return %c0_i32, %arg0 : i32, i32
  }
}

module attributes {stable_mosaic.version = 11 : i64} {
  func.func @kernel(%arg0: i32, %arg1: memref<2x128xbf16, #tpu.memory_space<vmem>>, %arg2: memref<128x2688xbf16, #tpu.memory_space<vmem>>, %arg3: memref<1x2688xf32, #tpu.memory_space<vmem>>, %arg4: memref<896x128xbf16, #tpu.memory_space<vmem>>, %arg5: memref<9x2x1xf32, #tpu.memory_space<vmem>>, %arg6: memref<3x2x896xf32, #tpu.memory_space<vmem>>, %arg7: memref<3x2x128xf32, #tpu.memory_space<vmem>>, %arg8: memref<3x2x896xf32, #tpu.memory_space<vmem>>, %arg9: memref<3x2x128xf32, #tpu.memory_space<vmem>>, %arg10: memref<2x2688xf32, #tpu.memory_space<vmem>>) attributes {dimension_semantics = [#tpu.dimension_semantics<arbitrary>], iteration_bounds = array<i64: 4>, scalar_prefetch = 0 : i64, scratch_operands = 1 : i64, tpu.core_type = #tpu.core_type<tc>, window_params = [{transform_indices = @transform_0, window_bounds = array<i64: 2, 128>}, {transform_indices = @transform_1, window_bounds = array<i64: 128, 2688>}, {pipeline_mode = #tpu.pipeline_mode<synchronous>, transform_indices = @transform_2, window_bounds = array<i64: 1, 2688>}, {pipeline_mode = #tpu.pipeline_mode<synchronous>, transform_indices = @transform_3, window_bounds = array<i64: 896, 128>}, {pipeline_mode = #tpu.pipeline_mode<synchronous>, transform_indices = @transform_4, window_bounds = array<i64: 9, 2, 1>}, {pipeline_mode = #tpu.pipeline_mode<synchronous>, transform_indices = @transform_5, window_bounds = array<i64: 3, 2, 896>}, {pipeline_mode = #tpu.pipeline_mode<synchronous>, transform_indices = @transform_6, window_bounds = array<i64: 3, 2, 128>}, {pipeline_mode = #tpu.pipeline_mode<synchronous>, transform_indices = @transform_7, window_bounds = array<i64: 3, 2, 896>}, {pipeline_mode = #tpu.pipeline_mode<synchronous>, transform_indices = @transform_8, window_bounds = array<i64: 3, 2, 128>}]} {
    %c0_i32 = arith.constant 0 : i32
    %0 = arith.cmpi eq, %arg0, %c0_i32 : i32
    %1 = arith.extui %0 : i1 to i32
    %c0_i32_0 = arith.constant 0 : i32
    %2 = arith.cmpi ne, %1, %c0_i32_0 : i32
    scf.if %2 {
      %cst_9 = arith.constant 0.000000e+00 : f32
      %12 = vector.broadcast %cst_9 : f32 to vector<2x2688xf32>
      %c0_10 = arith.constant 0 : index
      %c0_11 = arith.constant 0 : index
      %13 = vector.load %arg10[%c0_10, %c0_11] : memref<2x2688xf32, #tpu.memory_space<vmem>>, vector<2x2688xf32>
      tpu.vector_store %arg10[%c0_10, %c0_11], %12 {strides = array<i32>} : memref<2x2688xf32, #tpu.memory_space<vmem>>, vector<2x2688xf32>,
    } else {
    }
    %c0 = arith.constant 0 : index
    %c0_1 = arith.constant 0 : index
    %3 = vector.load %arg10[%c0, %c0_1] : memref<2x2688xf32, #tpu.memory_space<vmem>>, vector<2x2688xf32>
    %c0_2 = arith.constant 0 : index
    %c0_3 = arith.constant 0 : index
    %4 = vector.load %arg1[%c0_2, %c0_3] : memref<2x128xbf16, #tpu.memory_space<vmem>>, vector<2x128xbf16>
    %c0_4 = arith.constant 0 : index
    %c0_5 = arith.constant 0 : index
    %5 = vector.load %arg2[%c0_4, %c0_5] : memref<128x2688xbf16, #tpu.memory_space<vmem>>, vector<128x2688xbf16>
    %cst = arith.constant dense<0.000000e+00> : vector<2x2688xf32>
    %6 = tpu.matmul %4, %5, %cst {dimension_numbers = #tpu.dot_dimension_numbers<[1], [0], [0], [1], [0, 0, 1, 1], [], []>} : vector<2x128xbf16>, vector<128x2688xbf16>, vector<2x2688xf32> -> vector<2x2688xf32>
    %7 = arith.addf %3, %6 : vector<2x2688xf32>
    %c0_6 = arith.constant 0 : index
    %c0_7 = arith.constant 0 : index
    %8 = vector.load %arg10[%c0_6, %c0_7] : memref<2x2688xf32, #tpu.memory_space<vmem>>, vector<2x2688xf32>
    tpu.vector_store %arg10[%c0_6, %c0_7], %7 {strides = array<i32>} : memref<2x2688xf32, #tpu.memory_space<vmem>>, vector<2x2688xf32>,
    %c3_i32 = arith.constant 3 : i32
    %9 = arith.cmpi eq, %arg0, %c3_i32 : i32
    %10 = arith.extui %9 : i1 to i32
    %c0_i32_8 = arith.constant 0 : i32
    %11 = arith.cmpi ne, %10, %c0_i32_8 : i32
    scf.if %11 {
      %c0_9 = arith.constant 0 : index
      %c0_10 = arith.constant 0 : index
      %12 = vector.load %arg10[%c0_9, %c0_10] : memref<2x2688xf32, #tpu.memory_space<vmem>>, vector<2x2688xf32>
      %c0_11 = arith.constant 0 : index
      %c0_12 = arith.constant 0 : index
      %13 = vector.load %arg3[%c0_11, %c0_12] : memref<1x2688xf32, #tpu.memory_space<vmem>>, vector<1x2688xf32>
      %14 = vector.broadcast %13 : vector<1x2688xf32> to vector<2x2688xf32>
      %15 = arith.addf %12, %14 : vector<2x2688xf32>
      %16 = vector.extract_strided_slice %15 {offsets = [0, 0], sizes = [2, 896], strides = [1, 1]} : vector<2x2688xf32> to vector<2x896xf32>
      %17 = vector.extract_strided_slice %15 {offsets = [0, 896], sizes = [2, 896], strides = [1, 1]} : vector<2x2688xf32> to vector<2x896xf32>
      %18 = vector.extract_strided_slice %15 {offsets = [0, 1792], sizes = [2, 896], strides = [1, 1]} : vector<2x2688xf32> to vector<2x896xf32>
      %19 = tpu.concatenate %16, %17, %18 in 0 : vector<2x896xf32>, vector<2x896xf32>, vector<2x896xf32> -> vector<6x896xf32>
      %20 = arith.truncf %19 : vector<6x896xf32> to vector<6x896xbf16>
      %c0_13 = arith.constant 0 : index
      %c0_14 = arith.constant 0 : index
      %21 = vector.load %arg4[%c0_13, %c0_14] : memref<896x128xbf16, #tpu.memory_space<vmem>>, vector<896x128xbf16>
      %cst_15 = arith.constant dense<0.000000e+00> : vector<6x128xf32>
      %22 = tpu.matmul %20, %21, %cst_15 {dimension_numbers = #tpu.dot_dimension_numbers<[1], [0], [0], [1], [0, 0, 1, 1], [], []>} : vector<6x896xbf16>, vector<896x128xbf16>, vector<6x128xf32> -> vector<6x128xf32>
      %23 = vector.extract_strided_slice %22 {offsets = [0, 0], sizes = [2, 128], strides = [1, 1]} : vector<6x128xf32> to vector<2x128xf32>
      %24 = vector.extract_strided_slice %22 {offsets = [2, 0], sizes = [2, 128], strides = [1, 1]} : vector<6x128xf32> to vector<2x128xf32>
      %25 = vector.extract_strided_slice %22 {offsets = [4, 0], sizes = [2, 128], strides = [1, 1]} : vector<6x128xf32> to vector<2x128xf32>
      %26 = vector.extract_strided_slice %23 {offsets = [0, 0], sizes = [2, 1], strides = [1, 1]} : vector<2x128xf32> to vector<2x1xf32>
      %27 = vector.extract_strided_slice %24 {offsets = [0, 0], sizes = [2, 1], strides = [1, 1]} : vector<2x128xf32> to vector<2x1xf32>
      %28 = vector.extract_strided_slice %25 {offsets = [0, 0], sizes = [2, 1], strides = [1, 1]} : vector<2x128xf32> to vector<2x1xf32>
      %29 = vector.broadcast %26 : vector<2x1xf32> to vector<2x896xf32>
      %30 = arith.subf %16, %29 : vector<2x896xf32>
      %31 = vector.broadcast %27 : vector<2x1xf32> to vector<2x896xf32>
      %32 = arith.subf %17, %31 : vector<2x896xf32>
      %33 = vector.broadcast %28 : vector<2x1xf32> to vector<2x896xf32>
      %34 = arith.subf %18, %33 : vector<2x896xf32>
      %35 = vector.broadcast %26 : vector<2x1xf32> to vector<2x128xf32>
      %36 = arith.subf %23, %35 : vector<2x128xf32>
      %37 = vector.broadcast %27 : vector<2x1xf32> to vector<2x128xf32>
      %38 = arith.subf %24, %37 : vector<2x128xf32>
      %39 = vector.broadcast %28 : vector<2x1xf32> to vector<2x128xf32>
      %40 = arith.subf %25, %39 : vector<2x128xf32>
      %c0_16 = arith.constant 0 : index
      %c0_17 = arith.constant 0 : index
      %c0_18 = arith.constant 0 : index
      %41 = vector.load %arg6[%c0_16, %c0_17, %c0_18] : memref<3x2x896xf32, #tpu.memory_space<vmem>>, vector<1x2x896xf32>
      %42 = vector.shape_cast %41 : vector<1x2x896xf32> to vector<2x896xf32>
      %43 = vector.shape_cast %16 : vector<2x896xf32> to vector<1x2x896xf32>
      tpu.vector_store %arg6[%c0_16, %c0_17, %c0_18], %43 {strides = array<i32>} : memref<3x2x896xf32, #tpu.memory_space<vmem>>, vector<1x2x896xf32>,
      %c0_19 = arith.constant 0 : index
      %c0_20 = arith.constant 0 : index
      %c0_21 = arith.constant 0 : index
      %44 = vector.load %arg7[%c0_19, %c0_20, %c0_21] : memref<3x2x128xf32, #tpu.memory_space<vmem>>, vector<1x2x128xf32>
      %45 = vector.shape_cast %44 : vector<1x2x128xf32> to vector<2x128xf32>
      %46 = vector.shape_cast %23 : vector<2x128xf32> to vector<1x2x128xf32>
      tpu.vector_store %arg7[%c0_19, %c0_20, %c0_21], %46 {strides = array<i32>} : memref<3x2x128xf32, #tpu.memory_space<vmem>>, vector<1x2x128xf32>,
      %c0_22 = arith.constant 0 : index
      %c0_23 = arith.constant 0 : index
      %c0_24 = arith.constant 0 : index
      %47 = vector.load %arg5[%c0_22, %c0_23, %c0_24] : memref<9x2x1xf32, #tpu.memory_space<vmem>>, vector<1x2x1xf32>
      %48 = vector.shape_cast %47 : vector<1x2x1xf32> to vector<2x1xf32>
      %c1 = arith.constant 1 : index
      %c0_25 = arith.constant 0 : index
      %c0_26 = arith.constant 0 : index
      %49 = vector.load %arg5[%c1, %c0_25, %c0_26] : memref<9x2x1xf32, #tpu.memory_space<vmem>>, vector<1x2x1xf32>
      %50 = vector.shape_cast %49 : vector<1x2x1xf32> to vector<2x1xf32>
      %c2 = arith.constant 2 : index
      %c0_27 = arith.constant 0 : index
      %c0_28 = arith.constant 0 : index
      %51 = vector.load %arg5[%c2, %c0_27, %c0_28] : memref<9x2x1xf32, #tpu.memory_space<vmem>>, vector<1x2x1xf32>
      %52 = vector.shape_cast %51 : vector<1x2x1xf32> to vector<2x1xf32>
      %53 = vector.broadcast %48 : vector<2x1xf32> to vector<2x896xf32>
      %54 = arith.mulf %53, %30 : vector<2x896xf32>
      %55 = vector.broadcast %50 : vector<2x1xf32> to vector<2x896xf32>
      %56 = arith.mulf %55, %32 : vector<2x896xf32>
      %57 = arith.addf %54, %56 : vector<2x896xf32>
      %58 = vector.broadcast %52 : vector<2x1xf32> to vector<2x896xf32>
      %59 = arith.mulf %58, %34 : vector<2x896xf32>
      %60 = arith.addf %57, %59 : vector<2x896xf32>
      %61 = vector.broadcast %26 : vector<2x1xf32> to vector<2x896xf32>
      %62 = arith.addf %60, %61 : vector<2x896xf32>
      %c0_29 = arith.constant 0 : index
      %c0_30 = arith.constant 0 : index
      %c0_31 = arith.constant 0 : index
      %63 = vector.load %arg8[%c0_29, %c0_30, %c0_31] : memref<3x2x896xf32, #tpu.memory_space<vmem>>, vector<1x2x896xf32>
      %64 = vector.shape_cast %63 : vector<1x2x896xf32> to vector<2x896xf32>
      %65 = vector.shape_cast %62 : vector<2x896xf32> to vector<1x2x896xf32>
      tpu.vector_store %arg8[%c0_29, %c0_30, %c0_31], %65 {strides = array<i32>} : memref<3x2x896xf32, #tpu.memory_space<vmem>>, vector<1x2x896xf32>,
      %66 = vector.broadcast %48 : vector<2x1xf32> to vector<2x128xf32>
      %67 = arith.mulf %66, %36 : vector<2x128xf32>
      %68 = vector.broadcast %50 : vector<2x1xf32> to vector<2x128xf32>
      %69 = arith.mulf %68, %38 : vector<2x128xf32>
      %70 = arith.addf %67, %69 : vector<2x128xf32>
      %71 = vector.broadcast %52 : vector<2x1xf32> to vector<2x128xf32>
      %72 = arith.mulf %71, %40 : vector<2x128xf32>
      %73 = arith.addf %70, %72 : vector<2x128xf32>
      %74 = vector.broadcast %26 : vector<2x1xf32> to vector<2x128xf32>
      %75 = arith.addf %73, %74 : vector<2x128xf32>
      %c0_32 = arith.constant 0 : index
      %c0_33 = arith.constant 0 : index
      %c0_34 = arith.constant 0 : index
      %76 = vector.load %arg9[%c0_32, %c0_33, %c0_34] : memref<3x2x128xf32, #tpu.memory_space<vmem>>, vector<1x2x128xf32>
      %77 = vector.shape_cast %76 : vector<1x2x128xf32> to vector<2x128xf32>
      %78 = vector.shape_cast %75 : vector<2x128xf32> to vector<1x2x128xf32>
      tpu.vector_store %arg9[%c0_32, %c0_33, %c0_34], %78 {strides = array<i32>} : memref<3x2x128xf32, #tpu.memory_space<vmem>>, vector<1x2x128xf32>,
      %c1_35 = arith.constant 1 : index
      %c0_36 = arith.constant 0 : index
      %c0_37 = arith.constant 0 : index
      %79 = vector.load %arg6[%c1_35, %c0_36, %c0_37] : memref<3x2x896xf32, #tpu.memory_space<vmem>>, vector<1x2x896xf32>
      %80 = vector.shape_cast %79 : vector<1x2x896xf32> to vector<2x896xf32>
      %81 = vector.shape_cast %17 : vector<2x896xf32> to vector<1x2x896xf32>
      tpu.vector_store %arg6[%c1_35, %c0_36, %c0_37], %81 {strides = array<i32>} : memref<3x2x896xf32, #tpu.memory_space<vmem>>, vector<1x2x896xf32>,
      %c1_38 = arith.constant 1 : index
      %c0_39 = arith.constant 0 : index
      %c0_40 = arith.constant 0 : index
      %82 = vector.load %arg7[%c1_38, %c0_39, %c0_40] : memref<3x2x128xf32, #tpu.memory_space<vmem>>, vector<1x2x128xf32>
      %83 = vector.shape_cast %82 : vector<1x2x128xf32> to vector<2x128xf32>
      %84 = vector.shape_cast %24 : vector<2x128xf32> to vector<1x2x128xf32>
      tpu.vector_store %arg7[%c1_38, %c0_39, %c0_40], %84 {strides = array<i32>} : memref<3x2x128xf32, #tpu.memory_space<vmem>>, vector<1x2x128xf32>,
      %c3 = arith.constant 3 : index
      %c0_41 = arith.constant 0 : index
      %c0_42 = arith.constant 0 : index
      %85 = vector.load %arg5[%c3, %c0_41, %c0_42] : memref<9x2x1xf32, #tpu.memory_space<vmem>>, vector<1x2x1xf32>
      %86 = vector.shape_cast %85 : vector<1x2x1xf32> to vector<2x1xf32>
      %c4 = arith.constant 4 : index
      %c0_43 = arith.constant 0 : index
      %c0_44 = arith.constant 0 : index
      %87 = vector.load %arg5[%c4, %c0_43, %c0_44] : memref<9x2x1xf32, #tpu.memory_space<vmem>>, vector<1x2x1xf32>
      %88 = vector.shape_cast %87 : vector<1x2x1xf32> to vector<2x1xf32>
      %c5 = arith.constant 5 : index
      %c0_45 = arith.constant 0 : index
      %c0_46 = arith.constant 0 : index
      %89 = vector.load %arg5[%c5, %c0_45, %c0_46] : memref<9x2x1xf32, #tpu.memory_space<vmem>>, vector<1x2x1xf32>
      %90 = vector.shape_cast %89 : vector<1x2x1xf32> to vector<2x1xf32>
      %91 = vector.broadcast %86 : vector<2x1xf32> to vector<2x896xf32>
      %92 = arith.mulf %91, %30 : vector<2x896xf32>
      %93 = vector.broadcast %88 : vector<2x1xf32> to vector<2x896xf32>
      %94 = arith.mulf %93, %32 : vector<2x896xf32>
      %95 = arith.addf %92, %94 : vector<2x896xf32>
      %96 = vector.broadcast %90 : vector<2x1xf32> to vector<2x896xf32>
      %97 = arith.mulf %96, %34 : vector<2x896xf32>
      %98 = arith.addf %95, %97 : vector<2x896xf32>
      %99 = vector.broadcast %27 : vector<2x1xf32> to vector<2x896xf32>
      %100 = arith.addf %98, %99 : vector<2x896xf32>
      %c1_47 = arith.constant 1 : index
      %c0_48 = arith.constant 0 : index
      %c0_49 = arith.constant 0 : index
      %101 = vector.load %arg8[%c1_47, %c0_48, %c0_49] : memref<3x2x896xf32, #tpu.memory_space<vmem>>, vector<1x2x896xf32>
      %102 = vector.shape_cast %101 : vector<1x2x896xf32> to vector<2x896xf32>
      %103 = vector.shape_cast %100 : vector<2x896xf32> to vector<1x2x896xf32>
      tpu.vector_store %arg8[%c1_47, %c0_48, %c0_49], %103 {strides = array<i32>} : memref<3x2x896xf32, #tpu.memory_space<vmem>>, vector<1x2x896xf32>,
      %104 = vector.broadcast %86 : vector<2x1xf32> to vector<2x128xf32>
      %105 = arith.mulf %104, %36 : vector<2x128xf32>
      %106 = vector.broadcast %88 : vector<2x1xf32> to vector<2x128xf32>
      %107 = arith.mulf %106, %38 : vector<2x128xf32>
      %108 = arith.addf %105, %107 : vector<2x128xf32>
      %109 = vector.broadcast %90 : vector<2x1xf32> to vector<2x128xf32>
      %110 = arith.mulf %109, %40 : vector<2x128xf32>
      %111 = arith.addf %108, %110 : vector<2x128xf32>
      %112 = vector.broadcast %27 : vector<2x1xf32> to vector<2x128xf32>
      %113 = arith.addf %111, %112 : vector<2x128xf32>
      %c1_50 = arith.constant 1 : index
      %c0_51 = arith.constant 0 : index
      %c0_52 = arith.constant 0 : index
      %114 = vector.load %arg9[%c1_50, %c0_51, %c0_52] : memref<3x2x128xf32, #tpu.memory_space<vmem>>, vector<1x2x128xf32>
      %115 = vector.shape_cast %114 : vector<1x2x128xf32> to vector<2x128xf32>
      %116 = vector.shape_cast %113 : vector<2x128xf32> to vector<1x2x128xf32>
      tpu.vector_store %arg9[%c1_50, %c0_51, %c0_52], %116 {strides = array<i32>} : memref<3x2x128xf32, #tpu.memory_space<vmem>>, vector<1x2x128xf32>,
      %c2_53 = arith.constant 2 : index
      %c0_54 = arith.constant 0 : index
      %c0_55 = arith.constant 0 : index
      %117 = vector.load %arg6[%c2_53, %c0_54, %c0_55] : memref<3x2x896xf32, #tpu.memory_space<vmem>>, vector<1x2x896xf32>
      %118 = vector.shape_cast %117 : vector<1x2x896xf32> to vector<2x896xf32>
      %119 = vector.shape_cast %18 : vector<2x896xf32> to vector<1x2x896xf32>
      tpu.vector_store %arg6[%c2_53, %c0_54, %c0_55], %119 {strides = array<i32>} : memref<3x2x896xf32, #tpu.memory_space<vmem>>, vector<1x2x896xf32>,
      %c2_56 = arith.constant 2 : index
      %c0_57 = arith.constant 0 : index
      %c0_58 = arith.constant 0 : index
      %120 = vector.load %arg7[%c2_56, %c0_57, %c0_58] : memref<3x2x128xf32, #tpu.memory_space<vmem>>, vector<1x2x128xf32>
      %121 = vector.shape_cast %120 : vector<1x2x128xf32> to vector<2x128xf32>
      %122 = vector.shape_cast %25 : vector<2x128xf32> to vector<1x2x128xf32>
      tpu.vector_store %arg7[%c2_56, %c0_57, %c0_58], %122 {strides = array<i32>} : memref<3x2x128xf32, #tpu.memory_space<vmem>>, vector<1x2x128xf32>,
      %c6 = arith.constant 6 : index
      %c0_59 = arith.constant 0 : index
      %c0_60 = arith.constant 0 : index
      %123 = vector.load %arg5[%c6, %c0_59, %c0_60] : memref<9x2x1xf32, #tpu.memory_space<vmem>>, vector<1x2x1xf32>
      %124 = vector.shape_cast %123 : vector<1x2x1xf32> to vector<2x1xf32>
      %c7 = arith.constant 7 : index
      %c0_61 = arith.constant 0 : index
      %c0_62 = arith.constant 0 : index
      %125 = vector.load %arg5[%c7, %c0_61, %c0_62] : memref<9x2x1xf32, #tpu.memory_space<vmem>>, vector<1x2x1xf32>
      %126 = vector.shape_cast %125 : vector<1x2x1xf32> to vector<2x1xf32>
      %c8 = arith.constant 8 : index
      %c0_63 = arith.constant 0 : index
      %c0_64 = arith.constant 0 : index
      %127 = vector.load %arg5[%c8, %c0_63, %c0_64] : memref<9x2x1xf32, #tpu.memory_space<vmem>>, vector<1x2x1xf32>
      %128 = vector.shape_cast %127 : vector<1x2x1xf32> to vector<2x1xf32>
      %129 = vector.broadcast %124 : vector<2x1xf32> to vector<2x896xf32>
      %130 = arith.mulf %129, %30 : vector<2x896xf32>
      %131 = vector.broadcast %126 : vector<2x1xf32> to vector<2x896xf32>
      %132 = arith.mulf %131, %32 : vector<2x896xf32>
      %133 = arith.addf %130, %132 : vector<2x896xf32>
      %134 = vector.broadcast %128 : vector<2x1xf32> to vector<2x896xf32>
      %135 = arith.mulf %134, %34 : vector<2x896xf32>
      %136 = arith.addf %133, %135 : vector<2x896xf32>
      %137 = vector.broadcast %28 : vector<2x1xf32> to vector<2x896xf32>
      %138 = arith.addf %136, %137 : vector<2x896xf32>
      %c2_65 = arith.constant 2 : index
      %c0_66 = arith.constant 0 : index
      %c0_67 = arith.constant 0 : index
      %139 = vector.load %arg8[%c2_65, %c0_66, %c0_67] : memref<3x2x896xf32, #tpu.memory_space<vmem>>, vector<1x2x896xf32>
      %140 = vector.shape_cast %139 : vector<1x2x896xf32> to vector<2x896xf32>
      %141 = vector.shape_cast %138 : vector<2x896xf32> to vector<1x2x896xf32>
      tpu.vector_store %arg8[%c2_65, %c0_66, %c0_67], %141 {strides = array<i32>} : memref<3x2x896xf32, #tpu.memory_space<vmem>>, vector<1x2x896xf32>,
      %142 = vector.broadcast %124 : vector<2x1xf32> to vector<2x128xf32>
      %143 = arith.mulf %142, %36 : vector<2x128xf32>
      %144 = vector.broadcast %126 : vector<2x1xf32> to vector<2x128xf32>
      %145 = arith.mulf %144, %38 : vector<2x128xf32>
      %146 = arith.addf %143, %145 : vector<2x128xf32>
      %147 = vector.broadcast %128 : vector<2x1xf32> to vector<2x128xf32>
      %148 = arith.mulf %147, %40 : vector<2x128xf32>
      %149 = arith.addf %146, %148 : vector<2x128xf32>
      %150 = vector.broadcast %28 : vector<2x1xf32> to vector<2x128xf32>
      %151 = arith.addf %149, %150 : vector<2x128xf32>
      %c2_68 = arith.constant 2 : index
      %c0_69 = arith.constant 0 : index
      %c0_70 = arith.constant 0 : index
      %152 = vector.load %arg9[%c2_68, %c0_69, %c0_70] : memref<3x2x128xf32, #tpu.memory_space<vmem>>, vector<1x2x128xf32>
      %153 = vector.shape_cast %152 : vector<1x2x128xf32> to vector<2x128xf32>
      %154 = vector.shape_cast %151 : vector<2x128xf32> to vector<1x2x128xf32>
      tpu.vector_store %arg9[%c2_68, %c0_69, %c0_70], %154 {strides = array<i32>} : memref<3x2x128xf32, #tpu.memory_space<vmem>>, vector<1x2x128xf32>,
    } else {
    }
    return
  }
  func.func @transform_0(%arg0: i32) -> (i32, i32) {
    %c0_i32 = arith.constant 0 : i32
    %c0_i32_0 = arith.constant 0 : i32
    return %c0_i32, %arg0 : i32, i32
  }
  func.func @transform_1(%arg0: i32) -> (i32, i32) {
    %c0_i32 = arith.constant 0 : i32
    %c0_i32_0 = arith.constant 0 : i32
    return %arg0, %c0_i32 : i32, i32
  }
  func.func @transform_2(%arg0: i32) -> (i32, i32) {
    %c0_i32 = arith.constant 0 : i32
    %c0_i32_0 = arith.constant 0 : i32
    %c0_i32_1 = arith.constant 0 : i32
    return %c0_i32, %c0_i32_0 : i32, i32
  }
  func.func @transform_3(%arg0: i32) -> (i32, i32) {
    %c0_i32 = arith.constant 0 : i32
    %c0_i32_0 = arith.constant 0 : i32
    %c0_i32_1 = arith.constant 0 : i32
    return %c0_i32, %c0_i32_0 : i32, i32
  }
  func.func @transform_4(%arg0: i32) -> (i32, i32, i32) {
    %c0_i32 = arith.constant 0 : i32
    %c0_i32_0 = arith.constant 0 : i32
    %c0_i32_1 = arith.constant 0 : i32
    %c0_i32_2 = arith.constant 0 : i32
    return %c0_i32, %c0_i32_0, %c0_i32_1 : i32, i32, i32
  }
  func.func @transform_5(%arg0: i32) -> (i32, i32, i32) {
    %c0_i32 = arith.constant 0 : i32
    %c0_i32_0 = arith.constant 0 : i32
    %c0_i32_1 = arith.constant 0 : i32
    %c0_i32_2 = arith.constant 0 : i32
    return %c0_i32, %c0_i32_0, %c0_i32_1 : i32, i32, i32
  }
  func.func @transform_6(%arg0: i32) -> (i32, i32, i32) {
    %c0_i32 = arith.constant 0 : i32
    %c0_i32_0 = arith.constant 0 : i32
    %c0_i32_1 = arith.constant 0 : i32
    %c0_i32_2 = arith.constant 0 : i32
    return %c0_i32, %c0_i32_0, %c0_i32_1 : i32, i32, i32
  }
  func.func @transform_7(%arg0: i32) -> (i32, i32, i32) {
    %c0_i32 = arith.constant 0 : i32
    %c0_i32_0 = arith.constant 0 : i32
    %c0_i32_1 = arith.constant 0 : i32
    %c0_i32_2 = arith.constant 0 : i32
    return %c0_i32, %c0_i32_0, %c0_i32_1 : i32, i32, i32
  }
  func.func @transform_8(%arg0: i32) -> (i32, i32, i32) {
    %c0_i32 = arith.constant 0 : i32
    %c0_i32_0 = arith.constant 0 : i32
    %c0_i32_1 = arith.constant 0 : i32
    %c0_i32_2 = arith.constant 0 : i32
    return %c0_i32, %c0_i32_0, %c0_i32_1 : i32, i32, i32
  }
}

</mosaic_0001>

<bundles_post_ra>
// kernel: h2onet_sf_forward.2
= control target key start
LH: loop header
LB: loop body
LE: loop exit
PB: predicated region body
PF: predicated region fallthrough
CT: control target
= control target key end

     0   :  { %s2229_s0 = inlined_call_operand.vmem [shape: bf16[2,1024], index: 0, kind: input, shape index: {}]   ;;  %s2230_s1 = inlined_call_operand.hbm [shape: bf16[1024,768], index: 1, kind: input, shape index: {}]   ;;  %s2231_s2 = inlined_call_operand.hbm [shape: f32[1,768], index: 2, kind: input, shape index: {}]   ;;  %s2232_s3 = inlined_call_operand.vmem [shape: f32[2,768], index: 3, kind: output, shape index: {}]  }
   0x1   :  { %2233 = sst [smem:[#allocation8_spill]] %s2229_s0 }
   0x2   :  { %2234 = sst [smem:[#allocation9_spill]] %s2230_s1 }
   0x3   :  { %2235 = sst [smem:[#allocation10_spill]] %s2232_s3 }
   0x4   :  { %8 = vsyncpa [#allocation3], 0 }
   0x5   :  { %10 = vsyncpa [#allocation3 + $0x1], 0 }
   0x6   :  { %11 = vsyncpa [#allocation5], 0 }
   0x7   :  { %13 = vsyncpa [#allocation5 + $0x1], 0  ;;  %s1876_s12 = smov 0   ;;  %s1878_s13 = smov 0  }
   0x8   :  { %s1880_s14 = smov 0   ;;  %s1882_s15 = smov 0  }
   0x9   :  { %s1884_s16 = smov 0   ;;  %s1886_s17 = smov 0  }
   0xa   :  { %s1888_s18 = smov 0   ;;  %s1890_s19 = smov 0  }
   0xb   :  { %s1892_s20 = smov 0   ;;  %s1894_s21 = smov 0  }
   0xc   :  { %s1896_s22 = smov 0  }
   0xd LB: > { %s28_s23 = sadd.s32 1, %s1838_s20  ;;  %p73_p1 = scmp.ne.s32.totalorder %s1826_s17, %s1822_s16  ;;  %s1846_s22 = sphi %s1896_s22, %s19_s22   ;;  %s1842_s21 = sphi %s1894_s21, %s2258_s21   ;;  %s1838_s20 = sphi %s1892_s20, %s2257_s20   ;;  %s1834_s19 = sphi %s1890_s19, %s2256_s19   ;;  %s1830_s18 = sphi %s1888_s18, %s2255_s18   ;;  %s1826_s17 = sphi %s1886_s17, %s2254_s17   ;;  %s1822_s16 = sphi %s1884_s16, %s2253_s16   ;;  %s1818_s15 = sphi %s1882_s15, %s2252_s15   ;;  %s1814_s14 = sphi %s1880_s14, %s2251_s14   ;;  %s1810_s13 = sphi %s1878_s13, %s2250_s13   ;;  %s1806_s12 = sphi %s1876_s12, %s2249_s12  }
   0xe   : > { %p1933_p0 = scmp.ge.s32.totalorder %s28_s23, 2  ;;  %p74_p2 = scmp.eq.s32.totalorder %s1846_s22, 0 }
   0xf   : > { %p1469_p4 = scmp.lt.s32.totalorder %s1846_s22, 4  ;;  %s163_s27 = sand.u32 1, %s1826_s17  }
  0x10   : > { %s2260_s23 = smov (%p1933_p0, %s28_s23), 0  ;;  %p75_p3 = por %p74_p2, %p73_p1 }
  0x11   : > { %s1453_s28 = smul.u32 768, %s163_s27  ;;  %s2238_s1 = sld [smem:[#allocation9_spill]] }
  0x12   : > { %s169_s29 = smul.u32 3, %s1842_s21  ;;  %p1953_p5 = pnand %p1469_p4, %p75_p3 }
  0x13   : > { %s1454_s4 = smul.u32 384, %s1838_s20  ;;  %s167_s5 = scalar_lea.vmem [#allocation2], %s1453_s28 }
  0x14   : > { %s177_s6 = sshll.u32 %s167_s5, 4  ;;  %p1303_p6 = scmp.ge.s32.totalorder %s1846_s22, 1  ;;  %s178_s6 = int_to_ptr.vmem [resolvable:$true] %s177_s6 }
  0x15   : > { %s174_s7 = sadd.s32 %s1454_s4, %s169_s29  ;;  %s164_s24 = scalar_lea.sflag [#allocation3], %s163_s27 }
  0x16   : > { %s1301_s8 = sshll.u32 %s174_s7, 6  ;;  %p1698_p7 = pneg %p1953_p5 }
  0x17   : > { %s176_s11 = scalar_lea.hbm %s2238_s1, %s1301_s8  ;;  %s1709_s26 = scalar_lea.vmem %s178_s6, 12288 }
  0x18   : > { %p1710_p8 = scmp.ne.s32.totalorder %s178_s6, %s1709_s26  ;;  %s1848_s3 = smov [#allocation2]  }
  0x19   : > { %s1714_s0 = sshll.u32 %s1848_s3, 4  ;;  %s1715_s0 = int_to_ptr.vmem [resolvable:$false] %s1714_s0 }
  0x1a   : > { %p1712_p9 = pnand %p1710_p8, %p1698_p7  ;;  %s1716_s28 = scalar_lea.vmem %s1715_s0, 24576 }
  0x1b   : > { %p1717_p11 = scmp.lt.s32.totalorder %s178_s6, %s1715_s0  ;;  %p1718_p12 = scmp.lt.s32.totalorder %s1716_s28, %s1709_s26 }
  0x1c   : > { %p1713_p10 = pneg %p1712_p9 }
  0x1d   : > { %p1719_p13 = por %p1718_p12, %p1717_p11 }
  0x1f   : > { %p1720_p1 = pnand %p1719_p13, %p1713_p10 }
  0x21   : > { %1723 = shalt.err (!%p1720_p1)
}
  0x22   : > { %s1849_s29 = smov 384   ;;  %s1850_s3 = smov 192  }
  0x23   : > { %s1851_s0 = smov 12   ;;  %p204_p3 = scmp.lt.s32.totalorder %s1846_s22, 5 }
  0x24   : > { %1465 = dma.hbm_to_vmem [thread:$0]  (!%p1953_p5), %s176_s11, 12288, %s178_s6, %s164_s24, %s1849_s29, %s1850_s3, %s1851_s0  }
  0x25   : > { %p1969_p7 = pnand %p1303_p6, %p204_p3  ;;  %s1295_s27 = sadd.s32 4294967295, %s1846_s22  }
  0x26   : > { %s31_s4 = sadd.s32 1, %s1842_s21  ;;  %p79_p8 = scmp.ne.s32.totalorder %s1822_s16, %s1818_s15 }
  0x27   : > { %s2262_s4 = smov (!%p1933_p0, %s31_s4), %s1842_s21  ;;  %p1980_p9 = scmp.eq.s32.totalorder %s1295_s27, 0 }
  0x28   : > { %p33_p5 = scmp.ge.s32.totalorder %s2262_s4, 2  ;;  %s92_s24 = sadd.s32 1, %s1814_s14 }
  0x29   : > { %p1987_p6 = por %p1980_p9, %p79_p8  ;;  %p99_p0 = scmp.ne.s32.totalorder %s1814_s14, %s1810_s13 }
  0x2a   : > { %s2264_s4 = smov (%p33_p5, %s2262_s4), 0  ;;  %p105_p11 = scmp.ne.s32.totalorder %s1810_s13, %s1806_s12 }
  0x2b   : > { %p101_p10 = por %p99_p0, %p74_p2  ;;  %s62_s15 = ssub.s32 %s1842_s21, %s2264_s4 }
  0x2c   : > { %s187_s25 = sand.u32 1, %s1814_s14   ;;  %s2242_s6 = ssub.s32 %s1838_s20, %s2260_s23 }
  0x2d   : > { %s63_s7 = sor.u32 %s62_s15, %s2242_s6  ;;  %p90_p12 = scmp.eq.s32.totalorder %s62_s15, 0 }
  0x2e   : > { %p64_p13 = scmp.eq.s32.totalorder %s63_s7, 0  ;;  %p2007_p1 = por %p105_p11, %p1980_p9 }
  0x2f   : > { %s2012_s9 = scalar_select %p90_p12, %s1814_s14, %s92_s24  }
  0x30   : > { %s2244_s10 = sadd.s32 1, %s1826_s17  ;;  %s1455_s28 = smul.u32 3, %s187_s25 }
  0x31   : > { %s2017_s11 = scalar_select %p64_p13, %s1826_s17, %s2244_s10  }
  0x32   : > { %s1408_s29 = smul.u32 48, %s1842_s21  ;;  %p2022_p2 = pnand %p1469_p4, %p101_p10 }
  0x33   : > { %s191_s30 = scalar_lea.vmem [#allocation4], %s1455_s28  ;;  %s188_s24 = scalar_lea.sflag [#allocation5], %s187_s25 }
  0x34   : > { %s197_s27 = scalar_lea.hbm %s2231_s2, %s1408_s29  ;;  %s199_s15 = sshll.u32 %s191_s30, 4  ;;  %s200_s15 = int_to_ptr.vmem [resolvable:$true] %s199_s15 }
  0x35   : > { %p1726_p3 = pneg %p2022_p2  ;;  %s1737_s6 = scalar_lea.vmem %s200_s15, 48 }
  0x36   : > { %p1738_p8 = scmp.ne.s32.totalorder %s200_s15, %s1737_s6  ;;  %s1852_s7 = smov [#allocation4]  }
  0x37   : > { %s1742_s10 = sshll.u32 %s1852_s7, 4  ;;  %s1743_s10 = int_to_ptr.vmem [resolvable:$false] %s1742_s10 }
  0x38   : > { %p1740_p9 = pnand %p1738_p8, %p1726_p3  ;;  %s1744_s1 = scalar_lea.vmem %s1743_s10, 96 }
  0x39   : > { %p1745_p4 = scmp.lt.s32.totalorder %s200_s15, %s1743_s10  ;;  %p1746_p0 = scmp.lt.s32.totalorder %s1744_s1, %s1737_s6 }
  0x3a   : > { %p1741_p5 = pneg %p1740_p9 }
  0x3b   : > { %p1747_p10 = por %p1746_p0, %p1745_p4 }
  0x3d   : > { %p1748_p11 = pnand %p1747_p10, %p1741_p5 }
  0x3f   : > { %1751 = shalt.err (!%p1748_p11)
}
  0x40   : > { %1468 = dma.hbm_to_vmem [thread:$0]  (!%p2022_p2), %s197_s27, 48, %s200_s15, %s188_s24  }
  0x41   : > { %208 = sbr.rel (%p1969_p7) target bundleno = 448 (0x1c0), region = 32  ;;  %s210_s25 = sand.u32 (!%p1969_p7), 1, %s1822_s16  }
  0x42   : > { %s1456_s28 = smul.u32 (!%p1969_p7), 768, %s210_s25  ;;  %s211_s29 = scalar_lea.sflag (!%p1969_p7), [#allocation3], %s210_s25 }
  0x44   : > { %s2036_s3 = scalar_lea.vmem (!%p1969_p7), [#allocation2], %s1456_s28 }
  0x46   : > { %1797 = dma.done.wait (%p1987_p6), %s211_s29, 12288  }
  0x47   : > { %1799 = vsyncadd (%p1987_p6), %s211_s29, 4294955008  ;;  %s219_s1 = sand.u32 1, %s1810_s13  }
  0x48   : > { %s2043_s12 = smul.u32 3, %s219_s1  ;;  %s220_s26 = scalar_lea.sflag [#allocation5], %s219_s1 }
  0x4a   : > { %s223_s0 = scalar_lea.vmem [#allocation4], %s2043_s12 }
  0x4b   : > { %1801 = dma.done.wait (%p2007_p1), %s220_s26, 48  }
  0x4c   : > { %1803 = vsyncadd (%p2007_p1), %s220_s26, 4294967248  ;;  %s1304_s27 = sshll.u32 %s1830_s18, 2  ;;  %s263_s30 = smul.u32 3, %s1834_s19 }
  0x4d   : > { %p256_p7 = scmp.lt.s32.totalorder %s1304_s27, 7  ;;  %s2246_s24 = sld [smem:[#allocation8_spill]] }
  0x4e   : > { %p264_p12 = scmp.lt.s32.totalorder %s263_s30, 5  ;;  %s2247_s28 = sld [smem:[#allocation10_spill]] }
  0x4f   : > { %s2266_s27 = smov (!%p256_p7, %s1304_s27), 7  ;;  %p1306_p6 = scmp.ne.s32.totalorder %s1830_s18, 0 }
  0x50   : > { %s2268_s30 = smov (!%p264_p12, %s263_s30), 5 }
  0x51   : > { %s1305_s7 = sshll.u32 %s2268_s30, 1  ;;  %273 = sbr.rel (%p1306_p6) target bundleno = 88 (0x58), region = 44 }
  0x53   : > { %s258_s6 = scalar_lea.vmem %s2246_s24, %s2266_s27 }
  0x54   : > { %s2061_s8 = scalar_lea.vmem %s2247_s28, %s1305_s7 }
  0x56   : > { %v1853_v0 = vmov 0.0  }
  0x57   : > { %274 = vst [vmem:[%s2061_s8] sm:$0x3f] %v1853_v0 }
  0x58 PF: > { %v1564_v1 = vld [vmem:[%s2036_s3 + $0xac] ss:$12 sps:$4 sm:$0xff]   ;;  %v1568_v3 = vld [vmem:[%s2036_s3 + $0xa8] ss:$12 sps:$4 sm:$0xff]   ;;  %v1574_v7 = vld [vmem:[%s2036_s3 + $0x90] ss:$12 sps:$4 sm:$0xff]   ;;  %v417_v41 = vlaneseq }
  0x59   : > { %v1566_v2 = vld [vmem:[%s2036_s3 + $0x22c] ss:$12 sps:$4 sm:$0xff]   ;;  %946 = vmatprep.subr.bf16.mxu0 %v1564_v1  ;;  %v1569_v4 = vld [vmem:[%s2036_s3 + $0x228] ss:$12 sps:$4 sm:$0xff]   ;;  %v1575_v8 = vld [vmem:[%s2036_s3 + $0x210] ss:$12 sps:$4 sm:$0xff]  }
  0x5a   : > { %987 = vmatprep.subr.bf16.mxu1 %v1566_v2  ;;  %v1570_v5 = vld [vmem:[%s2036_s3 + $0x94] ss:$12 sps:$4 sm:$0xff]   ;;  %947 = vmatpush1.bf16.msra.mxu0 %v1568_v3  ;;  %v1576_v9 = vld [vmem:[%s2036_s3 + $0x7c] ss:$12 sps:$4 sm:$0xff]   ;;  %v1580_v11 = vld [vmem:[%s2036_s3 + $0x78] ss:$12 sps:$4 sm:$0xff]  }
  0x5b   : > { %988 = vmatpush1.bf16.msra.mxu1 %v1569_v4  ;;  %v1572_v6 = vld [vmem:[%s2036_s3 + $0x214] ss:$12 sps:$4 sm:$0xff]   ;;  %948 = vmatprep.subr.bf16.mxu0 %v1570_v5  ;;  %v1578_v10 = vld [vmem:[%s2036_s3 + $0x1fc] ss:$12 sps:$4 sm:$0xff]   ;;  %v1581_v12 = vld [vmem:[%s2036_s3 + $0x1f8] ss:$12 sps:$4 sm:$0xff]  }
  0x5c   : > { %989 = vmatprep.subr.bf16.mxu1 %v1572_v6  ;;  %v1582_v13 = vld [vmem:[%s2036_s3 + $0x64] ss:$12 sps:$4 sm:$0xff]   ;;  %v1586_v15 = vld [vmem:[%s2036_s3 + $0x60] ss:$12 sps:$4 sm:$0xff]   ;;  %v1592_v19 = vld [vmem:[%s2036_s3 + $0x48] ss:$12 sps:$4 sm:$0xff]  }
  0x5d   : > { %v1584_v14 = vld [vmem:[%s2036_s3 + $0x1e4] ss:$12 sps:$4 sm:$0xff]   ;;  %v1587_v16 = vld [vmem:[%s2036_s3 + $0x1e0] ss:$12 sps:$4 sm:$0xff]   ;;  %v1593_v20 = vld [vmem:[%s2036_s3 + $0x1c8] ss:$12 sps:$4 sm:$0xff]  }
  0x5e   : > { %949 = vmatpush1.bf16.msra.mxu0 %v1574_v7  ;;  %v1588_v17 = vld [vmem:[%s2036_s3 + $0x4c] ss:$12 sps:$4 sm:$0xff]   ;;  %v1594_v21 = vld [vmem:[%s2036_s3 + $0x34] ss:$12 sps:$4 sm:$0xff]   ;;  %v1598_v23 = vld [vmem:[%s2036_s3 + $0x30] ss:$12 sps:$4 sm:$0xff]  }
  0x5f   : > { %990 = vmatpush1.bf16.msra.mxu1 %v1575_v8  ;;  %950 = vmatprep.subr.bf16.mxu0 %v1576_v9  ;;  %v1590_v18 = vld [vmem:[%s2036_s3 + $0x1cc] ss:$12 sps:$4 sm:$0xff]   ;;  %v1596_v22 = vld [vmem:[%s2036_s3 + $0x1b4] ss:$12 sps:$4 sm:$0xff]   ;;  %v1599_v24 = vld [vmem:[%s2036_s3 + $0x1b0] ss:$12 sps:$4 sm:$0xff]  }
  0x60   : > { %991 = vmatprep.subr.bf16.mxu1 %v1578_v10  ;;  %v1600_v25 = vld [vmem:[%s2036_s3 + $0x1c] ss:$12 sps:$4 sm:$0xff]   ;;  %v1604_v27 = vld [vmem:[%s2036_s3 + $0x18] ss:$12 sps:$4 sm:$0xff]   ;;  %v1610_v31 = vld [vmem:[%s2036_s3] ss:$12 sps:$4 sm:$0xff]  }
  0x61   : > { %v1602_v26 = vld [vmem:[%s2036_s3 + $0x19c] ss:$12 sps:$4 sm:$0xff]   ;;  %v1605_v28 = vld [vmem:[%s2036_s3 + $0x198] ss:$12 sps:$4 sm:$0xff]   ;;  %v1611_v32 = vld [vmem:[%s2036_s3 + $0x180] ss:$12 sps:$4 sm:$0xff]  }
  0x62   : > { %951 = vmatpush1.bf16.msra.mxu0 %v1580_v11  ;;  %v1606_v29 = vld [vmem:[%s2036_s3 + $0x4] ss:$12 sps:$4 sm:$0xff]   ;;  %v1612_v33 = vld [vmem:[%s2036_s3 + $0x16c] ss:$12 sps:$4 sm:$0xff]   ;;  %v1616_v35 = vld [vmem:[%s2036_s3 + $0x168] ss:$12 sps:$4 sm:$0xff]  }
  0x63   : > { %992 = vmatpush1.bf16.msra.mxu1 %v1581_v12  ;;  %952 = vmatprep.subr.bf16.mxu0 %v1582_v13  ;;  %v1608_v30 = vld [vmem:[%s2036_s3 + $0x184] ss:$12 sps:$4 sm:$0xff]   ;;  %v1614_v34 = vld [vmem:[%s2036_s3 + $0x2ec] ss:$12 sps:$4 sm:$0xff]   ;;  %v1617_v36 = vld [vmem:[%s2036_s3 + $0x2e8] ss:$12 sps:$4 sm:$0xff]  }
  0x64   : > { %993 = vmatprep.subr.bf16.mxu1 %v1584_v14  ;;  %v1618_v37 = vld [vmem:[%s2036_s3 + $0x154] ss:$12 sps:$4 sm:$0xff]   ;;  %v1854_v39 = vmov 1966171168   ;;  %v1622_v42 = vld [vmem:[%s2036_s3 + $0x150] ss:$12 sps:$4 sm:$0xff]  }
  0x65   : > { %v1620_v38 = vld [vmem:[%s2036_s3 + $0x2d4] ss:$12 sps:$4 sm:$0xff]   ;;  %v415_v40 = vunpack.c.l.s4 %v1854_v39  ;;  %v1623_v43 = vld [vmem:[%s2036_s3 + $0x2d0] ss:$12 sps:$4 sm:$0xff]   ;;  %v2107_v47 = vshrl.u32 %v417_v41, 7  ;;  %p1130_p13 = scmp.eq.s32.totalorder %s1830_s18, 1 }
  0x66   : > { %953 = vmatpush1.bf16.msra.mxu0 %v1586_v15  ;;  %v1624_v44 = vld [vmem:[%s2036_s3 + $0x13c] ss:$12 sps:$4 sm:$0xff]   ;;  %v1628_v48 = vld [vmem:[%s2036_s3 + $0x138] ss:$12 sps:$4 sm:$0xff]   ;;  %v1634_v52 = vld [vmem:[%s2036_s3 + $0x120] ss:$12 sps:$4 sm:$0xff]  }
  0x67   : > { %994 = vmatpush1.bf16.msra.mxu1 %v1587_v16  ;;  %954 = vmatprep.subr.bf16.mxu0 %v1588_v17  ;;  %v1626_v45 = vld [vmem:[%s2036_s3 + $0x2bc] ss:$12 sps:$4 sm:$0xff]   ;;  %v416_v46 = vunpack.c.0.s8 %v415_v40  ;;  %v1629_v49 = vld [vmem:[%s2036_s3 + $0x2b8] ss:$12 sps:$4 sm:$0xff]   ;;  %v1635_v53 = vld [vmem:[%s2036_s3 + $0x2a0] ss:$12 sps:$4 sm:$0xff]  }
  0x68   : > { %995 = vmatprep.subr.bf16.mxu1 %v1590_v18  ;;  %v1630_v50 = vld [vmem:[%s2036_s3 + $0x124] ss:$12 sps:$4 sm:$0xff]   ;;  %v1307_v55 = vld.sshfl [vmem:[%s258_s6] sm:$0x33 pattern:$0x75316420] }
  0x69   : > { %v1632_v51 = vld [vmem:[%s2036_s3 + $0x2a4] ss:$12 sps:$4 sm:$0xff]   ;;  %v419_v54 = vsub.s32 %v416_v46, %v2107_v47  ;;  %v1636_v56 = vld [vmem:[%s2036_s3 + $0x10c] ss:$12 sps:$4 sm:$0xff]   ;;  %v413_v57 = vcombine.high %v1307_v55, %v1307_v55  ;;  %v1640_v59 = vld [vmem:[%s2036_s3 + $0x108] ss:$12 sps:$4 sm:$0xff]  }
  0x6a   : > { %955 = vmatpush1.bf16.msra.mxu0 %v1592_v19  ;;  %v1638_v58 = vld [vmem:[%s2036_s3 + $0x28c] ss:$12 sps:$4 sm:$0xff]   ;;  %v1641_v61 = vld [vmem:[%s2036_s3 + $0x288] ss:$12 sps:$4 sm:$0xff]   ;;  %v1646_v1 = vld [vmem:[%s2036_s3 + $0xf0] ss:$12 sps:$4 sm:$0xff]  }
  0x6b   : > { %996 = vmatpush1.bf16.msra.mxu1 %v1593_v20  ;;  %956 = vmatprep.subr.bf16.mxu0 %v1594_v21  ;;  %v427_v60 = vrot.slane %v413_v57, %v419_v54  ;;  %v1642_v62 = vld [vmem:[%s2036_s3 + $0xf4] ss:$12 sps:$4 sm:$0xff]   ;;  %v1647_v2 = vld [vmem:[%s2036_s3 + $0x270] ss:$12 sps:$4 sm:$0xff]   ;;  %v1652_v5 = vld [vmem:[%s2036_s3 + $0xd8] ss:$12 sps:$4 sm:$0xff]   ;;  %v2137_v11 = vrot.slane %v1307_v55, %v419_v54 }
  0x6c   : > { %997 = vmatprep.subr.bf16.mxu1 %v1596_v22  ;;  %v1644_v0 = vld [vmem:[%s2036_s3 + $0x274] ss:$12 sps:$4 sm:$0xff]   ;;  %v1648_v3 = vld [vmem:[%s2036_s3 + $0xdc] ss:$12 sps:$4 sm:$0xff]   ;;  %v1653_v6 = vld [vmem:[%s2036_s3 + $0x258] ss:$12 sps:$4 sm:$0xff]  }
  0x6d   : > { %v429_v63 = vcombine.high %v427_v60, %v427_v60  ;;  %978 = vmatprep.mubr.bf16.mxu0 %v427_v60  ;;  %v1650_v4 = vld [vmem:[%s2036_s3 + $0x25c] ss:$12 sps:$4 sm:$0xff]   ;;  %v1654_v7 = vld [vmem:[%s2036_s3 + $0xc4] ss:$12 sps:$4 sm:$0xff]   ;;  %v1658_v9 = vld [vmem:[%s2036_s3 + $0xc0] ss:$12 sps:$4 sm:$0xff]   ;;  %v2144_v15 = vcombine.high %v2137_v11, %v2137_v11 }
  0x6e   : > { %957 = vmatpush1.bf16.msra.mxu0 %v1598_v23  ;;  %v1656_v8 = vld [vmem:[%s2036_s3 + $0x244] ss:$12 sps:$4 sm:$0xff]   ;;  %v1659_v10 = vld [vmem:[%s2036_s3 + $0x240] ss:$12 sps:$4 sm:$0xff]   ;;  %v1688_v41 = vld [vmem:[%s2036_s3 + $0xc8] ss:$12 sps:$4 sm:$0xff]  }
  0x6f   : > { %998 = vmatpush1.bf16.msra.mxu1 %v1599_v24  ;;  %958 = vmatprep.subr.bf16.mxu0 %v1600_v25  ;;  %v1660_v12 = vld [vmem:[%s2036_s3 + $0x170] ss:$12 sps:$4 sm:$0xff]   ;;  %v1664_v17 = vld [vmem:[%s2036_s3 + $0x158] ss:$12 sps:$4 sm:$0xff]   ;;  %v1668_v21 = vld [vmem:[%s2036_s3 + $0x140] ss:$12 sps:$4 sm:$0xff]  }
  0x70   : > { %999 = vmatprep.subr.bf16.mxu1 %v1602_v26  ;;  %1019 = vmatprep.mubr.bf16.mxu1 %v429_v63  ;;  %v1661_v13 = vld [vmem:[%s2036_s3 + $0x2f0] ss:$12 sps:$4 sm:$0xff]   ;;  %v1665_v18 = vld [vmem:[%s2036_s3 + $0x2d8] ss:$12 sps:$4 sm:$0xff]   ;;  %v1669_v22 = vld [vmem:[%s2036_s3 + $0x2c0] ss:$12 sps:$4 sm:$0xff]  }
  0x71   : > { %v1662_v14 = vld [vmem:[%s2036_s3 + $0xb0] ss:$12 sps:$4 sm:$0xff]   ;;  %v1666_v19 = vld [vmem:[%s2036_s3 + $0x98] ss:$12 sps:$4 sm:$0xff]   ;;  %v1670_v23 = vld [vmem:[%s2036_s3 + $0x80] ss:$12 sps:$4 sm:$0xff]  }
  0x72   : > { %959 = vmatpush1.bf16.msra.mxu0 %v1604_v27  ;;  %v1663_v16 = vld [vmem:[%s2036_s3 + $0x230] ss:$12 sps:$4 sm:$0xff]   ;;  %v1667_v20 = vld [vmem:[%s2036_s3 + $0x218] ss:$12 sps:$4 sm:$0xff]   ;;  %v1671_v24 = vld [vmem:[%s2036_s3 + $0x200] ss:$12 sps:$4 sm:$0xff]  }
  0x73   : > { %1000 = vmatpush1.bf16.msra.mxu1 %v1605_v28  ;;  %960 = vmatprep.subr.bf16.mxu0 %v1606_v29  ;;  %v1672_v25 = vld [vmem:[%s2036_s3 + $0x128] ss:$12 sps:$4 sm:$0xff]   ;;  %v1676_v29 = vld [vmem:[%s2036_s3 + $0x110] ss:$12 sps:$4 sm:$0xff]   ;;  %v1686_v39 = vld [vmem:[%s2036_s3 + $0x20] ss:$12 sps:$4 sm:$0xff]  }
  0x74   : > { %1001 = vmatprep.subr.bf16.mxu1 %v1608_v30  ;;  %v1673_v26 = vld [vmem:[%s2036_s3 + $0x2a8] ss:$12 sps:$4 sm:$0xff]   ;;  %v1677_v30 = vld [vmem:[%s2036_s3 + $0x290] ss:$12 sps:$4 sm:$0xff]   ;;  %v1687_v40 = vld [vmem:[%s2036_s3 + $0x1a0] ss:$12 sps:$4 sm:$0xff]  }
  0x75   : > { %v1674_v27 = vld [vmem:[%s2036_s3 + $0x68] ss:$12 sps:$4 sm:$0xff]   ;;  %v1855_v54 = vmov 1983009808   ;;  %p1404_p1 = scmp.ne.s32.totalorder %s1830_s18, 1 }
  0x76   : > { %961 = vmatpush1.bf16.msra.mxu0 %v1610_v31  ;;  %v1675_v28 = vld [vmem:[%s2036_s3 + $0x1e8] ss:$12 sps:$4 sm:$0xff]   ;;  %v1678_v31 = vld [vmem:[%s2036_s3 + $0x50] ss:$12 sps:$4 sm:$0xff]   ;;  %v1113_v55 = vunpack.c.l.s4 %v1855_v54 }
  0x77   : > { %1002 = vmatpush1.bf16.msra.mxu1 %v1611_v32  ;;  %962 = vmatprep.subr.bf16.mxu0 %v1612_v33  ;;  %v1679_v32 = vld [vmem:[%s2036_s3 + $0x1d0] ss:$12 sps:$4 sm:$0xff]   ;;  %v1680_v33 = vld [vmem:[%s2036_s3 + $0xf8] ss:$12 sps:$4 sm:$0xff]  }
  0x78   : > { %1003 = vmatprep.subr.bf16.mxu1 %v1614_v34  ;;  %v1681_v34 = vld [vmem:[%s2036_s3 + $0x278] ss:$12 sps:$4 sm:$0xff]  }
  0x7a   : > { %963 = vmatpush2.bf16.msra.mxu0 %v1616_v35  ;;  %v1682_v35 = vld [vmem:[%s2036_s3 + $0x38] ss:$12 sps:$4 sm:$0xff]  }
  0x7b   : > { %1004 = vmatpush2.bf16.msra.mxu1 %v1617_v36  ;;  %964 = vmatprep.subr.bf16.mxu0 %v1618_v37  ;;  %v1683_v36 = vld [vmem:[%s2036_s3 + $0x1b8] ss:$12 sps:$4 sm:$0xff]   ;;  %v1684_v37 = vld [vmem:[%s2036_s3 + $0xe0] ss:$12 sps:$4 sm:$0xff]  }
  0x7c   : > { %1005 = vmatprep.subr.bf16.mxu1 %v1620_v38  ;;  %v1685_v38 = vld [vmem:[%s2036_s3 + $0x260] ss:$12 sps:$4 sm:$0xff]  }
  0x7e   : > { %965 = vmatpush2.bf16.msra.mxu0 %v1622_v42  ;;  %v1689_v42 = vld [vmem:[%s2036_s3 + $0x248] ss:$12 sps:$4 sm:$0xff]  }
  0x7f   : > { %1006 = vmatpush2.bf16.msra.mxu1 %v1623_v43  ;;  %966 = vmatprep.subr.bf16.mxu0 %v1624_v44  ;;  %v1690_v43 = vld [vmem:[%s2036_s3 + $0x8] ss:$12 sps:$4 sm:$0xff]  }
  0x80   : > { %1007 = vmatprep.subr.bf16.mxu1 %v1626_v45  ;;  %v1691_v44 = vld [vmem:[%s2036_s3 + $0x188] ss:$12 sps:$4 sm:$0xff]  }
  0x82   : > { %967 = vmatpush2.bf16.msra.mxu0 %v1628_v48 }
  0x83   : > { %1008 = vmatpush2.bf16.msra.mxu1 %v1629_v49  ;;  %968 = vmatprep.subr.bf16.mxu0 %v1630_v50 }
  0x84   : > { %1009 = vmatprep.subr.bf16.mxu1 %v1632_v51 }
  0x86   : > { %969 = vmatpush2.bf16.msra.mxu0 %v1634_v52 }
  0x87   : > { %1010 = vmatpush2.bf16.msra.mxu1 %v1635_v53  ;;  %970 = vmatprep.subr.bf16.mxu0 %v1636_v56 }
  0x88   : > { %1011 = vmatprep.subr.bf16.mxu1 %v1638_v58  ;;  %v1114_v58 = vunpack.c.0.s8 %v1113_v55 }
  0x8a   : > { %971 = vmatpush2.bf16.msra.mxu0 %v1640_v59 }
  0x8b   : > { %1012 = vmatpush2.bf16.msra.mxu1 %v1641_v61  ;;  %972 = vmatprep.subr.bf16.mxu0 %v1642_v62 }
  0x8c   : > { %1013 = vmatprep.subr.bf16.mxu1 %v1644_v0  ;;  %v1117_v0 = vsub.s32 %v1114_v58, %v2107_v47 }
  0x8e   : > { %973 = vmatpush2.bf16.msra.mxu0 %v1646_v1 }
  0x8f   : > { %1014 = vmatpush2.bf16.msra.mxu1 %v1647_v2  ;;  %974 = vmatprep.subr.bf16.mxu0 %v1648_v3 }
  0x90   : > { %1015 = vmatprep.subr.bf16.mxu1 %v1650_v4 }
  0x92   : > { %975 = vmatpush2.bf16.msra.mxu0 %v1652_v5 }
  0x93   : > { %1016 = vmatpush2.bf16.msra.mxu1 %v1653_v6  ;;  %976 = vmatprep.subr.bf16.mxu0 %v1654_v7 }
  0x94   : > { %1017 = vmatprep.subr.bf16.mxu1 %v1656_v8 }
  0x96   : > { %977 = vmatpush2.bf16.msra.mxu0 %v1658_v9 }
  0x97   : > { %1018 = vmatpush2.bf16.msra.mxu1 %v1659_v10  ;;  %1409 = vmatprep.subr.bf16.mxu0 %v1660_v12  ;;  %v275_v10 = vld [vmem:[%s2061_s8] sm:$0x3f] }
  0x98   : > { %1431 = vmatprep.subr.bf16.mxu1 %v1661_v13 }
  0x99   : > { %979 = vmatmul.mubr.bf16.vlgmr.msra.gmra.mxu0 %v2137_v11 }
  0x9a   : > { %1020 = vmatmul.mubr.bf16.vlgmr.msra.gmra.mxu1 %v2144_v15  ;;  %1410 = vmatpush3.bf16.msra.mxu0 %v1662_v14 }
  0x9b   : > { %1432 = vmatpush3.bf16.msra.mxu1 %v1663_v16  ;;  %1411 = vmatprep.subr.bf16.mxu0 %v1664_v17 }
  0x9c   : > { %1433 = vmatprep.subr.bf16.mxu1 %v1665_v18  ;;  %1060 = vmatprep.mubr.bf16.mxu0 %v427_v60 }
  0x9d   : > { %1100 = vmatprep.mubr.bf16.mxu1 %v429_v63 }
  0x9e   : > { %1412 = vmatpush3.bf16.msra.mxu0 %v1666_v19 }
  0x9f   : > { %1434 = vmatpush3.bf16.msra.mxu1 %v1667_v20  ;;  %1413 = vmatprep.subr.bf16.mxu0 %v1668_v21 }
  0xa0   : > { %1435 = vmatprep.subr.bf16.mxu1 %v1669_v22 }
  0xa2   : > { %1414 = vmatpush3.bf16.msra.mxu0 %v1670_v23 }
  0xa3   : > { %1436 = vmatpush3.bf16.msra.mxu1 %v1671_v24  ;;  %1415 = vmatprep.subr.bf16.mxu0 %v1672_v25 }
  0xa4   : > { %1437 = vmatprep.subr.bf16.mxu1 %v1673_v26 }
  0xa6   : > { %1416 = vmatpush3.bf16.msra.mxu0 %v1674_v27 }
  0xa7   : > { %1438 = vmatpush3.bf16.msra.mxu1 %v1675_v28  ;;  %1417 = vmatprep.subr.bf16.mxu0 %v1676_v29 }
  0xa8   : > { %1439 = vmatprep.subr.bf16.mxu1 %v1677_v30 }
  0xaa   : > { %1418 = vmatpush3.bf16.msra.mxu0 %v1678_v31 }
  0xab   : > { %1440 = vmatpush3.bf16.msra.mxu1 %v1679_v32  ;;  %1419 = vmatprep.subr.bf16.mxu0 %v1680_v33 }
  0xac   : > { %1441 = vmatprep.subr.bf16.mxu1 %v1681_v34 }
  0xae   : > { %1420 = vmatpush3.bf16.msra.mxu0 %v1682_v35 }
  0xaf   : > { %1442 = vmatpush3.bf16.msra.mxu1 %v1683_v36  ;;  %1421 = vmatprep.subr.bf16.mxu0 %v1684_v37 }
  0xb0   : > { %1443 = vmatprep.subr.bf16.mxu1 %v1685_v38 }
  0xb2   : > { %1422 = vmatpush3.bf16.msra.mxu0 %v1686_v39 }
  0xb3   : > { %1444 = vmatpush3.bf16.msra.mxu1 %v1687_v40  ;;  %1423 = vmatprep.subr.bf16.mxu0 %v1688_v41 }
  0xb4   : > { %1445 = vmatprep.subr.bf16.mxu1 %v1689_v42 }
  0xb6   : > { %1424 = vmatpush3.bf16.msra.mxu0 %v1690_v43 }
  0xb7   : > { %1446 = vmatpush3.bf16.msra.mxu1 %v1691_v44 }
  0xb9   : > { %1061 = vmatmul.mubr.bf16.vlgmr.msra.gmra.mxu0 %v2137_v11 }
  0xba   : > { %1101 = vmatmul.mubr.bf16.vlgmr.msra.gmra.mxu1 %v2144_v15 }
 0x159   : > { %v980_v45 = vpop.f32.mrf.mxu0 }
 0x15a   : > { %v1021_v46 = vpop.f32.mrf.mxu1 }
 0x15b   : > { %v982_v48 = vpop.f32.mrf.mxu0  ;;  %v1022_v56 = vadd.f32 %v1021_v46, %v980_v45 }
 0x15c   : > { %v1023_v49 = vpop.f32.mrf.mxu1 }
 0x15d   : > { %v984_v50 = vpop.f32.mrf.mxu0  ;;  %v1024_v57 = vadd.f32 %v1023_v49, %v982_v48 }
 0x15e   : > { %v1025_v51 = vpop.f32.mrf.mxu1 }
 0x15f   : > { %v985_v52 = vpop.f32.mrf.mxu0  ;;  %v1111_v63 = vcombine.low %v1022_v56, %v1024_v57 }
 0x160   : > { %v1026_v53 = vpop.f32.mrf.mxu1 }
 0x161   : > { %v1118_v8 = vrot.slane %v1111_v63, %v1117_v0 }
 0x179   : > { %v1425_v59 = vpop.f32.mrf.mxu0 }
 0x17a   : > { %v1447_v60 = vpop.f32.mrf.mxu1 }
 0x17b   : > { %v1426_v61 = vpop.f32.mrf.mxu0 }
 0x17c   : > { %v1448_v62 = vpop.f32.mrf.mxu1  ;;  %v1427_v1 = vadd.f32 %v1426_v61, %v1425_v59 }
 0x17d   : > { %v1449_v2 = vadd.f32 %v1448_v62, %v1447_v60  ;;  %v1428_v3 = vpop.f32.mrf.mxu0 }
 0x17e   : > { %v1450_v4 = vpop.f32.mrf.mxu1 }
 0x17f   : > { %v1103_v5 = vadd.f32 %v1449_v2, %v1427_v1  ;;  %v1429_v6 = vpop.f32.mrf.mxu0 }
 0x180   : > { %v1451_v7 = vpop.f32.mrf.mxu1 }
 0x181   : > { %v1125_v9 = vrot.slane %v1103_v5, %v1117_v0 }
 0x183   : > { %v1126_v11 = vcombine.low %v1118_v8, %v1125_v9  ;;  %1133 = sbr.rel (%p1404_p1) target bundleno = 405 (0x195), region = 48 }
 0x185   : > { %v1128_v12 = vadd.f32 %v1126_v11, %v275_v10 }
 0x187   : > { %1129 = vst [vmem:[%s2061_s8] sm:$0x3f] %v1128_v12 }
 0x188   : > { %v1135_v13 = vld [vmem:[%s223_s0] sm:$0x7]  ;;  %v1139_v14 = vsub.s32 0, %v2107_v47  ;;  %v1143_v15 = vsub.s32 1, %v2107_v47  ;;  %v1147_v16 = vsub.s32 2, %v2107_v47 }
 0x18a   : > { %v1140_v17 = vrot.slane %v1135_v13, %v1139_v14  ;;  %v1144_v18 = vrot.slane %v1135_v13, %v1143_v15  ;;  %v1148_v19 = vrot.slane %v1135_v13, %v1147_v16 }
 0x18c   : > { %v1149_v20 = vcombine.low %v1140_v17, %v1144_v18  ;;  %v1163_v21 = vrot.slane %v1148_v19, %v1117_v0 }
 0x18e   : > { %v1156_v22 = vrot.slane %v1149_v20, %v1117_v0  ;;  %v1134_v23 = vld [vmem:[%s2061_s8] sm:$0x3f] }
 0x190   : > { %v1164_v24 = vcombine.low %v1156_v22, %v1163_v21 }
 0x192   : > { %v1166_v25 = vadd.f32 %v1164_v24, %v1134_v23 }
 0x194   : > { %1167 = vst [vmem:[%s2061_s8] sm:$0x3f] %v1166_v25 }
 0x195 PF: > { %p1168_p2 = scmp.eq.s32.totalorder %s1834_s19, 1 }
 0x197   : > { %p1169_p3 = pnand %p1168_p2, %p1130_p13 }
 0x199   : > { %1172 = sbr.rel (%p1169_p3) target bundleno = 448 (0x1c0), region = 52 }
 0x19e   : > { %v1173_v47 = vld [vmem:[%s2061_s8 + $0x2] sm:$0x3] }
 0x19f   : > { %v1405_v26 = vmul.f32 -1.442695, %v1173_v47 }
 0x1a1   : > { %1692 = vpow2.f32 %v1405_v26 }
 0x1ae   : > { %v1693_v27 = vpop.eup %1692 }
 0x1af   : > { %v1177_v28 = vadd.f32 1.0, %v1693_v27 }
 0x1b1   : > { %1694 = vrcp.f32 %v1177_v28 }
 0x1be   : > { %v1695_v29 = vpop.eup %1694 }
 0x1bf   : > { %1180 = vst [vmem:[%s2061_s8 + $0x2] sm:$0x3] %v1695_v29 }
 0x1c0 PF: > { %s19_s22 = sadd.s32 1, %s1846_s22   ;;  %s2249_s12 = smov %s1810_s13 }
 0x1c1   : > { %p16_p8 = scmp.ge.s32.totalorder %s19_s22, 6   ;;  %s2250_s13 = smov %s1814_s14 }
 0x1c2   : > { %s2251_s14 = smov %s2012_s9  ;;  %s2252_s15 = smov %s1822_s16 }
 0x1c3   : > { %s2253_s16 = smov %s1826_s17  ;;  %s2254_s17 = smov %s2017_s11 }
 0x1c4   : > { %s2255_s18 = smov %s1838_s20  ;;  %s2256_s19 = smov %s1842_s21 }
 0x1c5   : > { %s2257_s20 = smov %s2260_s23  ;;  %s2258_s21 = smov %s2264_s4 }
 0x1c6   :  { %18 = sbr.rel (!%p16_p8) target bundleno = 13 (0xd), region = 100 }
 0x1cb   :  { %1203 = vsyncpa [#allocation3], 1 }
 0x1cc   :  { %1205 = vsyncpa [#allocation3 + $0x1], 1 }
 0x1cd   :  { %1206 = vsyncpa [#allocation5], 1 }
 0x1ce   :  { %1208 = vsyncpa [#allocation5 + $0x1], 1 }

// kernel: h2onet_sf_forward.3
= control target key start
LH: loop header
LB: loop body
LE: loop exit
PB: predicated region body
PF: predicated region fallthrough
CT: control target
= control target key end

     0   :  { %s5537_s0 = inlined_call_operand.vmem [shape: bf16[2,512], index: 0, kind: input, shape index: {}]   ;;  %s5538_s1 = inlined_call_operand.hbm [shape: bf16[512,2688], index: 1, kind: input, shape index: {}]   ;;  %s5539_s2 = inlined_call_operand.hbm [shape: f32[1,2688], index: 2, kind: input, shape index: {}]   ;;  %s5540_s3 = inlined_call_operand.hbm [shape: bf16[896,128], index: 3, kind: input, shape index: {}]   ;;  %s5541_s4 = inlined_call_operand.vmem [shape: f32[9,2,1], index: 4, kind: input, shape index: {}]   ;;  %s5542_s5 = inlined_call_operand.hbm [shape: f32[3,2,896], index: 5, kind: output, shape index: {0}]   ;;  %s5543_s6 = inlined_call_operand.hbm [shape: f32[3,2,128], index: 6, kind: output, shape index: {1}]   ;;  %s5544_s7 = inlined_call_operand.hbm [shape: f32[3,2,896], index: 7, kind: output, shape index: {2}]   ;;  %s5545_s8 = inlined_call_operand.hbm [shape: f32[3,2,128], index: 8, kind: output, shape index: {3}]  }
   0x1   :  { %5552 = sst [smem:[#allocation24_spill]] %s5539_s2 }
   0x2   :  { %14 = vsyncpa [#allocation4], 0 }
   0x3   :  { %16 = vsyncpa [#allocation4 + $0x1], 0 }
   0x4   :  { %17 = vsyncpa [#allocation7], 0 }
   0x5   :  { %18 = vsyncpa [#allocation5], 0 }
   0x6   :  { %19 = vsyncpa [#allocation11], 0 }
   0x7   :  { %20 = vsyncpa [#allocation14], 0  ;;  %s4721_s27 = smov 0   ;;  %s4723_s28 = smov 0  }
   0x8   :  { %s4725_s29 = smov 0   ;;  %s4727_s30 = smov 0  }
   0x9 LB: > { %s4740_s9 = sadd.s32 4294967295, %s4648_s30   ;;  %s4743_s10 = sadd.s32 1, %s4648_s30   ;;  %s4648_s30 = sphi %s4727_s30, %s5576_s30   ;;  %s4644_s29 = sphi %s4725_s29, %s5575_s29   ;;  %s4640_s28 = sphi %s4723_s28, %s5574_s28   ;;  %s4636_s27 = sphi %s4721_s27, %s5573_s27  }
   0xa   : > { %s56_s11 = ssub.s32 %s4648_s30, %s4743_s10  ;;  %s59_s12 = sadd.s32 1, %s4644_s29 }
   0xb   : > { %p57_p0 = scmp.eq.s32.totalorder %s56_s11, 0  ;;  %p66_p1 = scmp.ne.s32.totalorder %s4644_s29, %s4640_s28 }
   0xc   : > { %p67_p2 = scmp.eq.s32.totalorder %s4648_s30, 0  ;;  %p72_p3 = scmp.ne.s32.totalorder %s4640_s28, %s4636_s27 }
   0xd   : > { %s4753_s13 = scalar_select %p57_p0, %s4644_s29, %s59_s12  }
   0xe   : > { %p4755_p4 = por %p67_p2, %p66_p1  ;;  %p5546_p5 = scmp.eq.s32.totalorder %s4740_s9, 0 }
   0xf   : > { %5553 = sst [smem:[#allocation20_spill]] %s4753_s13  ;;  %p3628_p6 = scmp.ge.s32.totalorder %s4648_s30, 1 }
  0x10   : > { %p230_p7 = scmp.lt.s32.totalorder %s4648_s30, 5  ;;  %p4764_p8 = por %p5546_p5, %p72_p3 }
  0x11   : > { %s4650_s17 = smov [#allocation6]   ;;  %p4048_p12 = scmp.lt.s32.totalorder %s4648_s30, 4 }
  0x12   : > { %s5555_s15 = scalar_select %p4764_p8, 1, 0 }
  0x13   : > { %p4769_p10 = pnand %p3628_p6, %p230_p7  ;;  %s243_s18 = sshll.u32 %s4650_s17, 4  ;;  %s244_s18 = int_to_ptr.vmem [resolvable:$true] %s243_s18 }
  0x14   : > { %s4651_s20 = smov [#allocation8]   ;;  %p4784_p0 = pnand %p4048_p12, %p4755_p4 }
  0x15   : > { %s5556_s16 = scalar_select %p4769_p10, 1, 0 }
  0x16   : > { %p4035_p11 = pneg %p4769_p10  ;;  %s253_s21 = sshll.u32 %s4651_s20, 4  ;;  %s254_s21 = int_to_ptr.vmem [resolvable:$true] %s253_s21 }
  0x17   : > { %s5558_s22 = scalar_select %p4784_p0, 1, 0 }
  0x18   : > { %p4778_p13 = pnand %p4035_p11, %p5546_p5  ;;  %s4433_s23 = scalar_lea.vmem %s244_s18, 336 }
  0x19   : > { %p4434_p2 = scmp.ne.s32.totalorder %s244_s18, %s4433_s23  ;;  %s4440_s24 = scalar_lea.vmem %s244_s18, 352 }
  0x1a   : > { %p4424_p1 = pneg %p4778_p13  ;;  %p4441_p7 = scmp.lt.s32.totalorder %s244_s18, %s244_s18 }
  0x1b   : > { %p4442_p11 = scmp.lt.s32.totalorder %s4440_s24, %s4433_s23 }
  0x1c   : > { %p4436_p3 = pnand %p4434_p2, %p4424_p1 }
  0x1d   : > { %p4443_p9 = por %p4442_p11, %p4441_p7 }
  0x1e   : > { %p4437_p6 = pneg %p4436_p3 }
  0x20   : > { %p4444_p5 = pnand %p4443_p9, %p4437_p6 }
  0x22   : > { %4447 = shalt.err (!%p4444_p5)
}
  0x23   : > { %s5559_s2 = sld [smem:[#allocation24_spill]]  ;;  %s4459_s27 = scalar_lea.vmem %s254_s21, 7168 }
  0x24   : > { %p4460_p4 = scmp.ne.s32.totalorder %s254_s21, %s4459_s27  ;;  %p4467_p3 = scmp.lt.s32.totalorder %s254_s21, %s254_s21 }
  0x25   : > { %p4468_p8 = scmp.lt.s32.totalorder %s4459_s27, %s4459_s27 }
  0x26   : > { %p4462_p12 = pnand %p4460_p4, %p4424_p1 }
  0x27   : > { %p4469_p10 = por %p4468_p8, %p4467_p3 }
  0x28   : > { %p4463_p2 = pneg %p4462_p12 }
  0x29   : > { %4038 = dma.hbm_to_vmem [thread:$0]  (!%p4778_p13), %s5559_s2, 336, %s244_s18, [#allocation7]  }
  0x2a   : > { %p4470_p0 = pnand %p4469_p10, %p4463_p2 }
  0x2c   : > { %4473 = shalt.err (!%p4470_p0)
}
  0x2d   : > { %s4652_s11 = smov 64   ;;  %s4653_s12 = smov 4  }
  0x2e   : > { %4041 = dma.hbm_to_vmem [thread:$0]  (!%p4778_p13), %s5540_s3, 7168, %s254_s21, [#allocation7], %s4652_s11, %s4652_s11, %s4653_s12  }
  0x2f   : > { %s276_s18 = sand.u32 1, %s4644_s29   ;;  %s4007_s20 = smul.u32 21504, %s4648_s30 }
  0x30   : > { %s4006_s23 = smul.u32 1344, %s276_s18  ;;  %s4815_s19 = scalar_lea.sflag [#allocation4], %s276_s18 }
  0x31   : > { %s4811_s26 = scalar_lea.hbm %s5538_s1, %s4007_s20  ;;  %p5560_p8 = scmp.ne.s32.totalorder %s5558_s22, 0 }
  0x32   : > { %s280_s27 = scalar_lea.vmem [#allocation3], %s4006_s23  ;;  %s4474_s13 = scalar_lea.hbm %s4811_s26, 21504 }
  0x33   : > { %s288_s2 = sshll.u32 %s280_s27, 4  ;;  %p4475_p5 = scmp.ne.s32.totalorder %s4811_s26, %s4474_s13  ;;  %s4813_s2 = int_to_ptr.vmem [resolvable:$true] %s288_s2 }
  0x34   : > { %p4476_p9 = pneg %p5560_p8  ;;  %s4479_s11 = scalar_lea.hbm %s5538_s1, 86016 }
  0x35   : > { %p4480_p0 = scmp.lt.s32.totalorder %s4811_s26, %s5538_s1  ;;  %p4481_p1 = scmp.lt.s32.totalorder %s4479_s11, %s4474_s13 }
  0x36   : > { %p4477_p10 = pnand %p4476_p9, %p4475_p5 }
  0x37   : > { %p4482_p6 = por %p4481_p1, %p4480_p0 }
  0x38   : > { %p4478_p13 = pneg %p4477_p10 }
  0x3a   : > { %p4483_p7 = pnand %p4482_p6, %p4478_p13 }
  0x3c   : > { %4486 = shalt.err (!%p4483_p7)
}
  0x3d   : > { %s4487_s17 = scalar_lea.vmem %s4813_s2, 21504  ;;  %s4654_s18 = smov [#allocation3]  }
  0x3e   : > { %p4488_p11 = scmp.ne.s32.totalorder %s4813_s2, %s4487_s17  ;;  %s4492_s20 = sshll.u32 %s4654_s18, 4  ;;  %s4493_s20 = int_to_ptr.vmem [resolvable:$false] %s4492_s20 }
  0x3f   : > { %s4494_s23 = scalar_lea.vmem %s4493_s20, 43008  ;;  %p4495_p2 = scmp.lt.s32.totalorder %s4813_s2, %s4493_s20 }
  0x40   : > { %p4490_p4 = pnand %p4488_p11, %p4476_p9  ;;  %p4496_p3 = scmp.lt.s32.totalorder %s4494_s23, %s4487_s17 }
  0x42   : > { %p4491_p12 = pneg %p4490_p4  ;;  %p4497_p5 = por %p4496_p3, %p4495_p2 }
  0x44   : > { %p4498_p10 = pnand %p4497_p5, %p4491_p12 }
  0x46   : > { %4501 = shalt.err (!%p4498_p10)
}
  0x47   : > { %s4655_s13 = smov 1344   ;;  %s4656_s24 = smov 84  }
  0x48   : > { %4045 = dma.hbm_to_vmem [thread:$0]  (!%p5560_p8), %s4811_s26, 21504, %s4813_s2, %s4815_s19, %s4655_s13, %s4655_s13, %s4656_s24  }
  0x49   : > { %p5561_p9 = scmp.ne.s32.totalorder %s5556_s16, 0 }
  0x4a   : > { %s302_s25 = sand.u32 (!%p5561_p9), 1, %s4640_s28   ;;  %p5562_p13 = scmp.ne.s32.totalorder (!%p5561_p9), %s5555_s15, 0 }
  0x4b   : > { %300 = sbr.rel (%p5561_p9) target bundleno = 1005 (0x3ed), region = 40  ;;  %s303_s30 = scalar_lea.sflag (!%p5561_p9), [#allocation4], %s302_s25 }
  0x4c   : > { %s4008_s27 = smul.u32 (!%p5561_p9), 1344, %s302_s25 }
  0x4e   : > { %s4839_s21 = scalar_lea.vmem (!%p5561_p9), [#allocation3], %s4008_s27 }
  0x50   : > { %4615 = dma.done.wait (%p5562_p13), %s303_s30, 21504  }
  0x51   : > { %4617 = vsyncadd (%p5562_p13), %s303_s30, 4294945792  ;;  %p5563_p0 = scmp.eq.s32.totalorder %s4740_s9, 0 }
  0x53   : > { %4619 = dma.done.wait (%p5563_p0), [#allocation7], 7504   ;;  %p5564_p8 = pmov %p5563_p0 }
  0x54   : > { %p345_p1 = scmp.lt.s32.totalorder %s4740_s9, 3  ;;  %p5565_p6 = scmp.ne.s32.totalorder %s4740_s9, 0 }
  0x55   : > { %4621 = vsyncadd (%p5564_p8), [#allocation7], 4294959792 }
  0x56   : > { %s4851_s2 = scalar_select %p345_p1, %s4740_s9, 3 }
  0x57   : > { %353 = sbr.rel (%p5565_p6) target bundleno = 96 (0x60), region = 56 }
  0x58   : > { %s347_s26 = scalar_lea.vmem %s5537_s0, %s4851_s2 }
  0x5c   : > { %v4657_v0 = vmov 0.0  }
  0x5d   : > { %354 = vst [vmem:[#allocation2] sm:$0xff] %v4657_v0  ;;  %355 = vst [vmem:[#allocation2 + $0x8] sm:$0xff] %v4657_v0 }
  0x5e   : > { %356 = vst [vmem:[#allocation2 + $0x10] sm:$0xff] %v4657_v0  ;;  %357 = vst [vmem:[#allocation2 + $0x18] sm:$0xff] %v4657_v0 }
  0x5f   : > { %358 = vst [vmem:[#allocation2 + $0x20] sm:$0xff] %v4657_v0  ;;  %359 = vst [vmem:[#allocation2 + $0x28] sm:$0x3] %v4657_v0 }
  0x60 PF: > { %v4116_v1 = vld [vmem:[%s4839_s21 + $0x49c] ss:$84 sps:$4 sm:$0xff]   ;;  %v4118_v2 = vld [vmem:[%s4839_s21 + $0x4a4] ss:$84 sps:$4 sm:$0xff]   ;;  %v4658_v3 = vmov 0   ;;  %vm4660_vm0 = vmmov 0  }
  0x61   : > { %1423 = vmatprep.mubr.bf16.mxu0 %v4658_v3  ;;  %1464 = vmatprep.mubr.bf16.mxu1 %v4658_v3  ;;  %v4120_v4 = vld [vmem:[%s4839_s21 + $0x498] ss:$84 sps:$4 sm:$0xff]   ;;  %v4121_v5 = vld [vmem:[%s4839_s21 + $0x4a0] ss:$84 sps:$4 sm:$0xff]   ;;  %v4124_v7 = vld [vmem:[%s4839_s21 + $0x3fc] ss:$84 sps:$4 sm:$0xff]  }
  0x62   : > { %1391 = vmatprep.subr.bf16.mxu0 %v4116_v1  ;;  %1432 = vmatprep.subr.bf16.mxu1 %v4118_v2  ;;  %v4122_v6 = vld [vmem:[%s4839_s21 + $0x3f4] ss:$84 sps:$4 sm:$0xff]   ;;  %v4126_v8 = vld [vmem:[%s4839_s21 + $0x3f0] ss:$84 sps:$4 sm:$0xff]   ;;  %v4127_v9 = vld [vmem:[%s4839_s21 + $0x3f8] ss:$84 sps:$4 sm:$0xff]  }
  0x63   : > { %1392 = vmatpush1.bf16.msra.mxu0 %v4120_v4  ;;  %1433 = vmatpush1.bf16.msra.mxu1 %v4121_v5  ;;  %v4128_v10 = vld [vmem:[%s4839_s21 + $0x34c] ss:$84 sps:$4 sm:$0xff]   ;;  %v4130_v11 = vld [vmem:[%s4839_s21 + $0x354] ss:$84 sps:$4 sm:$0xff]   ;;  %v4133_v13 = vld [vmem:[%s4839_s21 + $0x350] ss:$84 sps:$4 sm:$0xff]  }
  0x64   : > { %1393 = vmatprep.subr.bf16.mxu0 %v4122_v6  ;;  %1434 = vmatprep.subr.bf16.mxu1 %v4124_v7  ;;  %v4132_v12 = vld [vmem:[%s4839_s21 + $0x348] ss:$84 sps:$4 sm:$0xff]   ;;  %v4134_v14 = vld [vmem:[%s4839_s21 + $0x2a4] ss:$84 sps:$4 sm:$0xff]   ;;  %v4136_v15 = vld [vmem:[%s4839_s21 + $0x2ac] ss:$84 sps:$4 sm:$0xff]  }
  0x65   : > { %v4138_v16 = vld [vmem:[%s4839_s21 + $0x2a0] ss:$84 sps:$4 sm:$0xff]   ;;  %v4139_v17 = vld [vmem:[%s4839_s21 + $0x2a8] ss:$84 sps:$4 sm:$0xff]   ;;  %v4142_v19 = vld [vmem:[%s4839_s21 + $0x204] ss:$84 sps:$4 sm:$0xff]  }
  0x66   : > { %v4140_v18 = vld [vmem:[%s4839_s21 + $0x1fc] ss:$84 sps:$4 sm:$0xff]   ;;  %v4144_v20 = vld [vmem:[%s4839_s21 + $0x1f8] ss:$84 sps:$4 sm:$0xff]   ;;  %v4145_v21 = vld [vmem:[%s4839_s21 + $0x200] ss:$84 sps:$4 sm:$0xff]  }
  0x67   : > { %1394 = vmatpush1.bf16.msra.mxu0 %v4126_v8  ;;  %1435 = vmatpush1.bf16.msra.mxu1 %v4127_v9  ;;  %v4146_v22 = vld [vmem:[%s4839_s21 + $0x154] ss:$84 sps:$4 sm:$0xff]   ;;  %v4148_v23 = vld [vmem:[%s4839_s21 + $0x15c] ss:$84 sps:$4 sm:$0xff]   ;;  %v4151_v25 = vld [vmem:[%s4839_s21 + $0x158] ss:$84 sps:$4 sm:$0xff]  }
  0x68   : > { %1395 = vmatprep.subr.bf16.mxu0 %v4128_v10  ;;  %1436 = vmatprep.subr.bf16.mxu1 %v4130_v11  ;;  %v4150_v24 = vld [vmem:[%s4839_s21 + $0x150] ss:$84 sps:$4 sm:$0xff]   ;;  %v4152_v26 = vld [vmem:[%s4839_s21 + $0xac] ss:$84 sps:$4 sm:$0xff]   ;;  %v4154_v27 = vld [vmem:[%s4839_s21 + $0xb4] ss:$84 sps:$4 sm:$0xff]  }
  0x69   : > { %v4156_v28 = vld [vmem:[%s4839_s21 + $0xa8] ss:$84 sps:$4 sm:$0xff]   ;;  %v4157_v29 = vld [vmem:[%s4839_s21 + $0xb0] ss:$84 sps:$4 sm:$0xff]   ;;  %v4160_v31 = vld [vmem:[%s4839_s21 + $0xc] ss:$84 sps:$4 sm:$0xff]  }
  0x6a   : > { %v4158_v30 = vld [vmem:[%s4839_s21 + $0x4] ss:$84 sps:$4 sm:$0xff]   ;;  %v4162_v32 = vld [vmem:[%s4839_s21] ss:$84 sps:$4 sm:$0xff]   ;;  %v4163_v33 = vld [vmem:[%s4839_s21 + $0x8] ss:$84 sps:$4 sm:$0xff]  }
  0x6b   : > { %1396 = vmatpush1.bf16.msra.mxu0 %v4132_v12  ;;  %1437 = vmatpush1.bf16.msra.mxu1 %v4133_v13  ;;  %v4166_v34 = vld [vmem:[%s4839_s21 + $0x4ac] ss:$84 sps:$4 sm:$0xff]   ;;  %v4169_v35 = vld [vmem:[%s4839_s21 + $0x4b4] ss:$84 sps:$4 sm:$0xff]   ;;  %v4167_v38 = vld [vmem:[%s4839_s21 + $0x4b0] ss:$84 sps:$4 sm:$0xff]  }
  0x6c   : > { %1397 = vmatprep.subr.bf16.mxu0 %v4134_v14  ;;  %1438 = vmatprep.subr.bf16.mxu1 %v4136_v15  ;;  %v4900_v36 = vld [vmem:[%s347_s26] sm:$0x1]  ;;  %v4164_v37 = vld [vmem:[%s4839_s21 + $0x4a8] ss:$84 sps:$4 sm:$0xff]   ;;  %v4172_v39 = vld [vmem:[%s4839_s21 + $0x404] ss:$84 sps:$4 sm:$0xff]  }
  0x6d   : > { %v4175_v40 = vld [vmem:[%s4839_s21 + $0x40c] ss:$84 sps:$4 sm:$0xff]   ;;  %v4173_v42 = vld [vmem:[%s4839_s21 + $0x408] ss:$84 sps:$4 sm:$0xff]   ;;  %v4181_v44 = vld [vmem:[%s4839_s21 + $0x364] ss:$84 sps:$4 sm:$0xff]  }
  0x6e   : > { %v4170_v41 = vld [vmem:[%s4839_s21 + $0x400] ss:$84 sps:$4 sm:$0xff]   ;;  %v4178_v43 = vld [vmem:[%s4839_s21 + $0x35c] ss:$84 sps:$4 sm:$0xff]   ;;  %v4176_v45 = vld [vmem:[%s4839_s21 + $0x358] ss:$84 sps:$4 sm:$0xff]  }
  0x6f   : > { %1398 = vmatpush1.bf16.msra.mxu0 %v4138_v16  ;;  %1439 = vmatpush1.bf16.msra.mxu1 %v4139_v17  ;;  %v4179_v46 = vld [vmem:[%s4839_s21 + $0x360] ss:$84 sps:$4 sm:$0xff]   ;;  %v4187_v48 = vld [vmem:[%s4839_s21 + $0x2bc] ss:$84 sps:$4 sm:$0xff]   ;;  %v4185_v50 = vld [vmem:[%s4839_s21 + $0x2b8] ss:$84 sps:$4 sm:$0xff]  }
  0x70   : > { %1399 = vmatprep.subr.bf16.mxu0 %v4140_v18  ;;  %1440 = vmatprep.subr.bf16.mxu1 %v4142_v19  ;;  %v4184_v47 = vld [vmem:[%s4839_s21 + $0x2b4] ss:$84 sps:$4 sm:$0xff]   ;;  %v4182_v49 = vld [vmem:[%s4839_s21 + $0x2b0] ss:$84 sps:$4 sm:$0xff]   ;;  %v4190_v51 = vld [vmem:[%s4839_s21 + $0x20c] ss:$84 sps:$4 sm:$0xff]  }
  0x71   : > { %v4193_v52 = vld [vmem:[%s4839_s21 + $0x214] ss:$84 sps:$4 sm:$0xff]   ;;  %v4191_v54 = vld [vmem:[%s4839_s21 + $0x210] ss:$84 sps:$4 sm:$0xff]   ;;  %v4199_v56 = vld [vmem:[%s4839_s21 + $0x16c] ss:$84 sps:$4 sm:$0xff]  }
  0x72   : > { %v4188_v53 = vld [vmem:[%s4839_s21 + $0x208] ss:$84 sps:$4 sm:$0xff]   ;;  %v4196_v55 = vld [vmem:[%s4839_s21 + $0x164] ss:$84 sps:$4 sm:$0xff]   ;;  %v4194_v57 = vld [vmem:[%s4839_s21 + $0x160] ss:$84 sps:$4 sm:$0xff]  }
  0x73   : > { %1400 = vmatpush1.bf16.msra.mxu0 %v4144_v20  ;;  %1441 = vmatpush1.bf16.msra.mxu1 %v4145_v21  ;;  %v4197_v58 = vld [vmem:[%s4839_s21 + $0x168] ss:$84 sps:$4 sm:$0xff]   ;;  %v4205_v60 = vld [vmem:[%s4839_s21 + $0xc4] ss:$84 sps:$4 sm:$0xff]   ;;  %v4203_v62 = vld [vmem:[%s4839_s21 + $0xc0] ss:$84 sps:$4 sm:$0xff]  }
  0x74   : > { %1401 = vmatprep.subr.bf16.mxu0 %v4146_v22  ;;  %1442 = vmatprep.subr.bf16.mxu1 %v4148_v23  ;;  %v4202_v59 = vld [vmem:[%s4839_s21 + $0xbc] ss:$84 sps:$4 sm:$0xff]   ;;  %v4200_v61 = vld [vmem:[%s4839_s21 + $0xb8] ss:$84 sps:$4 sm:$0xff]   ;;  %v4208_v63 = vld [vmem:[%s4839_s21 + $0x14] ss:$84 sps:$4 sm:$0xff]  }
  0x75   : > { %v4211_v0 = vld [vmem:[%s4839_s21 + $0x1c] ss:$84 sps:$4 sm:$0xff]   ;;  %v4209_v2 = vld [vmem:[%s4839_s21 + $0x18] ss:$84 sps:$4 sm:$0xff]   ;;  %v4215_v7 = vld [vmem:[%s4839_s21 + $0x4c0] ss:$84 sps:$4 sm:$0xff]  }
  0x76   : > { %v4206_v1 = vld [vmem:[%s4839_s21 + $0x10] ss:$84 sps:$4 sm:$0xff]   ;;  %v4212_v6 = vld [vmem:[%s4839_s21 + $0x4b8] ss:$84 sps:$4 sm:$0xff]   ;;  %v4220_v8 = vld [vmem:[%s4839_s21 + $0x414] ss:$84 sps:$4 sm:$0xff]  }
  0x77   : > { %1402 = vmatpush1.bf16.msra.mxu0 %v4150_v24  ;;  %1443 = vmatpush1.bf16.msra.mxu1 %v4151_v25  ;;  %v4214_v4 = vld [vmem:[%s4839_s21 + $0x4bc] ss:$84 sps:$4 sm:$0xff]   ;;  %v4217_v5 = vld [vmem:[%s4839_s21 + $0x4c4] ss:$84 sps:$4 sm:$0xff]   ;;  %v4226_v12 = vld [vmem:[%s4839_s21 + $0x36c] ss:$84 sps:$4 sm:$0xff]  }
  0x78   : > { %1403 = vmatprep.subr.bf16.mxu0 %v4152_v26  ;;  %1444 = vmatprep.subr.bf16.mxu1 %v4154_v27  ;;  %v4223_v9 = vld [vmem:[%s4839_s21 + $0x41c] ss:$84 sps:$4 sm:$0xff]   ;;  %v4221_v11 = vld [vmem:[%s4839_s21 + $0x418] ss:$84 sps:$4 sm:$0xff]   ;;  %v4229_v13 = vld [vmem:[%s4839_s21 + $0x374] ss:$84 sps:$4 sm:$0xff]  }
  0x79   : > { %v4218_v10 = vld [vmem:[%s4839_s21 + $0x410] ss:$84 sps:$4 sm:$0xff]   ;;  %v4224_v14 = vld [vmem:[%s4839_s21 + $0x368] ss:$84 sps:$4 sm:$0xff]   ;;  %v4235_v17 = vld [vmem:[%s4839_s21 + $0x2cc] ss:$84 sps:$4 sm:$0xff]  }
  0x7a   : > { %v4227_v15 = vld [vmem:[%s4839_s21 + $0x370] ss:$84 sps:$4 sm:$0xff]   ;;  %v4230_v18 = vld [vmem:[%s4839_s21 + $0x2c0] ss:$84 sps:$4 sm:$0xff]   ;;  %v4233_v19 = vld [vmem:[%s4839_s21 + $0x2c8] ss:$84 sps:$4 sm:$0xff]  }
  0x7b   : > { %1404 = vmatpush1.bf16.msra.mxu0 %v4156_v28  ;;  %1445 = vmatpush1.bf16.msra.mxu1 %v4157_v29  ;;  %v4232_v16 = vld [vmem:[%s4839_s21 + $0x2c4] ss:$84 sps:$4 sm:$0xff]   ;;  %v4238_v20 = vld [vmem:[%s4839_s21 + $0x21c] ss:$84 sps:$4 sm:$0xff]   ;;  %v4239_v23 = vld [vmem:[%s4839_s21 + $0x220] ss:$84 sps:$4 sm:$0xff]  }
  0x7c   : > { %1405 = vmatprep.subr.bf16.mxu0 %v4158_v30  ;;  %1446 = vmatprep.subr.bf16.mxu1 %v4160_v31  ;;  %v4241_v21 = vld [vmem:[%s4839_s21 + $0x224] ss:$84 sps:$4 sm:$0xff]   ;;  %v4244_v24 = vld [vmem:[%s4839_s21 + $0x174] ss:$84 sps:$4 sm:$0xff]   ;;  %v4247_v25 = vld [vmem:[%s4839_s21 + $0x17c] ss:$84 sps:$4 sm:$0xff]  }
  0x7d   : > { %v4236_v22 = vld [vmem:[%s4839_s21 + $0x218] ss:$84 sps:$4 sm:$0xff]   ;;  %v4242_v26 = vld [vmem:[%s4839_s21 + $0x170] ss:$84 sps:$4 sm:$0xff]   ;;  %v4253_v29 = vld [vmem:[%s4839_s21 + $0xd4] ss:$84 sps:$4 sm:$0xff]  }
  0x7e   : > { %v4245_v27 = vld [vmem:[%s4839_s21 + $0x178] ss:$84 sps:$4 sm:$0xff]   ;;  %v4248_v30 = vld [vmem:[%s4839_s21 + $0xc8] ss:$84 sps:$4 sm:$0xff]   ;;  %v4251_v31 = vld [vmem:[%s4839_s21 + $0xd0] ss:$84 sps:$4 sm:$0xff]  }
  0x7f   : > { %1406 = vmatpush1.bf16.msra.mxu0 %v4162_v32  ;;  %1447 = vmatpush1.bf16.msra.mxu1 %v4163_v33  ;;  %v4250_v28 = vld [vmem:[%s4839_s21 + $0xcc] ss:$84 sps:$4 sm:$0xff]   ;;  %v4256_v32 = vld [vmem:[%s4839_s21 + $0x24] ss:$84 sps:$4 sm:$0xff]   ;;  %p3807_p7 = scmp.ne.s32.totalorder %s4740_s9, 3 }
  0x80   : > { %1473 = vmatprep.subr.bf16.mxu0 %v4166_v34  ;;  %1514 = vmatprep.subr.bf16.mxu1 %v4169_v35  ;;  %v4259_v33 = vld [vmem:[%s4839_s21 + $0x2c] ss:$84 sps:$4 sm:$0xff]   ;;  %v4257_v35 = vld [vmem:[%s4839_s21 + $0x28] ss:$84 sps:$4 sm:$0xff]  }
  0x81   : > { %v4254_v34 = vld [vmem:[%s4839_s21 + $0x20] ss:$84 sps:$4 sm:$0xff]  }
  0x82   : > { %1424 = vmatmul.mubr.bf16.vlgmr.msra.gmra.mxu0 %v4900_v36  ;;  %1465 = vmatmul.mubr.bf16.vlgmr.msra.gmra.mxu1 %v4900_v36 }
  0x83   : > { %1474 = vmatpush1.bf16.msra.mxu0 %v4164_v37  ;;  %1515 = vmatpush1.bf16.msra.mxu1 %v4167_v38  ;;  %v4262_v37 = vld [vmem:[%s4839_s21 + $0x4cc] ss:$84 sps:$4 sm:$0xff]   ;;  %v4265_v38 = vld [vmem:[%s4839_s21 + $0x4d4] ss:$84 sps:$4 sm:$0xff]  }
  0x84   : > { %1475 = vmatprep.subr.bf16.mxu0 %v4172_v39  ;;  %1516 = vmatprep.subr.bf16.mxu1 %v4175_v40  ;;  %v4260_v39 = vld [vmem:[%s4839_s21 + $0x4c8] ss:$84 sps:$4 sm:$0xff]   ;;  %v4263_v40 = vld [vmem:[%s4839_s21 + $0x4d0] ss:$84 sps:$4 sm:$0xff]  }
  0x85   : > { %1505 = vmatprep.mubr.bf16.mxu0 %v4658_v3  ;;  %1546 = vmatprep.mubr.bf16.mxu1 %v4658_v3 }
  0x87   : > { %1476 = vmatpush1.bf16.msra.mxu0 %v4170_v41  ;;  %1517 = vmatpush1.bf16.msra.mxu1 %v4173_v42  ;;  %v4268_v41 = vld [vmem:[%s4839_s21 + $0x424] ss:$84 sps:$4 sm:$0xff]   ;;  %v4271_v42 = vld [vmem:[%s4839_s21 + $0x42c] ss:$84 sps:$4 sm:$0xff]  }
  0x88   : > { %1477 = vmatprep.subr.bf16.mxu0 %v4178_v43  ;;  %1518 = vmatprep.subr.bf16.mxu1 %v4181_v44  ;;  %v4266_v43 = vld [vmem:[%s4839_s21 + $0x420] ss:$84 sps:$4 sm:$0xff]   ;;  %v4269_v44 = vld [vmem:[%s4839_s21 + $0x428] ss:$84 sps:$4 sm:$0xff]  }
  0x8b   : > { %1478 = vmatpush1.bf16.msra.mxu0 %v4176_v45  ;;  %1519 = vmatpush1.bf16.msra.mxu1 %v4179_v46  ;;  %v4274_v45 = vld [vmem:[%s4839_s21 + $0x37c] ss:$84 sps:$4 sm:$0xff]   ;;  %v4277_v46 = vld [vmem:[%s4839_s21 + $0x384] ss:$84 sps:$4 sm:$0xff]  }
  0x8c   : > { %1479 = vmatprep.subr.bf16.mxu0 %v4184_v47  ;;  %1520 = vmatprep.subr.bf16.mxu1 %v4187_v48  ;;  %v4272_v47 = vld [vmem:[%s4839_s21 + $0x378] ss:$84 sps:$4 sm:$0xff]   ;;  %v4275_v48 = vld [vmem:[%s4839_s21 + $0x380] ss:$84 sps:$4 sm:$0xff]  }
  0x8f   : > { %1480 = vmatpush1.bf16.msra.mxu0 %v4182_v49  ;;  %1521 = vmatpush1.bf16.msra.mxu1 %v4185_v50  ;;  %v4280_v49 = vld [vmem:[%s4839_s21 + $0x2d4] ss:$84 sps:$4 sm:$0xff]   ;;  %v4283_v50 = vld [vmem:[%s4839_s21 + $0x2dc] ss:$84 sps:$4 sm:$0xff]  }
  0x90   : > { %1481 = vmatprep.subr.bf16.mxu0 %v4190_v51  ;;  %1522 = vmatprep.subr.bf16.mxu1 %v4193_v52  ;;  %v4278_v51 = vld [vmem:[%s4839_s21 + $0x2d0] ss:$84 sps:$4 sm:$0xff]   ;;  %v4281_v52 = vld [vmem:[%s4839_s21 + $0x2d8] ss:$84 sps:$4 sm:$0xff]  }
  0x93   : > { %1482 = vmatpush1.bf16.msra.mxu0 %v4188_v53  ;;  %1523 = vmatpush1.bf16.msra.mxu1 %v4191_v54  ;;  %v4286_v53 = vld [vmem:[%s4839_s21 + $0x22c] ss:$84 sps:$4 sm:$0xff]   ;;  %v4289_v54 = vld [vmem:[%s4839_s21 + $0x234] ss:$84 sps:$4 sm:$0xff]  }
  0x94   : > { %1483 = vmatprep.subr.bf16.mxu0 %v4196_v55  ;;  %1524 = vmatprep.subr.bf16.mxu1 %v4199_v56  ;;  %v4284_v55 = vld [vmem:[%s4839_s21 + $0x228] ss:$84 sps:$4 sm:$0xff]   ;;  %v4287_v56 = vld [vmem:[%s4839_s21 + $0x230] ss:$84 sps:$4 sm:$0xff]  }
  0x97   : > { %1484 = vmatpush1.bf16.msra.mxu0 %v4194_v57  ;;  %1525 = vmatpush1.bf16.msra.mxu1 %v4197_v58  ;;  %v4292_v57 = vld [vmem:[%s4839_s21 + $0x184] ss:$84 sps:$4 sm:$0xff]   ;;  %v4295_v58 = vld [vmem:[%s4839_s21 + $0x18c] ss:$84 sps:$4 sm:$0xff]  }
  0x98   : > { %1485 = vmatprep.subr.bf16.mxu0 %v4202_v59  ;;  %1526 = vmatprep.subr.bf16.mxu1 %v4205_v60  ;;  %v4290_v59 = vld [vmem:[%s4839_s21 + $0x180] ss:$84 sps:$4 sm:$0xff]   ;;  %v4293_v60 = vld [vmem:[%s4839_s21 + $0x188] ss:$84 sps:$4 sm:$0xff]  }
  0x9b   : > { %1486 = vmatpush1.bf16.msra.mxu0 %v4200_v61  ;;  %1527 = vmatpush1.bf16.msra.mxu1 %v4203_v62  ;;  %v4298_v61 = vld [vmem:[%s4839_s21 + $0xdc] ss:$84 sps:$4 sm:$0xff]   ;;  %v4301_v62 = vld [vmem:[%s4839_s21 + $0xe4] ss:$84 sps:$4 sm:$0xff]  }
  0x9c   : > { %1487 = vmatprep.subr.bf16.mxu0 %v4208_v63  ;;  %1528 = vmatprep.subr.bf16.mxu1 %v4211_v0  ;;  %v4296_v63 = vld [vmem:[%s4839_s21 + $0xd8] ss:$84 sps:$4 sm:$0xff]   ;;  %v4299_v0 = vld [vmem:[%s4839_s21 + $0xe0] ss:$84 sps:$4 sm:$0xff]  }
  0x9f   : > { %1488 = vmatpush1.bf16.msra.mxu0 %v4206_v1  ;;  %1529 = vmatpush1.bf16.msra.mxu1 %v4209_v2  ;;  %v4304_v1 = vld [vmem:[%s4839_s21 + $0x34] ss:$84 sps:$4 sm:$0xff]   ;;  %v4307_v2 = vld [vmem:[%s4839_s21 + $0x3c] ss:$84 sps:$4 sm:$0xff]  }
  0xa0   : > { %1555 = vmatprep.subr.bf16.mxu0 %v4214_v4  ;;  %1596 = vmatprep.subr.bf16.mxu1 %v4217_v5  ;;  %v4302_v4 = vld [vmem:[%s4839_s21 + $0x30] ss:$84 sps:$4 sm:$0xff]   ;;  %v4305_v5 = vld [vmem:[%s4839_s21 + $0x38] ss:$84 sps:$4 sm:$0xff]  }
  0xa2   : > { %1506 = vmatmul.mubr.bf16.vlgmr.msra.gmra.mxu0 %v4900_v36  ;;  %1547 = vmatmul.mubr.bf16.vlgmr.msra.gmra.mxu1 %v4900_v36 }
  0xa3   : > { %1556 = vmatpush1.bf16.msra.mxu0 %v4212_v6  ;;  %1597 = vmatpush1.bf16.msra.mxu1 %v4215_v7  ;;  %v4310_v6 = vld [vmem:[%s4839_s21 + $0x4dc] ss:$84 sps:$4 sm:$0xff]   ;;  %v4313_v7 = vld [vmem:[%s4839_s21 + $0x4e4] ss:$84 sps:$4 sm:$0xff]  }
  0xa4   : > { %1557 = vmatprep.subr.bf16.mxu0 %v4220_v8  ;;  %1598 = vmatprep.subr.bf16.mxu1 %v4223_v9  ;;  %v4308_v8 = vld [vmem:[%s4839_s21 + $0x4d8] ss:$84 sps:$4 sm:$0xff]   ;;  %v4311_v9 = vld [vmem:[%s4839_s21 + $0x4e0] ss:$84 sps:$4 sm:$0xff]  }
  0xa5   : > { %1587 = vmatprep.mubr.bf16.mxu0 %v4658_v3  ;;  %1628 = vmatprep.mubr.bf16.mxu1 %v4658_v3 }
  0xa7   : > { %1558 = vmatpush1.bf16.msra.mxu0 %v4218_v10  ;;  %1599 = vmatpush1.bf16.msra.mxu1 %v4221_v11  ;;  %v4316_v10 = vld [vmem:[%s4839_s21 + $0x434] ss:$84 sps:$4 sm:$0xff]   ;;  %v4319_v11 = vld [vmem:[%s4839_s21 + $0x43c] ss:$84 sps:$4 sm:$0xff]  }
  0xa8   : > { %1559 = vmatprep.subr.bf16.mxu0 %v4226_v12  ;;  %1600 = vmatprep.subr.bf16.mxu1 %v4229_v13  ;;  %v4314_v12 = vld [vmem:[%s4839_s21 + $0x430] ss:$84 sps:$4 sm:$0xff]   ;;  %v4317_v13 = vld [vmem:[%s4839_s21 + $0x438] ss:$84 sps:$4 sm:$0xff]  }
  0xab   : > { %1560 = vmatpush1.bf16.msra.mxu0 %v4224_v14  ;;  %1601 = vmatpush1.bf16.msra.mxu1 %v4227_v15  ;;  %v4322_v14 = vld [vmem:[%s4839_s21 + $0x38c] ss:$84 sps:$4 sm:$0xff]   ;;  %v4325_v15 = vld [vmem:[%s4839_s21 + $0x394] ss:$84 sps:$4 sm:$0xff]  }
  0xac   : > { %1561 = vmatprep.subr.bf16.mxu0 %v4232_v16  ;;  %1602 = vmatprep.subr.bf16.mxu1 %v4235_v17  ;;  %v4320_v16 = vld [vmem:[%s4839_s21 + $0x388] ss:$84 sps:$4 sm:$0xff]   ;;  %v4323_v17 = vld [vmem:[%s4839_s21 + $0x390] ss:$84 sps:$4 sm:$0xff]  }
  0xaf   : > { %1562 = vmatpush1.bf16.msra.mxu0 %v4230_v18  ;;  %1603 = vmatpush1.bf16.msra.mxu1 %v4233_v19  ;;  %v4328_v18 = vld [vmem:[%s4839_s21 + $0x2e4] ss:$84 sps:$4 sm:$0xff]   ;;  %v4331_v19 = vld [vmem:[%s4839_s21 + $0x2ec] ss:$84 sps:$4 sm:$0xff]  }
  0xb0   : > { %1563 = vmatprep.subr.bf16.mxu0 %v4238_v20  ;;  %1604 = vmatprep.subr.bf16.mxu1 %v4241_v21  ;;  %v4326_v20 = vld [vmem:[%s4839_s21 + $0x2e0] ss:$84 sps:$4 sm:$0xff]   ;;  %v4329_v21 = vld [vmem:[%s4839_s21 + $0x2e8] ss:$84 sps:$4 sm:$0xff]  }
  0xb3   : > { %1564 = vmatpush1.bf16.msra.mxu0 %v4236_v22  ;;  %1605 = vmatpush1.bf16.msra.mxu1 %v4239_v23  ;;  %v4337_v22 = vld [vmem:[%s4839_s21 + $0x244] ss:$84 sps:$4 sm:$0xff]  }
  0xb4   : > { %1565 = vmatprep.subr.bf16.mxu0 %v4244_v24  ;;  %1606 = vmatprep.subr.bf16.mxu1 %v4247_v25  ;;  %v4332_v23 = vld [vmem:[%s4839_s21 + $0x238] ss:$84 sps:$4 sm:$0xff]   ;;  %v4335_v24 = vld [vmem:[%s4839_s21 + $0x240] ss:$84 sps:$4 sm:$0xff]  }
  0xb5   : > { %v4340_v25 = vld [vmem:[%s4839_s21 + $0x194] ss:$84 sps:$4 sm:$0xff]  }
  0xb7   : > { %1566 = vmatpush1.bf16.msra.mxu0 %v4242_v26  ;;  %1607 = vmatpush1.bf16.msra.mxu1 %v4245_v27  ;;  %v4343_v26 = vld [vmem:[%s4839_s21 + $0x19c] ss:$84 sps:$4 sm:$0xff]  }
  0xb8   : > { %1567 = vmatprep.subr.bf16.mxu0 %v4250_v28  ;;  %1608 = vmatprep.subr.bf16.mxu1 %v4253_v29  ;;  %v4338_v27 = vld [vmem:[%s4839_s21 + $0x190] ss:$84 sps:$4 sm:$0xff]   ;;  %v4341_v28 = vld [vmem:[%s4839_s21 + $0x198] ss:$84 sps:$4 sm:$0xff]  }
  0xb9   : > { %v4346_v29 = vld [vmem:[%s4839_s21 + $0xec] ss:$84 sps:$4 sm:$0xff]  }
  0xbb   : > { %1568 = vmatpush1.bf16.msra.mxu0 %v4248_v30  ;;  %1609 = vmatpush1.bf16.msra.mxu1 %v4251_v31  ;;  %v4349_v30 = vld [vmem:[%s4839_s21 + $0xf4] ss:$84 sps:$4 sm:$0xff]  }
  0xbc   : > { %1569 = vmatprep.subr.bf16.mxu0 %v4256_v32  ;;  %1610 = vmatprep.subr.bf16.mxu1 %v4259_v33  ;;  %v4344_v31 = vld [vmem:[%s4839_s21 + $0xe8] ss:$84 sps:$4 sm:$0xff]   ;;  %v4347_v32 = vld [vmem:[%s4839_s21 + $0xf0] ss:$84 sps:$4 sm:$0xff]  }
  0xbd   : > { %v4352_v33 = vld [vmem:[%s4839_s21 + $0x44] ss:$84 sps:$4 sm:$0xff]  }
  0xbf   : > { %1570 = vmatpush1.bf16.msra.mxu0 %v4254_v34  ;;  %1611 = vmatpush1.bf16.msra.mxu1 %v4257_v35  ;;  %v4355_v34 = vld [vmem:[%s4839_s21 + $0x4c] ss:$84 sps:$4 sm:$0xff]  }
  0xc0   : > { %1637 = vmatprep.subr.bf16.mxu0 %v4262_v37  ;;  %1678 = vmatprep.subr.bf16.mxu1 %v4265_v38  ;;  %v4350_v35 = vld [vmem:[%s4839_s21 + $0x40] ss:$84 sps:$4 sm:$0xff]   ;;  %v4353_v37 = vld [vmem:[%s4839_s21 + $0x48] ss:$84 sps:$4 sm:$0xff]  }
  0xc1   : > { %v4356_v38 = vld [vmem:[%s4839_s21 + $0x4e8] ss:$84 sps:$4 sm:$0xff]  }
  0xc2   : > { %1588 = vmatmul.mubr.bf16.vlgmr.msra.gmra.mxu0 %v4900_v36  ;;  %1629 = vmatmul.mubr.bf16.vlgmr.msra.gmra.mxu1 %v4900_v36 }
  0xc3   : > { %1638 = vmatpush1.bf16.msra.mxu0 %v4260_v39  ;;  %1679 = vmatpush1.bf16.msra.mxu1 %v4263_v40  ;;  %v4659_v39 = vmov 0.0   ;;  %v4357_v40 = vld [vmem:[%s4839_s21 + $0x440] ss:$84 sps:$4 sm:$0xff]  }
  0xc4   : > { %1639 = vmatprep.subr.bf16.mxu0 %v4268_v41  ;;  %1680 = vmatprep.subr.bf16.mxu1 %v4271_v42  ;;  %v4358_v41 = vld [vmem:[%s4839_s21 + $0x398] ss:$84 sps:$4 sm:$0xff]   ;;  %v4359_v42 = vld [vmem:[%s4839_s21 + $0x2f0] ss:$84 sps:$4 sm:$0xff]  }
  0xc5   : > { %1669 = vmatprep.mubr.bf16.mxu0 %v4658_v3  ;;  %1710 = vmatprep.mubr.bf16.mxu1 %v4658_v3 }
  0xc7   : > { %1640 = vmatpush1.bf16.msra.mxu0 %v4266_v43  ;;  %1681 = vmatpush1.bf16.msra.mxu1 %v4269_v44  ;;  %v4360_v43 = vld [vmem:[%s4839_s21 + $0x248] ss:$84 sps:$4 sm:$0xff]   ;;  %v4361_v44 = vld [vmem:[%s4839_s21 + $0x1a0] ss:$84 sps:$4 sm:$0xff]  }
  0xc8   : > { %1641 = vmatprep.subr.bf16.mxu0 %v4274_v45  ;;  %1682 = vmatprep.subr.bf16.mxu1 %v4277_v46  ;;  %v4362_v45 = vld [vmem:[%s4839_s21 + $0xf8] ss:$84 sps:$4 sm:$0xff]   ;;  %v4363_v46 = vld [vmem:[%s4839_s21 + $0x50] ss:$84 sps:$4 sm:$0xff]  }
  0xcb   : > { %1642 = vmatpush1.bf16.msra.mxu0 %v4272_v47  ;;  %1683 = vmatpush1.bf16.msra.mxu1 %v4275_v48  ;;  %v4661_v47 = vmov 1983009808  }
  0xcc   : > { %1643 = vmatprep.subr.bf16.mxu0 %v4280_v49  ;;  %1684 = vmatprep.subr.bf16.mxu1 %v4283_v50  ;;  %v1865_v48 = vunpack.c.l.s4 %v4661_v47  ;;  %v1867_v49 = vlaneseq }
  0xce   : > { %v1866_v50 = vunpack.c.0.s8 %v1865_v48 }
  0xcf   : > { %1644 = vmatpush1.bf16.msra.mxu0 %v4278_v51  ;;  %1685 = vmatpush1.bf16.msra.mxu1 %v4281_v52  ;;  %v5055_v51 = vshrl.u32 %v1867_v49, 7 }
  0xd0   : > { %1645 = vmatprep.subr.bf16.mxu0 %v4286_v53  ;;  %1686 = vmatprep.subr.bf16.mxu1 %v4289_v54 }
  0xd1   : > { %v5058_v54 = vsub.s32 %v1866_v50, %v5055_v51 }
  0xd3   : > { %1646 = vmatpush1.bf16.msra.mxu0 %v4284_v55  ;;  %1687 = vmatpush1.bf16.msra.mxu1 %v4287_v56 }
  0xd4   : > { %1647 = vmatprep.subr.bf16.mxu0 %v4292_v57  ;;  %1688 = vmatprep.subr.bf16.mxu1 %v4295_v58 }
  0xd7   : > { %1648 = vmatpush1.bf16.msra.mxu0 %v4290_v59  ;;  %1689 = vmatpush1.bf16.msra.mxu1 %v4293_v60 }
  0xd8   : > { %1649 = vmatprep.subr.bf16.mxu0 %v4298_v61  ;;  %1690 = vmatprep.subr.bf16.mxu1 %v4301_v62  ;;  %v360_v62 = vld [vmem:[#allocation2] sm:$0xff] }
  0xdb   : > { %1650 = vmatpush1.bf16.msra.mxu0 %v4296_v63  ;;  %1691 = vmatpush1.bf16.msra.mxu1 %v4299_v0 }
  0xdc   : > { %1651 = vmatprep.subr.bf16.mxu0 %v4304_v1  ;;  %1692 = vmatprep.subr.bf16.mxu1 %v4307_v2 }
  0xdf   : > { %1652 = vmatpush1.bf16.msra.mxu0 %v4302_v4  ;;  %1693 = vmatpush1.bf16.msra.mxu1 %v4305_v5 }
  0xe0   : > { %1719 = vmatprep.subr.bf16.mxu0 %v4310_v6  ;;  %1760 = vmatprep.subr.bf16.mxu1 %v4313_v7 }
  0xe2   : > { %1670 = vmatmul.mubr.bf16.vlgmr.msra.gmra.mxu0 %v4900_v36  ;;  %1711 = vmatmul.mubr.bf16.vlgmr.msra.gmra.mxu1 %v4900_v36 }
  0xe3   : > { %1720 = vmatpush1.bf16.msra.mxu0 %v4308_v8  ;;  %1761 = vmatpush1.bf16.msra.mxu1 %v4311_v9 }
  0xe4   : > { %1721 = vmatprep.subr.bf16.mxu0 %v4316_v10  ;;  %1762 = vmatprep.subr.bf16.mxu1 %v4319_v11 }
  0xe5   : > { %1751 = vmatprep.mubr.bf16.mxu0 %v4658_v3  ;;  %1792 = vmatprep.mubr.bf16.mxu1 %v4658_v3  ;;  %v4334_v3 = vld [vmem:[%s4839_s21 + $0x23c] ss:$84 sps:$4 sm:$0xff]  }
  0xe7   : > { %1722 = vmatpush1.bf16.msra.mxu0 %v4314_v12  ;;  %1763 = vmatpush1.bf16.msra.mxu1 %v4317_v13 }
  0xe8   : > { %1723 = vmatprep.subr.bf16.mxu0 %v4322_v14  ;;  %1764 = vmatprep.subr.bf16.mxu1 %v4325_v15  ;;  %v361_v14 = vld [vmem:[#allocation2 + $0x8] sm:$0xff] }
  0xeb   : > { %1724 = vmatpush1.bf16.msra.mxu0 %v4320_v16  ;;  %1765 = vmatpush1.bf16.msra.mxu1 %v4323_v17 }
  0xec   : > { %1725 = vmatprep.subr.bf16.mxu0 %v4328_v18  ;;  %1766 = vmatprep.subr.bf16.mxu1 %v4331_v19 }
  0xef   : > { %1726 = vmatpush1.bf16.msra.mxu0 %v4326_v20  ;;  %1767 = vmatpush1.bf16.msra.mxu1 %v4329_v21 }
  0xf0   : > { %1727 = vmatprep.subr.bf16.mxu0 %v4334_v3  ;;  %1768 = vmatprep.subr.bf16.mxu1 %v4337_v22 }
  0xf3   : > { %1728 = vmatpush1.bf16.msra.mxu0 %v4332_v23  ;;  %1769 = vmatpush1.bf16.msra.mxu1 %v4335_v24 }
  0xf4   : > { %1729 = vmatprep.subr.bf16.mxu0 %v4340_v25  ;;  %1770 = vmatprep.subr.bf16.mxu1 %v4343_v26 }
  0xf7   : > { %1730 = vmatpush1.bf16.msra.mxu0 %v4338_v27  ;;  %1771 = vmatpush1.bf16.msra.mxu1 %v4341_v28  ;;  %v362_v28 = vld [vmem:[#allocation2 + $0x10] sm:$0xff] }
  0xf8   : > { %1731 = vmatprep.subr.bf16.mxu0 %v4346_v29  ;;  %1772 = vmatprep.subr.bf16.mxu1 %v4349_v30 }
  0xfb   : > { %1732 = vmatpush1.bf16.msra.mxu0 %v4344_v31  ;;  %1773 = vmatpush1.bf16.msra.mxu1 %v4347_v32 }
  0xfc   : > { %1733 = vmatprep.subr.bf16.mxu0 %v4352_v33  ;;  %1774 = vmatprep.subr.bf16.mxu1 %v4355_v34 }
  0xff   : > { %1734 = vmatpush1.bf16.msra.mxu0 %v4350_v35  ;;  %1775 = vmatpush1.bf16.msra.mxu1 %v4353_v37 }
 0x100   : > { %3966 = vmatprep.subr.bf16.mxu0 %v4659_v39 }
 0x102   : > { %1752 = vmatmul.mubr.bf16.vlgmr.msra.gmra.mxu0 %v4900_v36  ;;  %1793 = vmatmul.mubr.bf16.vlgmr.msra.gmra.mxu1 %v4900_v36 }
 0x103   : > { %3967 = vmatpush3.bf16.msra.mxu0 %v4356_v38  ;;  %3982 = vmatprep.mubr.msk.bf16.mxu0 %vm4660_vm0, %v4659_v39 }
 0x104   : > { %3968 = vmatprep.subr.bf16.mxu0 %v4659_v39 }
 0x107   : > { %3969 = vmatpush3.bf16.msra.mxu0 %v4357_v40 }
 0x108   : > { %3970 = vmatprep.subr.bf16.mxu0 %v4659_v39 }
 0x10b   : > { %3971 = vmatpush3.bf16.msra.mxu0 %v4358_v41 }
 0x10c   : > { %3972 = vmatprep.subr.bf16.mxu0 %v4659_v39 }
 0x10f   : > { %3973 = vmatpush3.bf16.msra.mxu0 %v4359_v42 }
 0x110   : > { %3974 = vmatprep.subr.bf16.mxu0 %v4659_v39 }
 0x113   : > { %3975 = vmatpush3.bf16.msra.mxu0 %v4360_v43 }
 0x114   : > { %3976 = vmatprep.subr.bf16.mxu0 %v4659_v39 }
 0x117   : > { %3977 = vmatpush3.bf16.msra.mxu0 %v4361_v44  ;;  %v363_v44 = vld [vmem:[#allocation2 + $0x18] sm:$0xff] }
 0x118   : > { %3978 = vmatprep.subr.bf16.mxu0 %v4659_v39 }
 0x11b   : > { %3979 = vmatpush3.bf16.msra.mxu0 %v4362_v45 }
 0x11c   : > { %3980 = vmatprep.subr.bf16.mxu0 %v4659_v39 }
 0x11f   : > { %3981 = vmatpush3.bf16.msra.mxu0 %v4363_v46 }
 0x122   : > { %3983 = vmatmul.mubr.bf16.vlgmr.msra.gmra.mxu0 %v4900_v36 }
 0x142   : > { %v1425_v52 = vpop.f32.mrf.mxu0  ;;  %v1466_v53 = vpop.f32.mrf.mxu1 }
 0x144   : > { %v1427_v55 = vpop.f32.mrf.mxu0  ;;  %v1468_v56 = vpop.f32.mrf.mxu1 }
 0x145   : > { %v1862_v57 = vcombine.low %v1425_v52, %v1427_v55  ;;  %v1863_v58 = vcombine.low %v1466_v53, %v1468_v56 }
 0x146   : > { %v1429_v59 = vpop.f32.mrf.mxu0  ;;  %v1470_v60 = vpop.f32.mrf.mxu1 }
 0x147   : > { %v1870_v61 = vrot.slane %v1862_v57, %v5058_v54  ;;  %v1877_v36 = vrot.slane %v1863_v58, %v5058_v54 }
 0x148   : > { %v1430_v63 = vpop.f32.mrf.mxu0  ;;  %v1471_v0 = vpop.f32.mrf.mxu1 }
 0x149   : > { %v1878_v1 = vcombine.low %v1870_v61, %v1877_v36  ;;  %v364_v61 = vld [vmem:[#allocation2 + $0x20] sm:$0xff] }
 0x14b   : > { %v1960_v2 = vadd.f32 %v1878_v1, %v360_v62  ;;  %v365_v1 = vld [vmem:[#allocation2 + $0x28] sm:$0x3] }
 0x14d   : > { %1966 = vst [vmem:[#allocation2] sm:$0xff] %v1960_v2 }
 0x162   : > { %v1507_v4 = vpop.f32.mrf.mxu0  ;;  %v1548_v5 = vpop.f32.mrf.mxu1 }
 0x164   : > { %v1509_v6 = vpop.f32.mrf.mxu0  ;;  %v1550_v7 = vpop.f32.mrf.mxu1 }
 0x165   : > { %v1879_v8 = vcombine.low %v1507_v4, %v1509_v6  ;;  %v1880_v9 = vcombine.low %v1548_v5, %v1550_v7 }
 0x166   : > { %v1511_v10 = vpop.f32.mrf.mxu0  ;;  %v1552_v11 = vpop.f32.mrf.mxu1 }
 0x167   : > { %v1887_v12 = vrot.slane %v1879_v8, %v5058_v54  ;;  %v1894_v13 = vrot.slane %v1880_v9, %v5058_v54 }
 0x168   : > { %v1512_v15 = vpop.f32.mrf.mxu0  ;;  %v1553_v16 = vpop.f32.mrf.mxu1 }
 0x169   : > { %v1895_v17 = vcombine.low %v1887_v12, %v1894_v13 }
 0x16b   : > { %v1961_v18 = vadd.f32 %v1895_v17, %v361_v14 }
 0x16d   : > { %1967 = vst [vmem:[#allocation2 + $0x8] sm:$0xff] %v1961_v18 }
 0x182   : > { %v1589_v19 = vpop.f32.mrf.mxu0  ;;  %v1630_v20 = vpop.f32.mrf.mxu1 }
 0x184   : > { %v1591_v21 = vpop.f32.mrf.mxu0  ;;  %v1632_v3 = vpop.f32.mrf.mxu1 }
 0x185   : > { %v1896_v22 = vcombine.low %v1589_v19, %v1591_v21  ;;  %v1897_v23 = vcombine.low %v1630_v20, %v1632_v3 }
 0x186   : > { %v1593_v24 = vpop.f32.mrf.mxu0  ;;  %v1634_v25 = vpop.f32.mrf.mxu1 }
 0x187   : > { %v1904_v26 = vrot.slane %v1896_v22, %v5058_v54  ;;  %v1911_v27 = vrot.slane %v1897_v23, %v5058_v54 }
 0x188   : > { %v1594_v29 = vpop.f32.mrf.mxu0  ;;  %v1635_v30 = vpop.f32.mrf.mxu1 }
 0x189   : > { %v1912_v31 = vcombine.low %v1904_v26, %v1911_v27 }
 0x18b   : > { %v1962_v32 = vadd.f32 %v1912_v31, %v362_v28 }
 0x18d   : > { %1968 = vst [vmem:[#allocation2 + $0x10] sm:$0xff] %v1962_v32 }
 0x1a2   : > { %v1671_v33 = vpop.f32.mrf.mxu0  ;;  %v1712_v34 = vpop.f32.mrf.mxu1 }
 0x1a4   : > { %v1673_v35 = vpop.f32.mrf.mxu0  ;;  %v1714_v37 = vpop.f32.mrf.mxu1 }
 0x1a5   : > { %v1913_v38 = vcombine.low %v1671_v33, %v1673_v35  ;;  %v1914_v39 = vcombine.low %v1712_v34, %v1714_v37 }
 0x1a6   : > { %v1675_v40 = vpop.f32.mrf.mxu0  ;;  %v1716_v41 = vpop.f32.mrf.mxu1 }
 0x1a7   : > { %v1921_v42 = vrot.slane %v1913_v38, %v5058_v54  ;;  %v1928_v43 = vrot.slane %v1914_v39, %v5058_v54 }
 0x1a8   : > { %v1676_v45 = vpop.f32.mrf.mxu0  ;;  %v1717_v46 = vpop.f32.mrf.mxu1 }
 0x1a9   : > { %v1929_v47 = vcombine.low %v1921_v42, %v1928_v43 }
 0x1ab   : > { %v1963_v48 = vadd.f32 %v1929_v47, %v363_v44 }
 0x1ad   : > { %1969 = vst [vmem:[#allocation2 + $0x18] sm:$0xff] %v1963_v48 }
 0x1c2   : > { %v1753_v49 = vpop.f32.mrf.mxu0  ;;  %v1794_v50 = vpop.f32.mrf.mxu1 }
 0x1c4   : > { %v1755_v52 = vpop.f32.mrf.mxu0  ;;  %v1796_v53 = vpop.f32.mrf.mxu1 }
 0x1c5   : > { %v1930_v55 = vcombine.low %v1753_v49, %v1755_v52  ;;  %v1931_v56 = vcombine.low %v1794_v50, %v1796_v53 }
 0x1c6   : > { %v1757_v57 = vpop.f32.mrf.mxu0  ;;  %v1798_v58 = vpop.f32.mrf.mxu1 }
 0x1c7   : > { %v1938_v59 = vrot.slane %v1930_v55, %v5058_v54  ;;  %v1945_v60 = vrot.slane %v1931_v56, %v5058_v54 }
 0x1c8   : > { %v1758_v36 = vpop.f32.mrf.mxu0  ;;  %v1799_v62 = vpop.f32.mrf.mxu1 }
 0x1c9   : > { %v1946_v63 = vcombine.low %v1938_v59, %v1945_v60 }
 0x1cb   : > { %v1964_v0 = vadd.f32 %v1946_v63, %v364_v61 }
 0x1cd   : > { %1970 = vst [vmem:[#allocation2 + $0x20] sm:$0xff] %v1964_v0 }
 0x1e2   : > { %v1835_v2 = vpop.f32.mrf.mxu0 }
 0x1e3   : > { %v1953_v4 = vrot.slane %v1835_v2, %v5058_v54 }
 0x1e4   : > { %v3984_v5 = vpop.f32.mrf.mxu0  ;;  %1975 = sbr.rel (%p3807_p7) target bundleno = 947 (0x3b3), region = 60 }
 0x1e5   : > { %v1965_v6 = vadd.f32 %v1953_v4, %v365_v1 }
 0x1e6   : > { %v1838_v7 = vpop.f32.mrf.mxu0 }
 0x1e7   : > { %1971 = vst [vmem:[#allocation2 + $0x28] sm:$0x3] %v1965_v6 }
 0x1e8   : > { %v3985_v8 = vpop.f32.mrf.mxu0 }
 0x1e9   : > { %v4366_v9 = vld [vmem:[#allocation8 + $0x78] sm:$0xff]   ;;  %v4370_v13 = vld [vmem:[#allocation8 + $0x70] sm:$0xff]   ;;  %v4374_v17 = vld [vmem:[#allocation8 + $0x68] sm:$0xff]   ;;  %v5073_v32 = vsub.s32 0, %v5055_v51  ;;  %v5076_v34 = vsub.s32 1, %v5055_v51  ;;  %v5079_v37 = vsub.s32 2, %v5055_v51 }
 0x1ea   : > { %v4367_v10 = vld [vmem:[#allocation8 + $0xf8] sm:$0xff]   ;;  %3891 = vmatprep.subr.bf16.mxu0 %v4366_v9  ;;  %v4371_v14 = vld [vmem:[#allocation8 + $0xf0] sm:$0xff]   ;;  %v4375_v18 = vld [vmem:[#allocation8 + $0xe8] sm:$0xff]   ;;  %v5082_v39 = vsub.s32 3, %v5055_v51  ;;  %v5085_v41 = vsub.s32 4, %v5055_v51  ;;  %v2010_v43 = vsub.s32 5, %v5055_v51 }
 0x1eb   : > { %v4368_v11 = vld [vmem:[#allocation8 + $0x38] sm:$0xff]   ;;  %3913 = vmatprep.subr.bf16.mxu1 %v4367_v10  ;;  %v4372_v15 = vld [vmem:[#allocation8 + $0x30] sm:$0xff]   ;;  %v4376_v19 = vld [vmem:[#allocation8 + $0x28] sm:$0xff]   ;;  %v2014_v45 = vsub.s32 6, %v5055_v51  ;;  %v2018_v47 = vsub.s32 7, %v5055_v51  ;;  %v4662_v57 = vmov 0.0  }
 0x1ec   : > { %v4369_v12 = vld [vmem:[#allocation8 + $0xb8] sm:$0xff]   ;;  %3892 = vmatpush3.bf16.msra.mxu0 %v4368_v11  ;;  %v4373_v16 = vld [vmem:[#allocation8 + $0xb0] sm:$0xff]   ;;  %v4377_v20 = vld [vmem:[#allocation8 + $0xa8] sm:$0xff]   ;;  %vm2295_vm1 = vcmask 1041408   ;;  %vm2303_vm2 = vcmask 1043456   ;;  %vm4663_vm3 = vmmov 0  }
 0x1ed   : > { %3914 = vmatpush3.bf16.msra.mxu1 %v4369_v12  ;;  %3893 = vmatprep.subr.bf16.mxu0 %v4370_v13  ;;  %v4378_v21 = vld [vmem:[#allocation8 + $0x60] sm:$0xff]   ;;  %v4382_v24 = vld [vmem:[#allocation8 + $0x58] sm:$0xff]   ;;  %v4386_v28 = vld [vmem:[#allocation8 + $0x50] sm:$0xff]  }
 0x1ee   : > { %3915 = vmatprep.subr.bf16.mxu1 %v4371_v14  ;;  %v4379_v3 = vld [vmem:[#allocation8 + $0xe0] sm:$0xff]   ;;  %v4383_v25 = vld [vmem:[#allocation8 + $0xd8] sm:$0xff]   ;;  %v4387_v29 = vld [vmem:[#allocation8 + $0xd0] sm:$0xff]  }
 0x1ef   : > { %v4380_v22 = vld [vmem:[#allocation8 + $0x20] sm:$0xff]   ;;  %v4384_v26 = vld [vmem:[#allocation8 + $0x18] sm:$0xff]   ;;  %v4388_v30 = vld [vmem:[#allocation8 + $0x10] sm:$0xff]  }
 0x1f0   : > { %3894 = vmatpush3.bf16.msra.mxu0 %v4372_v15  ;;  %v4381_v23 = vld [vmem:[#allocation8 + $0xa0] sm:$0xff]   ;;  %v4385_v27 = vld [vmem:[#allocation8 + $0x98] sm:$0xff]   ;;  %v4389_v31 = vld [vmem:[#allocation8 + $0x90] sm:$0xff]  }
 0x1f1   : > { %3916 = vmatpush3.bf16.msra.mxu1 %v4373_v16  ;;  %3895 = vmatprep.subr.bf16.mxu0 %v4374_v17  ;;  %v4390_v33 = vld [vmem:[#allocation8 + $0x48] sm:$0xff]   ;;  %v4394_v42 = vld [vmem:[#allocation8 + $0x40] sm:$0xff]   ;;  %v1983_v50 = vld [vmem:[#allocation6 + $0x8] sm:$0xff] }
 0x1f2   : > { %3917 = vmatprep.subr.bf16.mxu1 %v4375_v18  ;;  %v4391_v35 = vld [vmem:[#allocation8 + $0xc8] sm:$0xff]   ;;  %v4395_v44 = vld [vmem:[#allocation8 + $0xc0] sm:$0xff]   ;;  %v4398_v36 = vld [vmem:[#allocation8 + $0x178] sm:$0xff]   ;;  %v2023_v62 = vrot.slane %v1983_v50, %v5073_v32  ;;  %v2027_v63 = vrot.slane %v1983_v50, %v5076_v34  ;;  %v2031_v0 = vrot.slane %v1983_v50, %v5079_v37  ;;  %v2035_v1 = vrot.slane %v1983_v50, %v5082_v39 }
 0x1f3   : > { %v4392_v38 = vld [vmem:[#allocation8 + $0x8] sm:$0xff]   ;;  %v4396_v46 = vld [vmem:[#allocation8] sm:$0xff]   ;;  %v2039_v2 = vrot.slane %v1983_v50, %v5085_v41  ;;  %v2043_v4 = vrot.slane %v1983_v50, %v2010_v43  ;;  %v2047_v5 = vrot.slane %v1983_v50, %v2014_v45  ;;  %v2051_v6 = vrot.slane %v1983_v50, %v2018_v47  ;;  %v5101_v16 = vld [vmem:[#allocation6 + $0x10] sm:$0x1f] }
 0x1f4   : > { %3896 = vmatpush3.bf16.msra.mxu0 %v4376_v19  ;;  %v4393_v40 = vld [vmem:[#allocation8 + $0x88] sm:$0xff]   ;;  %v4397_v48 = vld [vmem:[#allocation8 + $0x80] sm:$0xff]   ;;  %v2106_v12 = vcombine.low %v2023_v62, %v2027_v63  ;;  %v2107_v13 = vcombine.low %v2031_v0, %v2035_v1 }
 0x1f5   : > { %3918 = vmatpush3.bf16.msra.mxu1 %v4377_v20  ;;  %3897 = vmatprep.subr.bf16.mxu0 %v4378_v21  ;;  %v1982_v49 = vld [vmem:[#allocation6] sm:$0xff]  ;;  %v1976_v11 = vld [vmem:[#allocation2] sm:$0xff]  ;;  %v2123_v14 = vcombine.low %v2039_v2, %v2043_v4  ;;  %v2124_v15 = vcombine.low %v2047_v5, %v2051_v6  ;;  %v2071_v5 = vrot.slane %v5101_v16, %v5085_v41 }
 0x1f6   : > { %3919 = vmatprep.subr.bf16.mxu1 %v4379_v3  ;;  %v1991_v52 = vrot.slane %v1982_v49, %v5073_v32  ;;  %v1995_v53 = vrot.slane %v1982_v49, %v5076_v34  ;;  %v1999_v55 = vrot.slane %v1982_v49, %v5079_v37  ;;  %v2003_v56 = vrot.slane %v1982_v49, %v5082_v39  ;;  %v1977_v17 = vld [vmem:[#allocation2 + $0x8] sm:$0xff]  ;;  %v1978_v3 = vld [vmem:[#allocation2 + $0x10] sm:$0xff] }
 0x1f7   : > { %v2007_v58 = vrot.slane %v1982_v49, %v5085_v41  ;;  %v2011_v59 = vrot.slane %v1982_v49, %v2010_v43  ;;  %v2015_v60 = vrot.slane %v1982_v49, %v2014_v45  ;;  %v2019_v61 = vrot.slane %v1982_v49, %v2018_v47 }
 0x1f8   : > { %3898 = vmatpush3.bf16.msra.mxu0 %v4380_v22  ;;  %v2072_v7 = vcombine.low %v1991_v52, %v1995_v53  ;;  %v2073_v8 = vcombine.low %v1999_v55, %v2003_v56  ;;  %v2114_v22 = vrot.slane %v2106_v12, %v5058_v54  ;;  %v1980_v53 = vld [vmem:[#allocation2 + $0x20] sm:$0xff] }
 0x1f9   : > { %3920 = vmatpush3.bf16.msra.mxu1 %v4381_v23  ;;  %3899 = vmatprep.subr.bf16.mxu0 %v4382_v24  ;;  %v2089_v9 = vcombine.low %v2007_v58, %v2011_v59  ;;  %v2090_v10 = vcombine.low %v2015_v60, %v2019_v61  ;;  %v2121_v23 = vrot.slane %v2107_v13, %v5058_v54 }
 0x1fa   : > { %3921 = vmatprep.subr.bf16.mxu1 %v4383_v25  ;;  %v2080_v18 = vrot.slane %v2072_v7, %v5058_v54  ;;  %v2087_v19 = vrot.slane %v2073_v8, %v5058_v54  ;;  %v2131_v24 = vrot.slane %v2123_v14, %v5058_v54  ;;  %v2138_v25 = vrot.slane %v2124_v15, %v5058_v54 }
 0x1fb   : > { %v2097_v20 = vrot.slane %v2089_v9, %v5058_v54  ;;  %v2104_v21 = vrot.slane %v2090_v10, %v5058_v54 }
 0x1fc   : > { %3900 = vmatpush3.bf16.msra.mxu0 %v4384_v26  ;;  %v1979_v26 = vld [vmem:[#allocation2 + $0x18] sm:$0xff] }
 0x1fd   : > { %3922 = vmatpush3.bf16.msra.mxu1 %v4385_v27  ;;  %3901 = vmatprep.subr.bf16.mxu0 %v4386_v28  ;;  %v2088_v27 = vcombine.low %v2080_v18, %v2087_v19  ;;  %v2105_v28 = vcombine.low %v2097_v20, %v2104_v21  ;;  %v2163_v19 = vrot.slane %v2071_v5, %v5058_v54 }
 0x1fe   : > { %3923 = vmatprep.subr.bf16.mxu1 %v4387_v29  ;;  %v2055_v29 = vrot.slane %v5101_v16, %v5073_v32 }
 0x200   : > { %3902 = vmatpush3.bf16.msra.mxu0 %v4388_v30  ;;  %v2059_v30 = vrot.slane %v5101_v16, %v5076_v34 }
 0x201   : > { %3924 = vmatpush3.bf16.msra.mxu1 %v4389_v31  ;;  %3903 = vmatprep.subr.bf16.mxu0 %v4390_v33  ;;  %v2122_v31 = vcombine.low %v2114_v22, %v2121_v23  ;;  %v2139_v33 = vcombine.low %v2131_v24, %v2138_v25  ;;  %v4399_v23 = vld [vmem:[#allocation8 + $0x138] sm:$0xff]  }
 0x202   : > { %3925 = vmatprep.subr.bf16.mxu1 %v4391_v35  ;;  %v2063_v35 = vrot.slane %v5101_v16, %v5079_v37  ;;  %v2140_v43 = vcombine.low %v2055_v29, %v2059_v30  ;;  %v4400_v29 = vld [vmem:[#allocation8 + $0x1b8] sm:$0xff]   ;;  %v1981_v30 = vld [vmem:[#allocation2 + $0x28] sm:$0x3] }
 0x203   : > { %v2173_v45 = vadd.f32 %v2139_v33, %v1979_v26  ;;  %v4401_v26 = vld [vmem:[#allocation8 + $0x170] sm:$0xff]  }
 0x204   : > { %3904 = vmatpush3.bf16.msra.mxu0 %v4392_v38  ;;  %v2067_v38 = vrot.slane %v5101_v16, %v5082_v39  ;;  %v2148_v37 = vrot.slane %v2140_v43, %v5058_v54  ;;  %v2175_v43 = vadd.f32 %v2163_v19, %v1981_v30  ;;  %v2979_v19 = vld [vmem:[%s5541_s4] sm:$0x3] }
 0x205   : > { %3926 = vmatpush3.bf16.msra.mxu1 %v4393_v40  ;;  %3905 = vmatprep.subr.bf16.mxu0 %v4394_v42  ;;  %v5119_v40 = vadd.f32 %v2088_v27, %v1976_v11  ;;  %v5121_v42 = vadd.f32 %v2105_v28, %v1977_v17  ;;  %v2943_v50 = vrot.slane %v2173_v45, 6  ;;  %v2237_v4 = vcombine.low %v2173_v45, %v2173_v45 }
 0x206   : > { %3927 = vmatprep.subr.bf16.mxu1 %v4395_v44  ;;  %v2172_v44 = vadd.f32 %v2122_v31, %v1978_v3  ;;  %v2141_v32 = vcombine.low %v2063_v35, %v2067_v38  ;;  %v2958_v8 = vrot.slane %v2173_v45, 4  ;;  %v4402_v35 = vld [vmem:[#allocation8 + $0x130] sm:$0xff]  }
 0x207   : > { %v2185_v34 = vrot.slane %v5119_v40, %v5058_v54  ;;  %2976 = vst [vmem:[#allocation9] sm:$0xff] %v5119_v40  ;;  %2977 = vst [vmem:[#allocation9 + $0x8] sm:$0x3f] %v5121_v42  ;;  %v2178_v39 = vcombine.high %v5119_v40, %v5119_v40  ;;  %v5148_v0 = vrot.slane %v5121_v42, %v5058_v54 }
 0x208   : > { %3906 = vmatpush3.bf16.msra.mxu0 %v4396_v46  ;;  %v2941_v46 = vrot.slane %v5121_v42, 6  ;;  %v2220_v47 = vcombine.low %v2172_v44, %v2172_v44  ;;  %v2942_v49 = vrot.slane %v2172_v44, 6  ;;  %v2155_v55 = vrot.slane %v2141_v32, %v5058_v54 }
 0x209   : > { %3928 = vmatpush3.bf16.msra.mxu1 %v4397_v48  ;;  %3935 = vmatprep.subr.bf16.mxu0 %v4398_v36  ;;  %v2254_v48 = vcombine.high %v2173_v45, %v2173_v45  ;;  %v2193_v52 = vcombine.high %v2185_v34, %v2185_v34  ;;  %v2192_v56 = vrot.slane %v2178_v39, %v5058_v54  ;;  %v4403_v45 = vld [vmem:[#allocation8 + $0x1b0] sm:$0xff]   ;;  %v2960_v32 = vrot.slane %v2175_v43, 4  ;;  %v4406_v39 = vld [vmem:[#allocation8 + $0x1a8] sm:$0xff]  }
 0x20a   : > { %3986 = vmatprep.subr.bf16.mxu1 %v4662_v57  ;;  %v2227_v58 = vrot.slane %v2220_v47, %v5058_v54  ;;  %v5136_v60 = vsel %vm2295_vm1, %v2941_v46, %v2942_v49  ;;  %v5139_v61 = vsel %vm2295_vm1, %v2942_v49, %v2943_v50  ;;  %v2156_v36 = vcombine.low %v2148_v37, %v2155_v55  ;;  %v4407_v37 = vld [vmem:[#allocation8 + $0x160] sm:$0xff]   ;;  %v4411_v50 = vld [vmem:[#allocation8 + $0x118] sm:$0xff]  }
 0x20b   : > { %v2261_v59 = vrot.slane %v2254_v48, %v5058_v54  ;;  %3224 = vst [vmem:[#allocation9 + $0xe] sm:$0xff] %v5136_v60  ;;  %3225 = vst [vmem:[#allocation9 + $0x16] sm:$0x3f] %v5139_v61  ;;  %v2194_v62 = vcombine.high %v2192_v56, %v2192_v56  ;;  %v5144_v63 = vrot.slane %v2172_v44, %v5058_v54  ;;  %v4404_v44 = vld [vmem:[#allocation8 + $0x168] sm:$0xff]   ;;  %v4408_v47 = vld [vmem:[#allocation8 + $0x120] sm:$0xff]  }
 0x20c   : > { %v2235_v1 = vcombine.high %v2227_v58, %v2227_v58  ;;  %v2297_v2 = vsel %vm2295_vm1, %v2193_v52, %v2227_v58  ;;  %v2174_v9 = vadd.f32 %v2156_v36, %v1980_v53  ;;  %v2210_v12 = vcombine.high %v5148_v0, %v5148_v0  ;;  %v4410_v48 = vld [vmem:[#allocation8 + $0x158] sm:$0xff]   ;;  %v4409_v49 = vld [vmem:[#allocation8 + $0x1a0] sm:$0xff]   ;;  %v4413_v52 = vld [vmem:[#allocation8 + $0x150] sm:$0xff]  }
 0x20d   : > { %v2262_v6 = vcombine.low %v2261_v59, %v2261_v59  ;;  %v2305_v7 = vsel %vm2303_vm2, %v2297_v2, %v2261_v59  ;;  %v2299_v11 = vsel %vm2295_vm1, %v2194_v62, %v5144_v63  ;;  %v5159_v13 = vrot.slane %v2237_v4, %v5058_v54  ;;  %v4412_v53 = vld [vmem:[#allocation8 + $0x198] sm:$0xff]   ;;  %v4416_v59 = vld [vmem:[#allocation8 + $0x148] sm:$0xff]   ;;  %v4415_v36 = vld [vmem:[#allocation8 + $0x190] sm:$0xff]  }
 0x20e   : > { %v2312_v10 = vpack.c.bf16 %v2305_v7, %v2305_v7  ;;  %v2270_v14 = vrot.slane %v2174_v9, %v5058_v54  ;;  %v2959_v15 = vrot.slane %v2174_v9, 4  ;;  %v2263_v17 = vcombine.high %v2174_v9, %v2174_v9  ;;  %v4417_v4 = vld [vmem:[#allocation8 + $0x108] sm:$0xff]  }
 0x20f   : > { %v2296_v41 = vsel %vm2295_vm1, %v2185_v34, %v2210_v12  ;;  %v2298_v16 = vsel %vm2295_vm1, %v2192_v56, %v2235_v1  ;;  %v2301_v18 = vsel %vm2295_vm1, %v2210_v12, %v5159_v13  ;;  %v4405_v34 = vld [vmem:[#allocation8 + $0x128] sm:$0xff]   ;;  %v2195_v55 = vcombine.high %v5121_v42, %v5121_v42  ;;  %v4414_v56 = vld [vmem:[#allocation8 + $0x110] sm:$0xff]   ;;  %v4421_v12 = vld [vmem:[#allocation8 + $0x180] sm:$0xff]  }
 0x210   : > { %2798 = vmatprep.mubr.bf16.mxu0 %v2312_v10  ;;  %v2278_v20 = vcombine.low %v2270_v14, %v2270_v14  ;;  %v2307_v21 = vsel %vm2303_vm2, %v2299_v11, %v2270_v14  ;;  %v5169_v3 = vsel %vm2303_vm2, %v2958_v8, %v2959_v15  ;;  %v2304_v22 = vsel %vm2303_vm2, %v2296_v41, %v2262_v6  ;;  %v4418_v7 = vld [vmem:[#allocation8 + $0x188] sm:$0xff]   ;;  %v4420_v10 = vld [vmem:[#allocation8 + $0x100] sm:$0xff]  }
 0x211   : > { %v2314_v24 = vpack.c.bf16 %v2307_v21, %v2307_v21  ;;  %3347 = vst [vmem:[#allocation9 + $0x1c] sm:$0xff] %v5169_v3  ;;  %v2311_v25 = vpack.c.bf16 %v2304_v22, %v2304_v22  ;;  %v5174_v27 = vrot.slane %v2263_v17, %v5058_v54  ;;  %v5182_v46 = vsel %vm2303_vm2, %v2959_v15, %v2960_v32  ;;  %v3864_v15 = vld [vmem:[%s5541_s4 + $0x2] sm:$0x3]  ;;  %v3866_v41 = vld [vmem:[%s5541_s4 + $0x6] sm:$0x3] }
 0x212   : > { %v2306_v28 = vsel %vm2303_vm2, %v2298_v16, %v2278_v20  ;;  %3348 = vst [vmem:[#allocation9 + $0x24] sm:$0x3f] %v5182_v46  ;;  %v2236_v58 = vcombine.high %v5144_v63, %v5144_v63  ;;  %v2286_v62 = vrot.slane %v2175_v43, %v5058_v54  ;;  %v2245_v1 = vcombine.high %v5159_v13, %v5159_v13  ;;  %v4419_v63 = vld [vmem:[#allocation8 + $0x140] sm:$0xff]  }
 0x213   : > { %2838 = vmatprep.mubr.bf16.mxu1 %v2314_v24  ;;  %2799 = vmatmul.mubr.bf16.vlgmr.msra.gmra.mxu0 %v2311_v25  ;;  %v2313_v31 = vpack.c.bf16 %v2306_v28, %v2306_v28  ;;  %v2309_v33 = vsel %vm2303_vm2, %v2301_v18, %v5174_v27  ;;  %v2209_v2 = vrot.slane %v2195_v55, %v5058_v54  ;;  %v4664_v17 = vmov 0   ;;  %v3865_v16 = vld [vmem:[%s5541_s4 + $0x4] sm:$0x3]  ;;  %v3871_v18 = vld [vmem:[%s5541_s4 + $0x10] sm:$0x3] }
 0x214   : > { %3936 = vmatpush3.bf16.msra.mxu0 %v4399_v23  ;;  %v2316_v38 = vpack.c.bf16 %v2309_v33, %v2309_v33  ;;  %v2279_v5 = vcombine.low %v5174_v27, %v5174_v27  ;;  %v2300_v6 = vsel %vm2295_vm1, %v5148_v0, %v2236_v58  ;;  %v2287_v8 = vcombine.low %v2286_v62, %v2286_v62 }
 0x215   : > { %2839 = vmatmul.mubr.bf16.vlgmr.msra.gmra.mxu1 %v2313_v31  ;;  %3937 = vmatprep.subr.bf16.mxu0 %v4401_v26  ;;  %v2302_v9 = vsel %vm2295_vm1, %v2209_v2, %v2245_v1 }
 0x216   : > { %3987 = vmatpush3.bf16.msra.mxu1 %v4400_v29  ;;  %2878 = vmatprep.mubr.bf16.mxu0 %v2316_v38  ;;  %v2308_v11 = vsel %vm2303_vm2, %v2300_v6, %v2279_v5  ;;  %v2310_v13 = vsel %vm2303_vm2, %v2302_v9, %v2287_v8 }
 0x217   : > { %3988 = vmatprep.subr.bf16.mxu1 %v4662_v57  ;;  %4002 = vmatprep.mubr.msk.bf16.mxu1 %vm4663_vm3, %v4662_v57  ;;  %v2315_v14 = vpack.c.bf16 %v2308_v11, %v2308_v11  ;;  %v2317_v0 = vpack.c.bf16 %v2310_v13, %v2310_v13 }
 0x218   : > { %3938 = vmatpush3.bf16.msra.mxu0 %v4402_v35  ;;  %4365 = vset.pattern.permute.xlu1 %v4664_v17 }
 0x219   : > { %3939 = vmatprep.subr.bf16.mxu0 %v4404_v44  ;;  %4364 = vset.pattern.permute.xlu0 %v4664_v17 }
 0x21a   : > { %3989 = vmatpush3.bf16.msra.mxu1 %v4403_v45  ;;  %3040 = vperm.xlu1 %4365, %v3864_v15  }
 0x21b   : > { %3990 = vmatprep.subr.bf16.mxu1 %v4662_v57  ;;  %2986 = vperm.xlu0 %4364, %v2979_v19  }
 0x21c   : > { %3940 = vmatpush3.bf16.msra.mxu0 %v4405_v34 }
 0x21d   : > { %3941 = vmatprep.subr.bf16.mxu0 %v4407_v37 }
 0x21e   : > { %3991 = vmatpush3.bf16.msra.mxu1 %v4406_v39  ;;  %3236 = vperm.xlu1 %4365, %v3866_v41  }
 0x21f   : > { %3992 = vmatprep.subr.bf16.mxu1 %v4662_v57 }
 0x220   : > { %3942 = vmatpush3.bf16.msra.mxu0 %v4408_v47  ;;  %v3867_v47 = vld [vmem:[%s5541_s4 + $0x8] sm:$0x3] }
 0x221   : > { %3943 = vmatprep.subr.bf16.mxu0 %v4410_v48  ;;  %v3870_v48 = vld [vmem:[%s5541_s4 + $0xe] sm:$0x3] }
 0x222   : > { %3993 = vmatpush3.bf16.msra.mxu1 %v4409_v49  ;;  %v3868_v49 = vld [vmem:[%s5541_s4 + $0xa] sm:$0x3] }
 0x223   : > { %3994 = vmatprep.subr.bf16.mxu1 %v4662_v57 }
 0x224   : > { %3944 = vmatpush3.bf16.msra.mxu0 %v4411_v50  ;;  %v4665_v50 = vmov 842150450  }
 0x225   : > { %3945 = vmatprep.subr.bf16.mxu0 %v4413_v52  ;;  %v2949_v52 = vunpack.c.l.s4 %v4665_v50 }
 0x226   : > { %3995 = vmatpush3.bf16.msra.mxu1 %v4412_v53  ;;  %v4666_v53 = vmov 269488144  }
 0x227   : > { %3996 = vmatprep.subr.bf16.mxu1 %v4662_v57  ;;  %v2932_v55 = vunpack.c.l.s4 %v4666_v53 }
 0x228   : > { %3946 = vmatpush3.bf16.msra.mxu0 %v4414_v56  ;;  %v4667_v56 = vmov 1414812756  }
 0x229   : > { %3947 = vmatprep.subr.bf16.mxu0 %v4416_v59  ;;  %v2966_v58 = vunpack.c.l.s4 %v4667_v56  ;;  %v2933_v62 = vunpack.c.0.s8 %v2932_v55 }
 0x22a   : > { %3997 = vmatpush3.bf16.msra.mxu1 %v4415_v36  ;;  %v2950_v36 = vunpack.c.0.s8 %v2949_v52 }
 0x22b   : > { %3998 = vmatprep.subr.bf16.mxu1 %v4662_v57  ;;  %v2967_v2 = vunpack.c.0.s8 %v2966_v58 }
 0x22c   : > { %3948 = vmatpush3.bf16.msra.mxu0 %v4417_v4  ;;  %v2953_v5 = vsub.s32 %v2950_v36, %v5055_v51 }
 0x22d   : > { %3949 = vmatprep.subr.bf16.mxu0 %v4419_v63  ;;  %v2936_v63 = vsub.s32 %v2933_v62, %v5055_v51  ;;  %v2970_v6 = vsub.s32 %v2967_v2, %v5055_v51 }
 0x22e   : > { %3999 = vmatpush3.bf16.msra.mxu1 %v4418_v7 }
 0x22f   : > { %4000 = vmatprep.subr.bf16.mxu1 %v4662_v57  ;;  %v3869_v57 = vld [vmem:[%s5541_s4 + $0xc] sm:$0x3] }
 0x230   : > { %3950 = vmatpush3.bf16.msra.mxu0 %v4420_v10  ;;  %3359 = vperm.xlu1 %4365, %v3869_v57  }
 0x232   : > { %4001 = vmatpush3.bf16.msra.mxu1 %v4421_v12 }
 0x233   : > { %2879 = vmatmul.mubr.bf16.vlgmr.msra.gmra.mxu0 %v2315_v14 }
 0x234   : > { %3101 = vperm.xlu1 %4365, %v3865_v16  }
 0x235   : > { %4003 = vmatmul.mubr.bf16.vlgmr.msra.gmra.mxu1 %v2317_v0 }
 0x238   : > { %3390 = vperm.xlu1 %4365, %v3871_v18  }
 0x295   : > { %v3041_v59 = vpop.permute.xlu1 %3040 }
 0x296   : > { %v5233_v1 = vpop.permute.xlu0 %2986 }
 0x299   : > { %v5235_v4 = vpop.permute.xlu1 %3236 }
 0x2ab   : > { %v3360_v13 = vpop.permute.xlu1 %3359 }
 0x2d3   : > { %v3907_v20 = vpop.f32.mrf.mxu0 }
 0x2d5   : > { %v3929_v21 = vpop.f32.mrf.mxu1  ;;  %v3908_v22 = vpop.f32.mrf.mxu0 }
 0x2d6   : > { %v3909_v28 = vadd.f32 %v3908_v22, %v3907_v20 }
 0x2d7   : > { %v3930_v23 = vpop.f32.mrf.mxu1  ;;  %v3910_v24 = vpop.f32.mrf.mxu0 }
 0x2d8   : > { %v3931_v29 = vadd.f32 %v3930_v23, %v3929_v21 }
 0x2d9   : > { %v3932_v25 = vpop.f32.mrf.mxu1  ;;  %v3911_v26 = vpop.f32.mrf.mxu0 }
 0x2da   : > { %v2841_v35 = vadd.f32 %v3931_v29, %v3909_v28 }
 0x2db   : > { %v3933_v27 = vpop.f32.mrf.mxu1 }
 0x2f3   : > { %v3951_v30 = vpop.f32.mrf.mxu0 }
 0x2f5   : > { %v2920_v31 = vpop.f32.mrf.mxu1  ;;  %v3952_v33 = vpop.f32.mrf.mxu0 }
 0x2f6   : > { %v3953_v38 = vadd.f32 %v3952_v33, %v3951_v30 }
 0x2f7   : > { %v4004_v43 = vpop.f32.mrf.mxu1  ;;  %v3954_v44 = vpop.f32.mrf.mxu0 }
 0x2f8   : > { %v2881_v45 = vadd.f32 %v3953_v38, %v2841_v35 }
 0x2f9   : > { %v2923_v32 = vpop.f32.mrf.mxu1  ;;  %v3955_v34 = vpop.f32.mrf.mxu0 }
 0x2fa   : > { %v2921_v37 = vadd.f32 %v2920_v31, %v2881_v45 }
 0x2fb   : > { %v4005_v39 = vpop.f32.mrf.mxu1 }
 0x2fc   : > { %2978 = vst [vmem:[#allocation10] ss:$4 sps:$4 sm:$0x3f] %v2921_v37   ;;  %2928 = vperm.xlu0 %4364, %v2921_v37  }
 0x300   : > { %3248 = vperm.xlu0 %4364, %v3867_v47  }
 0x304   : > { %3371 = vperm.xlu0 %4364, %v3870_v48  }
 0x308   : > { %3267 = vperm.xlu0 %4364, %v3868_v49  }
 0x377   : > { %v5240_v7 = vpop.permute.xlu0 %2928 }
 0x378   : > { %v2954_v8 = vrot.slane %v5240_v7, %v2953_v5  ;;  %v5244_v9 = vsub.f32 %v2921_v37, %v5240_v7  ;;  %v2937_v10 = vrot.slane %v5240_v7, %v2936_v63  ;;  %v5248_v11 = vrot.slane %v5240_v7, 4 }
 0x379   : > { %v2971_v12 = vrot.slane %v5240_v7, %v2970_v6  ;;  %v5265_v18 = vrot.slane %v5240_v7, 2 }
 0x37a   : > { %5566 = vst [vmem:[#allocation21_spill] sm:$0xff] %v5248_v11  ;;  %v2956_v14 = vsub.f32 %v5136_v60, %v2954_v8  ;;  %v2957_v0 = vsub.f32 %v5139_v61, %v2954_v8  ;;  %v5254_v51 = vrot.slane %v5244_v9, 2  ;;  %v2939_v15 = vsub.f32 %v5119_v40, %v2937_v10 }
 0x37b   : > { %v3249_v17 = vpop.permute.xlu0 %3248  ;;  %v2940_v41 = vsub.f32 %v5121_v42, %v2937_v10  ;;  %v5259_v57 = vmul.f32 %v3360_v13, %v5244_v9  ;;  %v5262_v16 = vsub.f32 %v5169_v3, %v2971_v12  ;;  %5567 = vst [vmem:[#allocation22_spill] sm:$0xff] %v5265_v18  ;;  %v5276_v22 = vsub.f32 %v5182_v46, %v2971_v12 }
 0x37c   : > { %v3045_v60 = vcombine.high %v2956_v14, %v2956_v14  ;;  %v3052_v61 = vrot.slane %v2956_v14, %v5058_v54  ;;  %v3062_v19 = vcombine.high %v2957_v0, %v2957_v0  ;;  %v3069_v20 = vrot.slane %v2957_v0, %v5058_v54 }
 0x37d   : > { %v5270_v40 = vmul.f32 %v5254_v51, %v3041_v59  ;;  %v5273_v42 = vmul.f32 %v3249_v17, %v5254_v51  ;;  %v2991_v21 = vcombine.high %v2939_v15, %v2939_v15  ;;  %v5283_v29 = vrot.slane %v2939_v15, %v5058_v54 }
 0x37e   : > { %v3059_v3 = vrot.slane %v3045_v60, %v5058_v54  ;;  %v3060_v23 = vcombine.high %v3052_v61, %v3052_v61  ;;  %v3076_v24 = vrot.slane %v3062_v19, %v5058_v54  ;;  %v3077_v25 = vcombine.high %v3069_v20, %v3069_v20 }
 0x37f   : > { %5568 = vst [vmem:[#allocation23_spill] sm:$0xff] %v5273_v42  ;;  %v3085_v26 = vmul.f32 %v3052_v61, %v3041_v59  ;;  %v3089_v27 = vmul.f32 %v3069_v20, %v3041_v59  ;;  %v5280_v28 = vmul.f32 %v3249_v17, %v3052_v61  ;;  %v5285_v35 = vmul.f32 %v3249_v17, %v3069_v20  ;;  %v3372_v45 = vpop.permute.xlu0 %3371 }
 0x380   : > { %v3061_v30 = vcombine.high %v3059_v3, %v3059_v3  ;;  %v3086_v31 = vmul.f32 %v3060_v23, %v3041_v59  ;;  %v3087_v33 = vmul.f32 %v3059_v3, %v3041_v59  ;;  %v3090_v46 = vmul.f32 %v3077_v25, %v3041_v59 }
 0x381   : > { %v3091_v38 = vmul.f32 %v3076_v24, %v3041_v59  ;;  %v5287_v43 = vmul.f32 %v3249_v17, %v3060_v23  ;;  %v5289_v44 = vmul.f32 %v3249_v17, %v3059_v3  ;;  %v5293_v37 = vmul.f32 %v3249_v17, %v3077_v25 }
 0x382   : > { %v3088_v32 = vmul.f32 %v3061_v30, %v3041_v59  ;;  %v5291_v34 = vmul.f32 %v3249_v17, %v3061_v30  ;;  %v5296_v39 = vrot.slane %v2991_v21, %v5058_v54  ;;  %v3006_v47 = vcombine.high %v5283_v29, %v5283_v29 }
 0x383   : > { %v3008_v48 = vcombine.high %v2940_v41, %v2940_v41  ;;  %v5301_v49 = vrot.slane %v2940_v41, %v5058_v54  ;;  %v3362_v50 = vmul.f32 %v3360_v13, %v5283_v29  ;;  %v3374_v55 = vmul.f32 %v3372_v45, %v3052_v61 }
 0x384   : > { %v5306_v52 = vcombine.high %v5296_v39, %v5296_v39  ;;  %v3364_v53 = vmul.f32 %v3360_v13, %v5296_v39  ;;  %v3375_v56 = vmul.f32 %v3372_v45, %v3060_v23  ;;  %v3363_v36 = vmul.f32 %v3360_v13, %v3006_v47 }
 0x385   : > { %v5310_v58 = vrot.slane %v3008_v48, %v5058_v54  ;;  %v5314_v59 = vcombine.high %v5301_v49, %v5301_v49  ;;  %v3366_v62 = vmul.f32 %v3360_v13, %v5301_v49  ;;  %v3376_v5 = vmul.f32 %v3372_v45, %v3059_v3 }
 0x386   : > { %v3365_v2 = vmul.f32 %v3360_v13, %v5306_v52  ;;  %v3377_v63 = vmul.f32 %v3372_v45, %v3061_v30  ;;  %v3378_v6 = vmul.f32 %v3372_v45, %v3069_v20  ;;  %v3379_v12 = vmul.f32 %v3372_v45, %v3077_v25 }
 0x387   : > { %v3367_v8 = vmul.f32 %v3360_v13, %v5314_v59  ;;  %v3368_v10 = vmul.f32 %v3360_v13, %v5310_v58  ;;  %v3380_v14 = vmul.f32 %v3372_v45, %v3076_v24  ;;  %v5320_v0 = vmul.f32 %v3249_v17, %v3076_v24 }
 0x388   : > { %v5322_v15 = vadd.f32 %v3374_v55, %v3362_v50  ;;  %v5324_v41 = vadd.f32 %v3375_v56, %v3363_v36  ;;  %v5326_v60 = vadd.f32 %v3376_v5, %v3364_v53  ;;  %v5328_v61 = vadd.f32 %v3377_v63, %v3365_v2 }
 0x389   : > { %v5330_v19 = vadd.f32 %v3378_v6, %v3366_v62  ;;  %v5332_v21 = vadd.f32 %v3379_v12, %v3367_v8  ;;  %v5334_v20 = vadd.f32 %v3380_v14, %v3368_v10  ;;  %v3031_v13 = vmul.f32 %v5283_v29, %v5233_v1 }
 0x38a   : > { %v3032_v17 = vmul.f32 %v3006_v47, %v5233_v1  ;;  %v3033_v3 = vmul.f32 %v5296_v39, %v5233_v1  ;;  %v3034_v23 = vmul.f32 %v5306_v52, %v5233_v1  ;;  %v3462_v24 = vmul.f32 %v3372_v45, %v5254_v51 }
 0x38b   : > { %v3035_v25 = vmul.f32 %v5301_v49, %v5233_v1  ;;  %v3036_v30 = vmul.f32 %v5314_v59, %v5233_v1  ;;  %v3037_v48 = vmul.f32 %v5310_v58, %v5233_v1  ;;  %v3092_v50 = vadd.f32 %v3085_v26, %v3031_v13 }
 0x38c   : > { %v3093_v53 = vadd.f32 %v3086_v31, %v3032_v17  ;;  %v3094_v55 = vadd.f32 %v3087_v33, %v3033_v3  ;;  %v3095_v56 = vadd.f32 %v3088_v32, %v3034_v23  ;;  %v3106_v5 = vcombine.high %v5262_v16, %v5262_v16 }
 0x38d   : > { %v3096_v36 = vadd.f32 %v3089_v27, %v3035_v25  ;;  %v3097_v62 = vadd.f32 %v3090_v46, %v3036_v30  ;;  %v3098_v2 = vadd.f32 %v3091_v38, %v3037_v48  ;;  %v5354_v51 = vrot.slane %v5262_v16, %v5058_v54  ;;  %v3102_v27 = vpop.permute.xlu1 %3101 }
 0x38e   : > { %v3123_v45 = vcombine.high %v5276_v22, %v5276_v22  ;;  %v5360_v63 = vrot.slane %v5276_v22, %v5058_v54  ;;  %v3211_v26 = vmul.f32 %v5233_v1, %v5244_v9  ;;  %v5365_v31 = vrot.slane %v3106_v5, %v5058_v54 }
 0x38f   : > { %v5368_v33 = vrot.slane %v5244_v9, 4  ;;  %v3239_v16 = vmul.f32 %v5235_v4, %v5283_v29  ;;  %v3240_v46 = vmul.f32 %v5235_v4, %v3006_v47  ;;  %v5375_v38 = vcombine.high %v5354_v51, %v5354_v51 }
 0x390   : > { %v5378_v22 = vrot.slane %v3123_v45, %v5058_v54  ;;  %v5382_v1 = vcombine.high %v5360_v63, %v5360_v63  ;;  %v3146_v32 = vmul.f32 %v5354_v51, %v3102_v27  ;;  %v5387_v6 = vcombine.high %v5365_v31, %v5365_v31 }
 0x391   : > { %v3148_v29 = vmul.f32 %v5365_v31, %v3102_v27  ;;  %v3150_v47 = vmul.f32 %v5360_v63, %v3102_v27  ;;  %v3216_v8 = vadd.f32 %v5270_v40, %v3211_v26  ;;  %v3147_v10 = vmul.f32 %v5375_v38, %v3102_v27 }
 0x392   : > { %v3151_v12 = vmul.f32 %v5382_v1, %v3102_v27  ;;  %v3152_v14 = vmul.f32 %v5378_v22, %v3102_v27  ;;  %v3153_v13 = vadd.f32 %v3146_v32, %v3092_v50  ;;  %v3149_v17 = vmul.f32 %v5387_v6, %v3102_v27 }
 0x393   : > { %v3155_v3 = vadd.f32 %v3148_v29, %v3094_v55  ;;  %v3157_v23 = vadd.f32 %v3150_v47, %v3096_v36  ;;  %v3219_v25 = vmul.f32 %v5368_v33, %v3102_v27  ;;  %v3154_v30 = vadd.f32 %v3147_v10, %v3093_v53 }
 0x394   : > { %v3158_v48 = vadd.f32 %v3151_v12, %v3097_v62  ;;  %v3159_v5 = vadd.f32 %v3152_v14, %v3098_v2  ;;  %v3160_v45 = vadd.f32 %v3153_v13, %v5240_v7  ;;  %v3156_v42 = vadd.f32 %v3149_v17, %v3095_v56 }
 0x395   : > { %v3162_v40 = vadd.f32 %v3155_v3, %v5240_v7  ;;  %v3164_v26 = vadd.f32 %v3157_v23, %v5240_v7  ;;  %v3220_v18 = vadd.f32 %v3219_v25, %v3216_v8  ;;  %v3161_v11 = vadd.f32 %v3154_v30, %v5240_v7  ;;  %v3268_v30 = vpop.permute.xlu0 %3267 }
 0x396   : > { %v3165_v50 = vadd.f32 %v3158_v48, %v5240_v7  ;;  %v3166_v55 = vadd.f32 %v3159_v5, %v5240_v7  ;;  %v3241_v36 = vmul.f32 %v5235_v4, %v5296_v39  ;;  %v3163_v53 = vadd.f32 %v3156_v42, %v5240_v7 }
 0x397   : > { %v3221_v62 = vadd.f32 %v3220_v18, %v5240_v7  ;;  %v3242_v56 = vmul.f32 %v5235_v4, %v5306_v52  ;;  %v3243_v2 = vmul.f32 %v5235_v4, %v5301_v49  ;;  %v3463_v27 = vadd.f32 %v3462_v24, %v5259_v57  ;;  %v3391_v52 = vpop.permute.xlu1 %3390 }
 0x398   : > { %v3174_v32 = vcombine.low %v3160_v45, %v3161_v11  ;;  %v3191_v29 = vcombine.low %v3164_v26, %v3165_v50  ;;  %v3244_v47 = vmul.f32 %v5235_v4, %v5314_v59  ;;  %v3175_v8 = vcombine.low %v3162_v40, %v3163_v53 }
 0x399   : > { %v3205_v39 = vrot.slane %v3166_v55, %v5058_v54  ;;  %3222 = vst [vmem:[#allocation13] sm:$0x3] %v3221_v62  ;;  %v3245_v7 = vmul.f32 %v5235_v4, %v5310_v58  ;;  %v3258_v18 = vadd.f32 %v5280_v28, %v3239_v16  ;;  %v3259_v57 = vadd.f32 %v5287_v43, %v3240_v46 }
 0x39a   : > { %v3182_v42 = vrot.slane %v3174_v32, %v5058_v54  ;;  %v3198_v49 = vrot.slane %v3191_v29, %v5058_v54  ;;  %v3260_v11 = vadd.f32 %v5289_v44, %v3241_v36  ;;  %v3189_v59 = vrot.slane %v3175_v8, %v5058_v54 }
 0x39b   : > { %v3261_v24 = vadd.f32 %v5291_v34, %v3242_v56  ;;  %v3262_v10 = vadd.f32 %v5285_v35, %v3243_v2  ;;  %v3263_v12 = vadd.f32 %v5293_v37, %v3244_v47  ;;  %v3264_v28 = vadd.f32 %v5320_v0, %v3245_v7 }
 0x39c   : > { %v3206_v58 = vcombine.low %v3198_v49, %v3205_v39  ;;  %v3393_v16 = vmul.f32 %v3391_v52, %v5354_v51  ;;  %v3394_v14 = vmul.f32 %v3391_v52, %v5375_v38  ;;  %v3190_v13 = vcombine.low %v3182_v42, %v3189_v59 }
 0x39d   : > { %v3395_v43 = vmul.f32 %v3391_v52, %v5365_v31  ;;  %v3396_v44 = vmul.f32 %v3391_v52, %v5387_v6  ;;  %v3397_v46 = vmul.f32 %v3391_v52, %v5360_v63  ;;  %v3338_v35 = vmul.f32 %v5235_v4, %v5244_v9  ;;  %v5569_v9 = vld [vmem:[#allocation21_spill] sm:$0xff] }
 0x39e   : > { %3210 = vst [vmem:[#allocation12 + $0x8] sm:$0x3f] %v3206_v58  ;;  %v3398_v34 = vmul.f32 %v3391_v52, %v5382_v1  ;;  %v3399_v37 = vmul.f32 %v3391_v52, %v5378_v22  ;;  %v3400_v0 = vadd.f32 %v3393_v16, %v5322_v15  ;;  %3209 = vst [vmem:[#allocation12] sm:$0xff] %v3190_v13  ;;  %v5570_v58 = vld [vmem:[#allocation22_spill] sm:$0xff] }
 0x39f   : > { %v3401_v17 = vadd.f32 %v3394_v14, %v5324_v41  ;;  %v3402_v3 = vadd.f32 %v3395_v43, %v5326_v60  ;;  %v3403_v23 = vadd.f32 %v3396_v44, %v5328_v61  ;;  %v3404_v25 = vadd.f32 %v3397_v46, %v5330_v19 }
 0x3a0   : > { %v3405_v48 = vadd.f32 %v3398_v34, %v5332_v21  ;;  %v3406_v4 = vadd.f32 %v3399_v37, %v5334_v20  ;;  %v3409_v5 = vadd.f32 %v5569_v9, %v3400_v0  ;;  %v3464_v45 = vmul.f32 %v3391_v52, %v5368_v33 }
 0x3a1   : > { %v3410_v15 = vadd.f32 %v5569_v9, %v3401_v17  ;;  %v3411_v40 = vadd.f32 %v5569_v9, %v3402_v3  ;;  %v3412_v41 = vadd.f32 %v5569_v9, %v3403_v23  ;;  %v3413_v60 = vadd.f32 %v5569_v9, %v3404_v25 }
 0x3a2   : > { %v3414_v61 = vadd.f32 %v5569_v9, %v3405_v48  ;;  %v3415_v19 = vadd.f32 %v5569_v9, %v3406_v4  ;;  %v3465_v26 = vadd.f32 %v3464_v45, %v3463_v27  ;;  %v3270_v21 = vmul.f32 %v3268_v30, %v5354_v51 }
 0x3a3   : > { %v3423_v20 = vcombine.low %v3409_v5, %v3410_v15  ;;  %v3424_v50 = vcombine.low %v3411_v40, %v3412_v41  ;;  %v3271_v55 = vmul.f32 %v3268_v30, %v5375_v38  ;;  %v3272_v36 = vmul.f32 %v3268_v30, %v5365_v31 }
 0x3a4   : > { %v3440_v53 = vcombine.low %v3413_v60, %v3414_v61  ;;  %v3454_v62 = vrot.slane %v3415_v19, %v5058_v54  ;;  %v3466_v56 = vadd.f32 %v3465_v26, %v5569_v9  ;;  %v3273_v2 = vmul.f32 %v3268_v30, %v5387_v6 }
 0x3a5   : > { %v3431_v32 = vrot.slane %v3423_v20, %v5058_v54  ;;  %v3438_v29 = vrot.slane %v3424_v50, %v5058_v54  ;;  %v3274_v27 = vmul.f32 %v3268_v30, %v5360_v63  ;;  %v3275_v51 = vmul.f32 %v3268_v30, %v5382_v1 }
 0x3a6   : > { %v3447_v47 = vrot.slane %v3440_v53, %v5058_v54  ;;  %3468 = vst [vmem:[#allocation13 + $0x4] sm:$0x3] %v3466_v56  ;;  %v3276_v31 = vmul.f32 %v3268_v30, %v5378_v22  ;;  %v3277_v38 = vadd.f32 %v3270_v21, %v3258_v18  ;;  %v3278_v8 = vadd.f32 %v3271_v55, %v3259_v57  ;;  %v5571_v18 = vld [vmem:[#allocation23_spill] sm:$0xff] }
 0x3a7   : > { %v3439_v39 = vcombine.low %v3431_v32, %v3438_v29  ;;  %v3279_v7 = vadd.f32 %v3272_v36, %v3260_v11  ;;  %v3280_v42 = vadd.f32 %v3273_v2, %v3261_v24  ;;  %v3281_v49 = vadd.f32 %v3274_v27, %v3262_v10 }
 0x3a8   : > { %v3455_v6 = vcombine.low %v3447_v47, %v3454_v62  ;;  %v3282_v52 = vadd.f32 %v3275_v51, %v3263_v12  ;;  %v3283_v59 = vadd.f32 %v3276_v31, %v3264_v28  ;;  %v3286_v16 = vadd.f32 %v5570_v58, %v3277_v38 }
 0x3a9   : > { %3459 = vst [vmem:[#allocation12 + $0x1c] sm:$0xff] %v3439_v39  ;;  %v3287_v63 = vadd.f32 %v5570_v58, %v3278_v8  ;;  %v3288_v1 = vadd.f32 %v5570_v58, %v3279_v7  ;;  %v3289_v14 = vadd.f32 %v5570_v58, %v3280_v42  ;;  %v3290_v22 = vadd.f32 %v5570_v58, %v3281_v49 }
 0x3aa   : > { %v3340_v57 = vadd.f32 %v5571_v18, %v3338_v35  ;;  %3460 = vst [vmem:[#allocation12 + $0x24] sm:$0x3f] %v3455_v6  ;;  %v3291_v11 = vadd.f32 %v5570_v58, %v3282_v52  ;;  %v3292_v24 = vadd.f32 %v5570_v58, %v3283_v59  ;;  %v3341_v10 = vmul.f32 %v3268_v30, %v5368_v33 }
 0x3ab   : > { %v3300_v12 = vcombine.low %v3286_v16, %v3287_v63  ;;  %v3301_v28 = vcombine.low %v3288_v1, %v3289_v14 }
 0x3ac   : > { %v3317_v13 = vcombine.low %v3290_v22, %v3291_v11  ;;  %v3342_v43 = vadd.f32 %v3341_v10, %v3340_v57  ;;  %v3331_v37 = vrot.slane %v3292_v24, %v5058_v54 }
 0x3ad   : > { %v3308_v44 = vrot.slane %v3300_v12, %v5058_v54  ;;  %v3315_v46 = vrot.slane %v3301_v28, %v5058_v54 }
 0x3ae   : > { %v3324_v34 = vrot.slane %v3317_v13, %v5058_v54  ;;  %v3343_v35 = vadd.f32 %v3342_v43, %v5570_v58 }
 0x3af   : > { %v3316_v0 = vcombine.low %v3308_v44, %v3315_v46 }
 0x3b0   : > { %v3332_v17 = vcombine.low %v3324_v34, %v3331_v37  ;;  %3345 = vst [vmem:[#allocation13 + $0x2] sm:$0x3] %v3343_v35 }
 0x3b1   : > { %3336 = vst [vmem:[#allocation12 + $0xe] sm:$0xff] %v3316_v0 }
 0x3b2   : > { %3337 = vst [vmem:[#allocation12 + $0x16] sm:$0x3f] %v3332_v17 }
 0x3b3 PF: > { %p4051_p11 = scmp.eq.s32.totalorder %s4740_s9, 3  ;;  %s4668_s19 = smov [#allocation10]  }
 0x3b4   : > { %s3488_s11 = sshll.u32 %s4668_s19, 4  ;;  %s3489_s11 = int_to_ptr.vmem [resolvable:$true] %s3488_s11 }
 0x3b5   : > { %s4502_s12 = scalar_lea.vmem %s3489_s11, 96  ;;  %p4509_p3 = scmp.lt.s32.totalorder %s3489_s11, %s3489_s11 }
 0x3b6   : > { %p4503_p4 = scmp.ne.s32.totalorder %s3489_s11, %s4502_s12  ;;  %p4510_p5 = scmp.lt.s32.totalorder %s4502_s12, %s4502_s12 }
 0x3b8   : > { %p4504_p12 = pnand %p4503_p4, %p4051_p11  ;;  %p4511_p10 = por %p4510_p5, %p4509_p3 }
 0x3ba   : > { %p4505_p2 = pneg %p4504_p12 }
 0x3bc   : > { %p4512_p9 = pnand %p4511_p10, %p4505_p2 }
 0x3be   : > { %4515 = shalt.err (!%p4512_p9)
}
 0x3bf   : > { %s4669_s14 = smov 32   ;;  %s4670_s17 = smov 2  }
 0x3c0   : > { %4022 = dma.vmem_to_hbm [thread:$0]  (%p4051_p11), %s3489_s11, 96, %s5543_s6, [#allocation11], %s4669_s14, %s4669_s14, %s4670_s17  }
 0x3c1   : > { %s4671_s23 = smov [#allocation9]  }
 0x3c2   : > { %s3475_s13 = sshll.u32 %s4671_s23, 4  ;;  %s3476_s13 = int_to_ptr.vmem [resolvable:$true] %s3475_s13 }
 0x3c3   : > { %s4526_s24 = scalar_lea.vmem %s3476_s13, 672  ;;  %p4533_p1 = scmp.lt.s32.totalorder %s3476_s13, %s3476_s13 }
 0x3c4   : > { %p4527_p13 = scmp.ne.s32.totalorder %s3476_s13, %s4526_s24  ;;  %p4534_p6 = scmp.lt.s32.totalorder %s4526_s24, %s4526_s24 }
 0x3c6   : > { %p4528_p0 = pnand %p4527_p13, %p4051_p11  ;;  %p4535_p7 = por %p4534_p6, %p4533_p1 }
 0x3c8   : > { %p4529_p8 = pneg %p4528_p0 }
 0x3ca   : > { %p4536_p4 = pnand %p4535_p7, %p4529_p8 }
 0x3cc   : > { %4539 = shalt.err (!%p4536_p4)
}
 0x3cd   : > { %s4672_s25 = smov 224   ;;  %s4673_s27 = smov 14  }
 0x3ce   : > { %4020 = dma.vmem_to_hbm [thread:$0]  (%p4051_p11), %s3476_s13, 672, %s5542_s5, [#allocation5], %s4672_s25, %s4672_s25, %s4673_s27  }
 0x3cf   : > { %s4674_s2 = smov [#allocation12]   ;;  %s4675_s22 = smov [#allocation13]  }
 0x3d0   : > { %s3501_s16 = sshll.u32 %s4674_s2, 4  ;;  %s3514_s26 = sshll.u32 %s4675_s22, 4  ;;  %s3502_s16 = int_to_ptr.vmem [resolvable:$true] %s3501_s16  ;;  %s3515_s26 = int_to_ptr.vmem [resolvable:$true] %s3514_s26 }
 0x3d1   : > { %s4550_s15 = scalar_lea.vmem %s3502_s16, 672  ;;  %p4557_p5 = scmp.lt.s32.totalorder %s3502_s16, %s3502_s16 }
 0x3d2   : > { %p4551_p12 = scmp.ne.s32.totalorder %s3502_s16, %s4550_s15  ;;  %p4558_p10 = scmp.lt.s32.totalorder %s4550_s15, %s4550_s15 }
 0x3d4   : > { %p4552_p2 = pnand %p4551_p12, %p4051_p11  ;;  %p4559_p9 = por %p4558_p10, %p4557_p5 }
 0x3d6   : > { %p4553_p3 = pneg %p4552_p2 }
 0x3d8   : > { %p4560_p13 = pnand %p4559_p9, %p4553_p3 }
 0x3da   : > { %4563 = shalt.err (!%p4560_p13)
}
 0x3db   : > { %4024 = dma.vmem_to_hbm [thread:$0]  (%p4051_p11), %s3502_s16, 672, %s5544_s7, [#allocation11], %s4672_s25, %s4672_s25, %s4673_s27  }
 0x3dc   : > { %s4574_s12 = scalar_lea.vmem %s3515_s26, 96  ;;  %p4581_p6 = scmp.lt.s32.totalorder %s3515_s26, %s3515_s26 }
 0x3dd   : > { %p4575_p0 = scmp.ne.s32.totalorder %s3515_s26, %s4574_s12  ;;  %p4582_p7 = scmp.lt.s32.totalorder %s4574_s12, %s4574_s12 }
 0x3df   : > { %p4576_p8 = pnand %p4575_p0, %p4051_p11  ;;  %p4583_p4 = por %p4582_p7, %p4581_p6 }
 0x3e1   : > { %p4577_p1 = pneg %p4576_p8 }
 0x3e3   : > { %p4584_p12 = pnand %p4583_p4, %p4577_p1 }
 0x3e5   : > { %4587 = shalt.err (!%p4584_p12)
}
 0x3e6   : > { %4026 = dma.vmem_to_hbm [thread:$0]  (%p4051_p11), %s3515_s26, 96, %s5545_s8, [#allocation14], %s4669_s14, %s4669_s14, %s4670_s17  }
 0x3e7   : > { %4623 = dma.done.wait (%p4051_p11), [#allocation5], 672  }
 0x3e8   : > { %4625 = vsyncadd (%p4051_p11), [#allocation5], 4294966624 }
 0x3e9   : > { %4627 = dma.done.wait (%p4051_p11), [#allocation11], 768  }
 0x3ea   : > { %4629 = vsyncadd (%p4051_p11), [#allocation11], 4294966528 }
 0x3eb   : > { %4631 = dma.done.wait (%p4051_p11), [#allocation14], 96  }
 0x3ec   : > { %4633 = vsyncadd (%p4051_p11), [#allocation14], 4294967200 }
 0x3ed PF: > { %s5572_s14 = sld [smem:[#allocation20_spill]]  ;;  %p23_p2 = scmp.ge.s32.totalorder %s4743_s10, 6  }
 0x3ee   : > { %s5573_s27 = smov %s4640_s28  ;;  %s5574_s28 = smov %s4644_s29 }
 0x3ef   : > { %s5576_s30 = smov %s4743_s10  ;;  %25 = sbr.rel (!%p23_p2) target bundleno = 9 (0x9), region = 136 }
 0x3f3   : > { %s5575_s29 = smov %s5572_s14 }
 0x3f4   :  { %3542 = vsyncpa [#allocation4], 1 }
 0x3f5   :  { %3544 = vsyncpa [#allocation4 + $0x1], 1 }
 0x3f6   :  { %3545 = vsyncpa [#allocation7], 1 }
 0x3f7   :  { %3546 = vsyncpa [#allocation5], 1 }
 0x3f8   :  { %3548 = vsyncpa [#allocation5 + $0x1], 1 }
 0x3f9   :  { %3549 = vsyncpa [#allocation11], 1 }
 0x3fa   :  { %3550 = vsyncpa [#allocation14], 1 }

</bundles_post_ra>
